<compile_context>
chip_gen: v5e
topology: v5e:2x2
jax: 0.10.0
libtpu: 0.0.40
codegen_flags: <defaults>
</compile_context>

<pallas_src>
import functools

import jax
import jax.numpy as jnp
import numpy as np
from jax import lax
from jax.experimental import pallas as pl
from jax.experimental.pallas import tpu as pltpu


# --------------------------------------------------------------------------
# Kernel helpers
# --------------------------------------------------------------------------
def _store_padded(pad_ref, center):
    """Write `center` (H, W, C) into pad_ref's interior and zero the 1-px border.

    Only the four border strips are zeroed each step (the interior is fully
    overwritten), avoiding a full-buffer re-zero per grid iteration.
    """
    Hp2, Wp2, C = pad_ref.shape
    H, W = Hp2 - 2, Wp2 - 2
    dt = pad_ref.dtype
    pad_ref[0:1, :, :] = jnp.zeros((1, Wp2, C), dt)
    pad_ref[H + 1:H + 2, :, :] = jnp.zeros((1, Wp2, C), dt)
    pad_ref[:, 0:1, :] = jnp.zeros((Hp2, 1, C), dt)
    pad_ref[:, W + 1:W + 2, :] = jnp.zeros((Hp2, 1, C), dt)
    pad_ref[1:H + 1, 1:W + 1, :] = center.astype(dt)


def _conv3x3_acc(pad_ref, w_ref):
    """3x3 'same' conv as 9 accumulating MXU matmuls (no materialized im2col).

    pad_ref: (H+2, W+2, C) zero-padded input scratch, compute dtype.
    w_ref:   (9, C, Cout) BN-folded weights, taps in (kh, kw) order along dim 0.
    Returns (H*W, Cout) float32.
    """
    Hp2, Wp2, C = pad_ref.shape
    H, W = Hp2 - 2, Wp2 - 2
    acc = None
    for kh in range(3):
        for kw in range(3):
            tap = pad_ref[kh:kh + H, kw:kw + W, :].reshape(H * W, C)
            part = jnp.dot(tap, w_ref[kh * 3 + kw],
                           preferred_element_type=jnp.float32)
            acc = part if acc is None else acc + part
    return acc


def _store_lane_dense(o_ref, out, H, W, Cout):
    """Store (H*W, Cout) `out` into the lane-dense (1, H, W*Cout) o_ref block.

    Per-column masked VMEM stores do the relayout (only safe, always-lowerable
    ops: split-leading reshape + static middle-dim slice + masked ref store);
    the HBM writeback DMA of the (H, W*Cout) block is then fully lane-dense.
    """
    out3 = out.reshape(H, W, Cout)          # split leading dims only (free)
    for w in range(W):
        o_ref[0, :, w * Cout:(w + 1) * Cout] = out3[:, w, :]


def _block_body(x_ref, w1_ref, b1_ref, w2_ref, b2_ref, o_ref,
                pad1_ref, pad2_ref, shortcut_fn, dense_out):
    _, H, W, Cin = x_ref.shape
    Cout = w1_ref.shape[2]

    x = x_ref[0]                                          # (H, W, Cin) compute dtype

    # ---- conv1 (BN1 scale folded into w1) + bias + relu -----------------------
    _store_padded(pad1_ref, x)
    h1 = _conv3x3_acc(pad1_ref, w1_ref) + b1_ref[...]     # (H*W, Cout) f32
    h1 = jnp.maximum(h1, 0.0)

    # ---- conv2 (BN2 scale folded into w2) + bias -------------------------------
    # Note: on the bf16 path h1 is re-quantized to bf16 here (deliberate
    # accuracy/bandwidth tradeoff, covered by the loose bf16 test tolerance).
    _store_padded(pad2_ref, h1.reshape(H, W, Cout))
    h2 = _conv3x3_acc(pad2_ref, w2_ref) + b2_ref[...]     # (H*W, Cout) f32

    # ---- shortcut (extra accumulating matmul or VPU add) + residual + relu -----
    sc = shortcut_fn(x.reshape(H * W, Cin))               # (H*W, Cout) f32
    out = jnp.maximum(h2 + sc, 0.0).astype(o_ref.dtype)

    if dense_out:
        _store_lane_dense(o_ref, out, H, W, Cout)
    else:
        o_ref[0] = out


def _projection_kernel(x_ref, w1_ref, b1_ref, w2_ref, b2_ref, wsc_ref, bsc_ref,
                       o_ref, pad1_ref, pad2_ref, *, dense_out):
    def shortcut(x2d):
        # Fused as the extra accumulating matmul of the conv2 stage.
        return jnp.dot(x2d, wsc_ref[...],
                       preferred_element_type=jnp.float32) + bsc_ref[...]
    _block_body(x_ref, w1_ref, b1_ref, w2_ref, b2_ref, o_ref,
                pad1_ref, pad2_ref, shortcut, dense_out)


def _identity_kernel(x_ref, w1_ref, b1_ref, w2_ref, b2_ref,
                     o_ref, pad1_ref, pad2_ref, *, dense_out):
    def shortcut(x2d):
        return x2d.astype(jnp.float32)                    # identity: plain VPU add
    _block_body(x_ref, w1_ref, b1_ref, w2_ref, b2_ref, o_ref,
                pad1_ref, pad2_ref, shortcut, dense_out)


# --------------------------------------------------------------------------
# Wrapper: NHWC core entry point + NCHW (PyTorch-convention) wrapper.
# --------------------------------------------------------------------------
def _fold_bn(gamma, beta, rmean, rvar, eps=1e-5):
    scale = gamma / jnp.sqrt(rvar + eps)
    bias = beta - rmean * scale
    return scale, bias


def _vmem_capacity_bytes():
    try:
        info = pltpu.get_tpu_info()
        cap = getattr(info, "vmem_capacity_bytes", None)
        if cap:
            return int(cap)
    except Exception:
        pass
    return 64 * 1024 * 1024          # conservative fallback: v7x per-TC VMEM


def _vmem_limit_bytes(H, W, Cin, Cout, itemsize, has_projection):
    est = 2 * H * W * Cin * itemsize                          # double-buffered input
    est += 2 * H * W * Cout * itemsize                        # double-buffered output
    w_elems = 9 * Cin * Cout + 9 * Cout * Cout
    if has_projection:
        w_elems += Cin * Cout
    est += 2 * w_elems * itemsize                             # weights (+ buffering)
    est += (H + 2) * (W + 2) * (Cin + Cout) * itemsize        # padded scratches
    est += 4 * H * W * Cout * 4                               # f32 live h1/h2/acc
    cap = _vmem_capacity_bytes()
    # headroom for compiler temporaries / spills; never request > 75% of VMEM.
    return int(min(max(4 * est, 16 * 1024 * 1024), (cap * 3) // 4))


def resnet_block_forward_nhwc(x_nhwc, params, compute_dtype=jnp.float32):
    """Eval-mode ResNetBlock forward, NHWC in -> NHWC out (compute-dtype out)."""
    N, H, W, Cin = x_nhwc.shape
    Cout = params["w1"].shape[0]
    cdt = jnp.dtype(compute_dtype)

    x = x_nhwc.astype(cdt)

    s1, b1 = _fold_bn(params["g1"], params["be1"], params["rm1"], params["rv1"])
    s2, b2 = _fold_bn(params["g2"], params["be2"], params["rm2"], params["rv2"])

    # OIHW -> (kh, kw, Cin, Cout), fold BN scale per output channel, -> (9, C, Cout)
    w1 = (jnp.transpose(params["w1"], (2, 3, 1, 0)) * s1).reshape(9, Cin, Cout)
    w2 = (jnp.transpose(params["w2"], (2, 3, 1, 0)) * s2).reshape(9, Cout, Cout)
    w1, w2 = w1.astype(cdt), w2.astype(cdt)
    b1 = b1.reshape(1, Cout).astype(jnp.float32)
    b2 = b2.reshape(1, Cout).astype(jnp.float32)

    # Lane-dense output slab when Cout alone is not lane-dense but W*Cout is.
    dense_out = (Cout % 128 != 0) and ((W * Cout) % 128 == 0)
    if dense_out:
        out_shape = jax.ShapeDtypeStruct((N, H, W * Cout), cdt)
        out_spec = pl.BlockSpec((1, H, W * Cout), lambda n: (n, 0, 0))
    else:
        out_shape = jax.ShapeDtypeStruct((N, H * W, Cout), cdt)
        out_spec = pl.BlockSpec((1, H * W, Cout), lambda n: (n, 0, 0))

    has_projection = "wsc" in params
    if has_projection:
        ssc, bsc = _fold_bn(params["gsc"], params["besc"],
                            params["rmsc"], params["rvsc"])
        wsc = (jnp.transpose(params["wsc"][:, :, 0, 0], (1, 0)) * ssc).astype(cdt)
        bsc = bsc.reshape(1, Cout).astype(jnp.float32)
        kernel = functools.partial(_projection_kernel, dense_out=dense_out)
        extra_inputs = [wsc, bsc]
        extra_specs = [pl.BlockSpec((Cin, Cout), lambda n: (0, 0)),
                       pl.BlockSpec((1, Cout), lambda n: (0, 0))]
    else:
        assert Cin == Cout, "identity shortcut requires Cin == Cout"
        kernel = functools.partial(_identity_kernel, dense_out=dense_out)
        extra_inputs = []
        extra_specs = []

    out = pl.pallas_call(
        kernel,
        out_shape=out_shape,
        grid_spec=pltpu.PrefetchScalarGridSpec(
            num_scalar_prefetch=0,
            grid=(N,),
            in_specs=[
                pl.BlockSpec((1, H, W, Cin), lambda n: (n, 0, 0, 0)),   # x (unpadded)
                pl.BlockSpec((9, Cin, Cout), lambda n: (0, 0, 0)),      # w1 * s1
                pl.BlockSpec((1, Cout), lambda n: (0, 0)),              # bn1 bias
                pl.BlockSpec((9, Cout, Cout), lambda n: (0, 0, 0)),     # w2 * s2
                pl.BlockSpec((1, Cout), lambda n: (0, 0)),              # bn2 bias
            ] + extra_specs,
            out_specs=out_spec,
            scratch_shapes=[
                pltpu.VMEM((H + 2, W + 2, Cin), cdt),    # padded conv1 input
                pltpu.VMEM((H + 2, W + 2, Cout), cdt),   # padded conv2 input
            ],
        ),
        compiler_params=pltpu.CompilerParams(
            dimension_semantics=("parallel",),           # batch elems independent
            vmem_limit_bytes=_vmem_limit_bytes(H, W, Cin, Cout, cdt.itemsize,
                                               has_projection),
        ),
    )(x, w1, b1, w2, b2, *extra_inputs)

    return out.reshape(N, H, W, Cout)


@functools.partial(jax.jit, static_argnames=("compute_dtype",))
def resnet_block_forward(x_nchw, params, compute_dtype=jnp.float32):
    """Eval-mode ResNetBlock forward: (N, Cin, H, W) -> (N, Cout, H, W)."""
    x = jnp.transpose(x_nchw, (0, 2, 3, 1))
    out = resnet_block_forward_nhwc(x, params, compute_dtype)
    return jnp.transpose(out, (0, 3, 1, 2))


# --------------------------------------------------------------------------
# Deterministic parameter construction (shapes per ResNetBlock.__init__).
# --------------------------------------------------------------------------
def make_params(key, in_channels, out_channels, stride=1):
    assert stride == 1, "only stride=1 implemented"  # TODO(synk): strided variant
    ks = jax.random.split(key, 8)
    p = {
        "w1": 0.1 * jax.random.normal(ks[0], (out_channels, in_channels, 3, 3), jnp.float32),
        "g1": 1.0 + 0.05 * jax.random.normal(ks[1], (out_channels,), jnp.float32),
        "be1": 0.05 * jax.random.normal(ks[2], (out_channels,), jnp.float32),
        "rm1": 0.1 * jax.random.normal(ks[3], (out_channels,), jnp.float32),
        "rv1": 1.0 + 0.1 * jnp.abs(jax.random.normal(ks[4], (out_channels,), jnp.float32)),
        "w2": 0.1 * jax.random.normal(ks[5], (out_channels, out_channels, 3, 3), jnp.float32),
        "g2": 1.0 + 0.05 * jax.random.normal(ks[6], (out_channels,), jnp.float32),
        "be2": 0.05 * jax.random.normal(ks[7], (out_channels,), jnp.float32),
        "rm2": jnp.zeros((out_channels,), jnp.float32),
        "rv2": jnp.ones((out_channels,), jnp.float32),
    }
    if stride != 1 or in_channels != out_channels:
        ks2 = jax.random.split(ks[0], 4)
        p.update({
            "wsc": 0.1 * jax.random.normal(ks2[0], (out_channels, in_channels, 1, 1), jnp.float32),
            "gsc": 1.0 + 0.05 * jax.random.normal(ks2[1], (out_channels,), jnp.float32),
            "besc": 0.05 * jax.random.normal(ks2[2], (out_channels,), jnp.float32),
            "rmsc": 0.1 * jax.random.normal(ks2[3], (out_channels,), jnp.float32),
            "rvsc": jnp.ones((out_channels,), jnp.float32),
        })
    return p


# --------------------------------------------------------------------------
# Plain-JAX reference (NCHW, identical to the PyTorch eval-mode forward).
# --------------------------------------------------------------------------
def reference_forward(x, params):
    dn = ("NCHW", "OIHW", "NCHW")

    def bn(y, g, b, rm, rv, eps=1e-5):
        s = g / jnp.sqrt(rv + eps)
        return y * s[None, :, None, None] + (b - rm * s)[None, :, None, None]

    out = lax.conv_general_dilated(x, params["w1"], (1, 1), ((1, 1), (1, 1)),
                                   dimension_numbers=dn)
    out = jnp.maximum(bn(out, params["g1"], params["be1"], params["rm1"], params["rv1"]), 0.0)
    out = lax.conv_general_dilated(out, params["w2"], (1, 1), ((1, 1), (1, 1)),
                                   dimension_numbers=dn)
    out = bn(out, params["g2"], params["be2"], params["rm2"], params["rv2"])
    if "wsc" in params:
        sc = lax.conv_general_dilated(x, params["wsc"], (1, 1), ((0, 0), (0, 0)),
                                      dimension_numbers=dn)
        sc = bn(sc, params["gsc"], params["besc"], params["rmsc"], params["rvsc"])
    else:
        sc = x
    return jnp.maximum(out + sc, 0.0)


if __name__ == "__main__":
    key = jax.random.PRNGKey(0)
    kx, kp, kx2, kp2 = jax.random.split(key, 4)

    # Case 1: projection shortcut (Cin != Cout), f32, lane-dense output path.
    N, Cin, Cout, H, W = 2, 4, 8, 16, 16          # W*Cout = 128 -> dense slab
    x = jax.random.normal(kx, (N, Cin, H, W), jnp.float32)
    params = make_params(kp, Cin, Cout, stride=1)
    out = jax.block_until_ready(resnet_block_forward(x, params))
    ref = jax.block_until_ready(reference_forward(x, params))
    np.testing.assert_allclose(np.asarray(out), np.asarray(ref), rtol=1e-4, atol=1e-4)

    # Case 2: identity shortcut (Cin == Cout), f32, fallback (H*W, Cout) output path.
    H2, W2 = 12, 12                               # W*Cout = 96 -> fallback layout
    x2 = jax.random.normal(kx2, (N, Cout, H2, W2), jnp.float32)
    params2 = make_params(kp2, Cout, Cout, stride=1)
    out2 = jax.block_until_ready(resnet_block_forward(x2, params2))
    ref2 = jax.block_until_ready(reference_forward(x2, params2))
    np.testing.assert_allclose(np.asarray(out2), np.asarray(ref2), rtol=1e-4, atol=1e-4)

    # Case 3: bf16 MXU operands / bf16 output (f32 accumulation) — loose check.
    out_bf16 = jax.block_until_ready(
        resnet_block_forward(x, params, compute_dtype=jnp.bfloat16))
    np.testing.assert_allclose(np.asarray(out_bf16.astype(jnp.float32)),
                               np.asarray(ref), rtol=1e-1, atol=5e-2)

    print("KERNEL_OK")
</pallas_src>

<mosaic_0001>
module attributes {stable_mosaic.version = 11 : i64} {
  func.func @_projection_kernel(%arg0: i32, %arg1: memref<1x16x16x4xf32, #tpu.memory_space<vmem>>, %arg2: memref<9x4x8xf32, #tpu.memory_space<vmem>>, %arg3: memref<1x8xf32, #tpu.memory_space<vmem>>, %arg4: memref<9x8x8xf32, #tpu.memory_space<vmem>>, %arg5: memref<1x8xf32, #tpu.memory_space<vmem>>, %arg6: memref<4x8xf32, #tpu.memory_space<vmem>>, %arg7: memref<1x8xf32, #tpu.memory_space<vmem>>, %arg8: memref<1x16x128xf32, #tpu.memory_space<vmem>>, %arg9: memref<18x18x4xf32, #tpu.memory_space<vmem>>, %arg10: memref<18x18x8xf32, #tpu.memory_space<vmem>>) attributes {dimension_semantics = [#tpu.dimension_semantics<parallel>], iteration_bounds = array<i64: 2>, scalar_prefetch = 0 : i64, scratch_operands = 2 : i64, tpu.core_type = #tpu.core_type<tc>, window_params = [{transform_indices = @transform_0, window_bounds = array<i64: 1, 16, 16, 4>}, {pipeline_mode = #tpu.pipeline_mode<synchronous>, transform_indices = @transform_1, window_bounds = array<i64: 9, 4, 8>}, {pipeline_mode = #tpu.pipeline_mode<synchronous>, transform_indices = @transform_2, window_bounds = array<i64: 1, 8>}, {pipeline_mode = #tpu.pipeline_mode<synchronous>, transform_indices = @transform_3, window_bounds = array<i64: 9, 8, 8>}, {pipeline_mode = #tpu.pipeline_mode<synchronous>, transform_indices = @transform_4, window_bounds = array<i64: 1, 8>}, {pipeline_mode = #tpu.pipeline_mode<synchronous>, transform_indices = @transform_5, window_bounds = array<i64: 4, 8>}, {pipeline_mode = #tpu.pipeline_mode<synchronous>, transform_indices = @transform_6, window_bounds = array<i64: 1, 8>}, {transform_indices = @transform_7, window_bounds = array<i64: 1, 16, 128>}]} {
    %c0 = arith.constant 0 : index
    %c0_0 = arith.constant 0 : index
    %c0_1 = arith.constant 0 : index
    %c0_2 = arith.constant 0 : index
    %0 = vector.load %arg1[%c0, %c0_0, %c0_1, %c0_2] : memref<1x16x16x4xf32, #tpu.memory_space<vmem>>, vector<1x16x16x4xf32>
    %1 = vector.shape_cast %0 : vector<1x16x16x4xf32> to vector<16x16x4xf32>
    %cst = arith.constant 0.000000e+00 : f32
    %2 = vector.broadcast %cst : f32 to vector<1x18x4xf32>
    %c0_3 = arith.constant 0 : index
    %c0_4 = arith.constant 0 : index
    %c0_5 = arith.constant 0 : index
    %3 = vector.load %arg9[%c0_3, %c0_4, %c0_5] : memref<18x18x4xf32, #tpu.memory_space<vmem>>, vector<1x18x4xf32>
    tpu.vector_store %arg9[%c0_3, %c0_4, %c0_5], %2 {strides = array<i32>} : memref<18x18x4xf32, #tpu.memory_space<vmem>>, vector<1x18x4xf32>,
    %cst_6 = arith.constant 0.000000e+00 : f32
    %4 = vector.broadcast %cst_6 : f32 to vector<1x18x4xf32>
    %c17 = arith.constant 17 : index
    %c0_7 = arith.constant 0 : index
    %c0_8 = arith.constant 0 : index
    %5 = vector.load %arg9[%c17, %c0_7, %c0_8] : memref<18x18x4xf32, #tpu.memory_space<vmem>>, vector<1x18x4xf32>
    tpu.vector_store %arg9[%c17, %c0_7, %c0_8], %4 {strides = array<i32>} : memref<18x18x4xf32, #tpu.memory_space<vmem>>, vector<1x18x4xf32>,
    %cst_9 = arith.constant 0.000000e+00 : f32
    %6 = vector.broadcast %cst_9 : f32 to vector<18x1x4xf32>
    %c0_10 = arith.constant 0 : index
    %c0_11 = arith.constant 0 : index
    %c0_12 = arith.constant 0 : index
    %7 = vector.load %arg9[%c0_10, %c0_11, %c0_12] : memref<18x18x4xf32, #tpu.memory_space<vmem>>, vector<18x1x4xf32>
    tpu.vector_store %arg9[%c0_10, %c0_11, %c0_12], %6 {strides = array<i32>} : memref<18x18x4xf32, #tpu.memory_space<vmem>>, vector<18x1x4xf32>,
    %cst_13 = arith.constant 0.000000e+00 : f32
    %8 = vector.broadcast %cst_13 : f32 to vector<18x1x4xf32>
    %c0_14 = arith.constant 0 : index
    %c17_15 = arith.constant 17 : index
    %c0_16 = arith.constant 0 : index
    %9 = vector.load %arg9[%c0_14, %c17_15, %c0_16] : memref<18x18x4xf32, #tpu.memory_space<vmem>>, vector<18x1x4xf32>
    tpu.vector_store %arg9[%c0_14, %c17_15, %c0_16], %8 {strides = array<i32>} : memref<18x18x4xf32, #tpu.memory_space<vmem>>, vector<18x1x4xf32>,
    %c1 = arith.constant 1 : index
    %c1_17 = arith.constant 1 : index
    %c0_18 = arith.constant 0 : index
    %10 = vector.load %arg9[%c1, %c1_17, %c0_18] : memref<18x18x4xf32, #tpu.memory_space<vmem>>, vector<16x16x4xf32>
    tpu.vector_store %arg9[%c1, %c1_17, %c0_18], %1 {strides = array<i32>} : memref<18x18x4xf32, #tpu.memory_space<vmem>>, vector<16x16x4xf32>,
    %c0_19 = arith.constant 0 : index
    %c0_20 = arith.constant 0 : index
    %c0_21 = arith.constant 0 : index
    %11 = vector.load %arg9[%c0_19, %c0_20, %c0_21] : memref<18x18x4xf32, #tpu.memory_space<vmem>>, vector<16x16x4xf32>
    %12 = vector.shape_cast %11 : vector<16x16x4xf32> to vector<256x4xf32>
    %c0_22 = arith.constant 0 : index
    %c0_23 = arith.constant 0 : index
    %c0_24 = arith.constant 0 : index
    %13 = vector.load %arg2[%c0_22, %c0_23, %c0_24] : memref<9x4x8xf32, #tpu.memory_space<vmem>>, vector<1x4x8xf32>
    %14 = vector.shape_cast %13 : vector<1x4x8xf32> to vector<4x8xf32>
    %cst_25 = arith.constant dense<0.000000e+00> : vector<256x8xf32>
    %15 = tpu.matmul %12, %14, %cst_25 {dimension_numbers = #tpu.dot_dimension_numbers<[1], [0], [0], [1], [0, 0, 1, 1], [], []>} : vector<256x4xf32>, vector<4x8xf32>, vector<256x8xf32> -> vector<256x8xf32>
    %c0_26 = arith.constant 0 : index
    %c1_27 = arith.constant 1 : index
    %c0_28 = arith.constant 0 : index
    %16 = vector.load %arg9[%c0_26, %c1_27, %c0_28] : memref<18x18x4xf32, #tpu.memory_space<vmem>>, vector<16x16x4xf32>
    %17 = vector.shape_cast %16 : vector<16x16x4xf32> to vector<256x4xf32>
    %c1_29 = arith.constant 1 : index
    %c0_30 = arith.constant 0 : index
    %c0_31 = arith.constant 0 : index
    %18 = vector.load %arg2[%c1_29, %c0_30, %c0_31] : memref<9x4x8xf32, #tpu.memory_space<vmem>>, vector<1x4x8xf32>
    %19 = vector.shape_cast %18 : vector<1x4x8xf32> to vector<4x8xf32>
    %cst_32 = arith.constant dense<0.000000e+00> : vector<256x8xf32>
    %20 = tpu.matmul %17, %19, %cst_32 {dimension_numbers = #tpu.dot_dimension_numbers<[1], [0], [0], [1], [0, 0, 1, 1], [], []>} : vector<256x4xf32>, vector<4x8xf32>, vector<256x8xf32> -> vector<256x8xf32>
    %21 = arith.addf %15, %20 : vector<256x8xf32>
    %c0_33 = arith.constant 0 : index
    %c2 = arith.constant 2 : index
    %c0_34 = arith.constant 0 : index
    %22 = vector.load %arg9[%c0_33, %c2, %c0_34] : memref<18x18x4xf32, #tpu.memory_space<vmem>>, vector<16x16x4xf32>
    %23 = vector.shape_cast %22 : vector<16x16x4xf32> to vector<256x4xf32>
    %c2_35 = arith.constant 2 : index
    %c0_36 = arith.constant 0 : index
    %c0_37 = arith.constant 0 : index
    %24 = vector.load %arg2[%c2_35, %c0_36, %c0_37] : memref<9x4x8xf32, #tpu.memory_space<vmem>>, vector<1x4x8xf32>
    %25 = vector.shape_cast %24 : vector<1x4x8xf32> to vector<4x8xf32>
    %cst_38 = arith.constant dense<0.000000e+00> : vector<256x8xf32>
    %26 = tpu.matmul %23, %25, %cst_38 {dimension_numbers = #tpu.dot_dimension_numbers<[1], [0], [0], [1], [0, 0, 1, 1], [], []>} : vector<256x4xf32>, vector<4x8xf32>, vector<256x8xf32> -> vector<256x8xf32>
    %27 = arith.addf %21, %26 : vector<256x8xf32>
    %c1_39 = arith.constant 1 : index
    %c0_40 = arith.constant 0 : index
    %c0_41 = arith.constant 0 : index
    %28 = vector.load %arg9[%c1_39, %c0_40, %c0_41] : memref<18x18x4xf32, #tpu.memory_space<vmem>>, vector<16x16x4xf32>
    %29 = vector.shape_cast %28 : vector<16x16x4xf32> to vector<256x4xf32>
    %c3 = arith.constant 3 : index
    %c0_42 = arith.constant 0 : index
    %c0_43 = arith.constant 0 : index
    %30 = vector.load %arg2[%c3, %c0_42, %c0_43] : memref<9x4x8xf32, #tpu.memory_space<vmem>>, vector<1x4x8xf32>
    %31 = vector.shape_cast %30 : vector<1x4x8xf32> to vector<4x8xf32>
    %cst_44 = arith.constant dense<0.000000e+00> : vector<256x8xf32>
    %32 = tpu.matmul %29, %31, %cst_44 {dimension_numbers = #tpu.dot_dimension_numbers<[1], [0], [0], [1], [0, 0, 1, 1], [], []>} : vector<256x4xf32>, vector<4x8xf32>, vector<256x8xf32> -> vector<256x8xf32>
    %33 = arith.addf %27, %32 : vector<256x8xf32>
    %c1_45 = arith.constant 1 : index
    %c1_46 = arith.constant 1 : index
    %c0_47 = arith.constant 0 : index
    %34 = vector.load %arg9[%c1_45, %c1_46, %c0_47] : memref<18x18x4xf32, #tpu.memory_space<vmem>>, vector<16x16x4xf32>
    %35 = vector.shape_cast %34 : vector<16x16x4xf32> to vector<256x4xf32>
    %c4 = arith.constant 4 : index
    %c0_48 = arith.constant 0 : index
    %c0_49 = arith.constant 0 : index
    %36 = vector.load %arg2[%c4, %c0_48, %c0_49] : memref<9x4x8xf32, #tpu.memory_space<vmem>>, vector<1x4x8xf32>
    %37 = vector.shape_cast %36 : vector<1x4x8xf32> to vector<4x8xf32>
    %cst_50 = arith.constant dense<0.000000e+00> : vector<256x8xf32>
    %38 = tpu.matmul %35, %37, %cst_50 {dimension_numbers = #tpu.dot_dimension_numbers<[1], [0], [0], [1], [0, 0, 1, 1], [], []>} : vector<256x4xf32>, vector<4x8xf32>, vector<256x8xf32> -> vector<256x8xf32>
    %39 = arith.addf %33, %38 : vector<256x8xf32>
    %c1_51 = arith.constant 1 : index
    %c2_52 = arith.constant 2 : index
    %c0_53 = arith.constant 0 : index
    %40 = vector.load %arg9[%c1_51, %c2_52, %c0_53] : memref<18x18x4xf32, #tpu.memory_space<vmem>>, vector<16x16x4xf32>
    %41 = vector.shape_cast %40 : vector<16x16x4xf32> to vector<256x4xf32>
    %c5 = arith.constant 5 : index
    %c0_54 = arith.constant 0 : index
    %c0_55 = arith.constant 0 : index
    %42 = vector.load %arg2[%c5, %c0_54, %c0_55] : memref<9x4x8xf32, #tpu.memory_space<vmem>>, vector<1x4x8xf32>
    %43 = vector.shape_cast %42 : vector<1x4x8xf32> to vector<4x8xf32>
    %cst_56 = arith.constant dense<0.000000e+00> : vector<256x8xf32>
    %44 = tpu.matmul %41, %43, %cst_56 {dimension_numbers = #tpu.dot_dimension_numbers<[1], [0], [0], [1], [0, 0, 1, 1], [], []>} : vector<256x4xf32>, vector<4x8xf32>, vector<256x8xf32> -> vector<256x8xf32>
    %45 = arith.addf %39, %44 : vector<256x8xf32>
    %c2_57 = arith.constant 2 : index
    %c0_58 = arith.constant 0 : index
    %c0_59 = arith.constant 0 : index
    %46 = vector.load %arg9[%c2_57, %c0_58, %c0_59] : memref<18x18x4xf32, #tpu.memory_space<vmem>>, vector<16x16x4xf32>
    %47 = vector.shape_cast %46 : vector<16x16x4xf32> to vector<256x4xf32>
    %c6 = arith.constant 6 : index
    %c0_60 = arith.constant 0 : index
    %c0_61 = arith.constant 0 : index
    %48 = vector.load %arg2[%c6, %c0_60, %c0_61] : memref<9x4x8xf32, #tpu.memory_space<vmem>>, vector<1x4x8xf32>
    %49 = vector.shape_cast %48 : vector<1x4x8xf32> to vector<4x8xf32>
    %cst_62 = arith.constant dense<0.000000e+00> : vector<256x8xf32>
    %50 = tpu.matmul %47, %49, %cst_62 {dimension_numbers = #tpu.dot_dimension_numbers<[1], [0], [0], [1], [0, 0, 1, 1], [], []>} : vector<256x4xf32>, vector<4x8xf32>, vector<256x8xf32> -> vector<256x8xf32>
    %51 = arith.addf %45, %50 : vector<256x8xf32>
    %c2_63 = arith.constant 2 : index
    %c1_64 = arith.constant 1 : index
    %c0_65 = arith.constant 0 : index
    %52 = vector.load %arg9[%c2_63, %c1_64, %c0_65] : memref<18x18x4xf32, #tpu.memory_space<vmem>>, vector<16x16x4xf32>
    %53 = vector.shape_cast %52 : vector<16x16x4xf32> to vector<256x4xf32>
    %c7 = arith.constant 7 : index
    %c0_66 = arith.constant 0 : index
    %c0_67 = arith.constant 0 : index
    %54 = vector.load %arg2[%c7, %c0_66, %c0_67] : memref<9x4x8xf32, #tpu.memory_space<vmem>>, vector<1x4x8xf32>
    %55 = vector.shape_cast %54 : vector<1x4x8xf32> to vector<4x8xf32>
    %cst_68 = arith.constant dense<0.000000e+00> : vector<256x8xf32>
    %56 = tpu.matmul %53, %55, %cst_68 {dimension_numbers = #tpu.dot_dimension_numbers<[1], [0], [0], [1], [0, 0, 1, 1], [], []>} : vector<256x4xf32>, vector<4x8xf32>, vector<256x8xf32> -> vector<256x8xf32>
    %57 = arith.addf %51, %56 : vector<256x8xf32>
    %c2_69 = arith.constant 2 : index
    %c2_70 = arith.constant 2 : index
    %c0_71 = arith.constant 0 : index
    %58 = vector.load %arg9[%c2_69, %c2_70, %c0_71] : memref<18x18x4xf32, #tpu.memory_space<vmem>>, vector<16x16x4xf32>
    %59 = vector.shape_cast %58 : vector<16x16x4xf32> to vector<256x4xf32>
    %c8 = arith.constant 8 : index
    %c0_72 = arith.constant 0 : index
    %c0_73 = arith.constant 0 : index
    %60 = vector.load %arg2[%c8, %c0_72, %c0_73] : memref<9x4x8xf32, #tpu.memory_space<vmem>>, vector<1x4x8xf32>
    %61 = vector.shape_cast %60 : vector<1x4x8xf32> to vector<4x8xf32>
    %cst_74 = arith.constant dense<0.000000e+00> : vector<256x8xf32>
    %62 = tpu.matmul %59, %61, %cst_74 {dimension_numbers = #tpu.dot_dimension_numbers<[1], [0], [0], [1], [0, 0, 1, 1], [], []>} : vector<256x4xf32>, vector<4x8xf32>, vector<256x8xf32> -> vector<256x8xf32>
    %63 = arith.addf %57, %62 : vector<256x8xf32>
    %c0_75 = arith.constant 0 : index
    %c0_76 = arith.constant 0 : index
    %64 = vector.load %arg3[%c0_75, %c0_76] : memref<1x8xf32, #tpu.memory_space<vmem>>, vector<1x8xf32>
    %65 = vector.broadcast %64 : vector<1x8xf32> to vector<256x8xf32>
    %66 = arith.addf %63, %65 : vector<256x8xf32>
    %cst_77 = arith.constant 0.000000e+00 : f32
    %67 = vector.broadcast %cst_77 : f32 to vector<256x8xf32>
    %68 = arith.maximumf %66, %67 : vector<256x8xf32>
    %69 = vector.shape_cast %68 : vector<256x8xf32> to vector<16x16x8xf32>
    %cst_78 = arith.constant 0.000000e+00 : f32
    %70 = vector.broadcast %cst_78 : f32 to vector<1x18x8xf32>
    %c0_79 = arith.constant 0 : index
    %c0_80 = arith.constant 0 : index
    %c0_81 = arith.constant 0 : index
    %71 = vector.load %arg10[%c0_79, %c0_80, %c0_81] : memref<18x18x8xf32, #tpu.memory_space<vmem>>, vector<1x18x8xf32>
    tpu.vector_store %arg10[%c0_79, %c0_80, %c0_81], %70 {strides = array<i32>} : memref<18x18x8xf32, #tpu.memory_space<vmem>>, vector<1x18x8xf32>,
    %cst_82 = arith.constant 0.000000e+00 : f32
    %72 = vector.broadcast %cst_82 : f32 to vector<1x18x8xf32>
    %c17_83 = arith.constant 17 : index
    %c0_84 = arith.constant 0 : index
    %c0_85 = arith.constant 0 : index
    %73 = vector.load %arg10[%c17_83, %c0_84, %c0_85] : memref<18x18x8xf32, #tpu.memory_space<vmem>>, vector<1x18x8xf32>
    tpu.vector_store %arg10[%c17_83, %c0_84, %c0_85], %72 {strides = array<i32>} : memref<18x18x8xf32, #tpu.memory_space<vmem>>, vector<1x18x8xf32>,
    %cst_86 = arith.constant 0.000000e+00 : f32
    %74 = vector.broadcast %cst_86 : f32 to vector<18x1x8xf32>
    %c0_87 = arith.constant 0 : index
    %c0_88 = arith.constant 0 : index
    %c0_89 = arith.constant 0 : index
    %75 = vector.load %arg10[%c0_87, %c0_88, %c0_89] : memref<18x18x8xf32, #tpu.memory_space<vmem>>, vector<18x1x8xf32>
    tpu.vector_store %arg10[%c0_87, %c0_88, %c0_89], %74 {strides = array<i32>} : memref<18x18x8xf32, #tpu.memory_space<vmem>>, vector<18x1x8xf32>,
    %cst_90 = arith.constant 0.000000e+00 : f32
    %76 = vector.broadcast %cst_90 : f32 to vector<18x1x8xf32>
    %c0_91 = arith.constant 0 : index
    %c17_92 = arith.constant 17 : index
    %c0_93 = arith.constant 0 : index
    %77 = vector.load %arg10[%c0_91, %c17_92, %c0_93] : memref<18x18x8xf32, #tpu.memory_space<vmem>>, vector<18x1x8xf32>
    tpu.vector_store %arg10[%c0_91, %c17_92, %c0_93], %76 {strides = array<i32>} : memref<18x18x8xf32, #tpu.memory_space<vmem>>, vector<18x1x8xf32>,
    %c1_94 = arith.constant 1 : index
    %c1_95 = arith.constant 1 : index
    %c0_96 = arith.constant 0 : index
    %78 = vector.load %arg10[%c1_94, %c1_95, %c0_96] : memref<18x18x8xf32, #tpu.memory_space<vmem>>, vector<16x16x8xf32>
    tpu.vector_store %arg10[%c1_94, %c1_95, %c0_96], %69 {strides = array<i32>} : memref<18x18x8xf32, #tpu.memory_space<vmem>>, vector<16x16x8xf32>,
    %c0_97 = arith.constant 0 : index
    %c0_98 = arith.constant 0 : index
    %c0_99 = arith.constant 0 : index
    %79 = vector.load %arg10[%c0_97, %c0_98, %c0_99] : memref<18x18x8xf32, #tpu.memory_space<vmem>>, vector<16x16x8xf32>
    %80 = vector.shape_cast %79 : vector<16x16x8xf32> to vector<256x8xf32>
    %c0_100 = arith.constant 0 : index
    %c0_101 = arith.constant 0 : index
    %c0_102 = arith.constant 0 : index
    %81 = vector.load %arg4[%c0_100, %c0_101, %c0_102] : memref<9x8x8xf32, #tpu.memory_space<vmem>>, vector<1x8x8xf32>
    %82 = vector.shape_cast %81 : vector<1x8x8xf32> to vector<8x8xf32>
    %cst_103 = arith.constant dense<0.000000e+00> : vector<256x8xf32>
    %83 = tpu.matmul %80, %82, %cst_103 {dimension_numbers = #tpu.dot_dimension_numbers<[1], [0], [0], [1], [0, 0, 1, 1], [], []>} : vector<256x8xf32>, vector<8x8xf32>, vector<256x8xf32> -> vector<256x8xf32>
    %c0_104 = arith.constant 0 : index
    %c1_105 = arith.constant 1 : index
    %c0_106 = arith.constant 0 : index
    %84 = vector.load %arg10[%c0_104, %c1_105, %c0_106] : memref<18x18x8xf32, #tpu.memory_space<vmem>>, vector<16x16x8xf32>
    %85 = vector.shape_cast %84 : vector<16x16x8xf32> to vector<256x8xf32>
    %c1_107 = arith.constant 1 : index
    %c0_108 = arith.constant 0 : index
    %c0_109 = arith.constant 0 : index
    %86 = vector.load %arg4[%c1_107, %c0_108, %c0_109] : memref<9x8x8xf32, #tpu.memory_space<vmem>>, vector<1x8x8xf32>
    %87 = vector.shape_cast %86 : vector<1x8x8xf32> to vector<8x8xf32>
    %cst_110 = arith.constant dense<0.000000e+00> : vector<256x8xf32>
    %88 = tpu.matmul %85, %87, %cst_110 {dimension_numbers = #tpu.dot_dimension_numbers<[1], [0], [0], [1], [0, 0, 1, 1], [], []>} : vector<256x8xf32>, vector<8x8xf32>, vector<256x8xf32> -> vector<256x8xf32>
    %89 = arith.addf %83, %88 : vector<256x8xf32>
    %c0_111 = arith.constant 0 : index
    %c2_112 = arith.constant 2 : index
    %c0_113 = arith.constant 0 : index
    %90 = vector.load %arg10[%c0_111, %c2_112, %c0_113] : memref<18x18x8xf32, #tpu.memory_space<vmem>>, vector<16x16x8xf32>
    %91 = vector.shape_cast %90 : vector<16x16x8xf32> to vector<256x8xf32>
    %c2_114 = arith.constant 2 : index
    %c0_115 = arith.constant 0 : index
    %c0_116 = arith.constant 0 : index
    %92 = vector.load %arg4[%c2_114, %c0_115, %c0_116] : memref<9x8x8xf32, #tpu.memory_space<vmem>>, vector<1x8x8xf32>
    %93 = vector.shape_cast %92 : vector<1x8x8xf32> to vector<8x8xf32>
    %cst_117 = arith.constant dense<0.000000e+00> : vector<256x8xf32>
    %94 = tpu.matmul %91, %93, %cst_117 {dimension_numbers = #tpu.dot_dimension_numbers<[1], [0], [0], [1], [0, 0, 1, 1], [], []>} : vector<256x8xf32>, vector<8x8xf32>, vector<256x8xf32> -> vector<256x8xf32>
    %95 = arith.addf %89, %94 : vector<256x8xf32>
    %c1_118 = arith.constant 1 : index
    %c0_119 = arith.constant 0 : index
    %c0_120 = arith.constant 0 : index
    %96 = vector.load %arg10[%c1_118, %c0_119, %c0_120] : memref<18x18x8xf32, #tpu.memory_space<vmem>>, vector<16x16x8xf32>
    %97 = vector.shape_cast %96 : vector<16x16x8xf32> to vector<256x8xf32>
    %c3_121 = arith.constant 3 : index
    %c0_122 = arith.constant 0 : index
    %c0_123 = arith.constant 0 : index
    %98 = vector.load %arg4[%c3_121, %c0_122, %c0_123] : memref<9x8x8xf32, #tpu.memory_space<vmem>>, vector<1x8x8xf32>
    %99 = vector.shape_cast %98 : vector<1x8x8xf32> to vector<8x8xf32>
    %cst_124 = arith.constant dense<0.000000e+00> : vector<256x8xf32>
    %100 = tpu.matmul %97, %99, %cst_124 {dimension_numbers = #tpu.dot_dimension_numbers<[1], [0], [0], [1], [0, 0, 1, 1], [], []>} : vector<256x8xf32>, vector<8x8xf32>, vector<256x8xf32> -> vector<256x8xf32>
    %101 = arith.addf %95, %100 : vector<256x8xf32>
    %c1_125 = arith.constant 1 : index
    %c1_126 = arith.constant 1 : index
    %c0_127 = arith.constant 0 : index
    %102 = vector.load %arg10[%c1_125, %c1_126, %c0_127] : memref<18x18x8xf32, #tpu.memory_space<vmem>>, vector<16x16x8xf32>
    %103 = vector.shape_cast %102 : vector<16x16x8xf32> to vector<256x8xf32>
    %c4_128 = arith.constant 4 : index
    %c0_129 = arith.constant 0 : index
    %c0_130 = arith.constant 0 : index
    %104 = vector.load %arg4[%c4_128, %c0_129, %c0_130] : memref<9x8x8xf32, #tpu.memory_space<vmem>>, vector<1x8x8xf32>
    %105 = vector.shape_cast %104 : vector<1x8x8xf32> to vector<8x8xf32>
    %cst_131 = arith.constant dense<0.000000e+00> : vector<256x8xf32>
    %106 = tpu.matmul %103, %105, %cst_131 {dimension_numbers = #tpu.dot_dimension_numbers<[1], [0], [0], [1], [0, 0, 1, 1], [], []>} : vector<256x8xf32>, vector<8x8xf32>, vector<256x8xf32> -> vector<256x8xf32>
    %107 = arith.addf %101, %106 : vector<256x8xf32>
    %c1_132 = arith.constant 1 : index
    %c2_133 = arith.constant 2 : index
    %c0_134 = arith.constant 0 : index
    %108 = vector.load %arg10[%c1_132, %c2_133, %c0_134] : memref<18x18x8xf32, #tpu.memory_space<vmem>>, vector<16x16x8xf32>
    %109 = vector.shape_cast %108 : vector<16x16x8xf32> to vector<256x8xf32>
    %c5_135 = arith.constant 5 : index
    %c0_136 = arith.constant 0 : index
    %c0_137 = arith.constant 0 : index
    %110 = vector.load %arg4[%c5_135, %c0_136, %c0_137] : memref<9x8x8xf32, #tpu.memory_space<vmem>>, vector<1x8x8xf32>
    %111 = vector.shape_cast %110 : vector<1x8x8xf32> to vector<8x8xf32>
    %cst_138 = arith.constant dense<0.000000e+00> : vector<256x8xf32>
    %112 = tpu.matmul %109, %111, %cst_138 {dimension_numbers = #tpu.dot_dimension_numbers<[1], [0], [0], [1], [0, 0, 1, 1], [], []>} : vector<256x8xf32>, vector<8x8xf32>, vector<256x8xf32> -> vector<256x8xf32>
    %113 = arith.addf %107, %112 : vector<256x8xf32>
    %c2_139 = arith.constant 2 : index
    %c0_140 = arith.constant 0 : index
    %c0_141 = arith.constant 0 : index
    %114 = vector.load %arg10[%c2_139, %c0_140, %c0_141] : memref<18x18x8xf32, #tpu.memory_space<vmem>>, vector<16x16x8xf32>
    %115 = vector.shape_cast %114 : vector<16x16x8xf32> to vector<256x8xf32>
    %c6_142 = arith.constant 6 : index
    %c0_143 = arith.constant 0 : index
    %c0_144 = arith.constant 0 : index
    %116 = vector.load %arg4[%c6_142, %c0_143, %c0_144] : memref<9x8x8xf32, #tpu.memory_space<vmem>>, vector<1x8x8xf32>
    %117 = vector.shape_cast %116 : vector<1x8x8xf32> to vector<8x8xf32>
    %cst_145 = arith.constant dense<0.000000e+00> : vector<256x8xf32>
    %118 = tpu.matmul %115, %117, %cst_145 {dimension_numbers = #tpu.dot_dimension_numbers<[1], [0], [0], [1], [0, 0, 1, 1], [], []>} : vector<256x8xf32>, vector<8x8xf32>, vector<256x8xf32> -> vector<256x8xf32>
    %119 = arith.addf %113, %118 : vector<256x8xf32>
    %c2_146 = arith.constant 2 : index
    %c1_147 = arith.constant 1 : index
    %c0_148 = arith.constant 0 : index
    %120 = vector.load %arg10[%c2_146, %c1_147, %c0_148] : memref<18x18x8xf32, #tpu.memory_space<vmem>>, vector<16x16x8xf32>
    %121 = vector.shape_cast %120 : vector<16x16x8xf32> to vector<256x8xf32>
    %c7_149 = arith.constant 7 : index
    %c0_150 = arith.constant 0 : index
    %c0_151 = arith.constant 0 : index
    %122 = vector.load %arg4[%c7_149, %c0_150, %c0_151] : memref<9x8x8xf32, #tpu.memory_space<vmem>>, vector<1x8x8xf32>
    %123 = vector.shape_cast %122 : vector<1x8x8xf32> to vector<8x8xf32>
    %cst_152 = arith.constant dense<0.000000e+00> : vector<256x8xf32>
    %124 = tpu.matmul %121, %123, %cst_152 {dimension_numbers = #tpu.dot_dimension_numbers<[1], [0], [0], [1], [0, 0, 1, 1], [], []>} : vector<256x8xf32>, vector<8x8xf32>, vector<256x8xf32> -> vector<256x8xf32>
    %125 = arith.addf %119, %124 : vector<256x8xf32>
    %c2_153 = arith.constant 2 : index
    %c2_154 = arith.constant 2 : index
    %c0_155 = arith.constant 0 : index
    %126 = vector.load %arg10[%c2_153, %c2_154, %c0_155] : memref<18x18x8xf32, #tpu.memory_space<vmem>>, vector<16x16x8xf32>
    %127 = vector.shape_cast %126 : vector<16x16x8xf32> to vector<256x8xf32>
    %c8_156 = arith.constant 8 : index
    %c0_157 = arith.constant 0 : index
    %c0_158 = arith.constant 0 : index
    %128 = vector.load %arg4[%c8_156, %c0_157, %c0_158] : memref<9x8x8xf32, #tpu.memory_space<vmem>>, vector<1x8x8xf32>
    %129 = vector.shape_cast %128 : vector<1x8x8xf32> to vector<8x8xf32>
    %cst_159 = arith.constant dense<0.000000e+00> : vector<256x8xf32>
    %130 = tpu.matmul %127, %129, %cst_159 {dimension_numbers = #tpu.dot_dimension_numbers<[1], [0], [0], [1], [0, 0, 1, 1], [], []>} : vector<256x8xf32>, vector<8x8xf32>, vector<256x8xf32> -> vector<256x8xf32>
    %131 = arith.addf %125, %130 : vector<256x8xf32>
    %c0_160 = arith.constant 0 : index
    %c0_161 = arith.constant 0 : index
    %132 = vector.load %arg5[%c0_160, %c0_161] : memref<1x8xf32, #tpu.memory_space<vmem>>, vector<1x8xf32>
    %133 = vector.broadcast %132 : vector<1x8xf32> to vector<256x8xf32>
    %134 = arith.addf %131, %133 : vector<256x8xf32>
    %135 = vector.shape_cast %1 : vector<16x16x4xf32> to vector<256x4xf32>
    %c0_162 = arith.constant 0 : index
    %c0_163 = arith.constant 0 : index
    %136 = vector.load %arg6[%c0_162, %c0_163] : memref<4x8xf32, #tpu.memory_space<vmem>>, vector<4x8xf32>
    %cst_164 = arith.constant dense<0.000000e+00> : vector<256x8xf32>
    %137 = tpu.matmul %135, %136, %cst_164 {dimension_numbers = #tpu.dot_dimension_numbers<[1], [0], [0], [1], [0, 0, 1, 1], [], []>} : vector<256x4xf32>, vector<4x8xf32>, vector<256x8xf32> -> vector<256x8xf32>
    %c0_165 = arith.constant 0 : index
    %c0_166 = arith.constant 0 : index
    %138 = vector.load %arg7[%c0_165, %c0_166] : memref<1x8xf32, #tpu.memory_space<vmem>>, vector<1x8xf32>
    %139 = vector.broadcast %138 : vector<1x8xf32> to vector<256x8xf32>
    %140 = arith.addf %137, %139 : vector<256x8xf32>
    %141 = arith.addf %134, %140 : vector<256x8xf32>
    %cst_167 = arith.constant 0.000000e+00 : f32
    %142 = vector.broadcast %cst_167 : f32 to vector<256x8xf32>
    %143 = arith.maximumf %141, %142 : vector<256x8xf32>
    %144 = vector.shape_cast %143 : vector<256x8xf32> to vector<16x16x8xf32>
    %145 = vector.extract_strided_slice %144 {offsets = [0, 0, 0], sizes = [16, 1, 8], strides = [1, 1, 1]} : vector<16x16x8xf32> to vector<16x1x8xf32>
    %146 = vector.shape_cast %145 : vector<16x1x8xf32> to vector<16x8xf32>
    %c0_168 = arith.constant 0 : index
    %c0_169 = arith.constant 0 : index
    %c0_170 = arith.constant 0 : index
    %147 = vector.load %arg8[%c0_168, %c0_169, %c0_170] : memref<1x16x128xf32, #tpu.memory_space<vmem>>, vector<1x16x8xf32>
    %148 = vector.shape_cast %147 : vector<1x16x8xf32> to vector<16x8xf32>
    %149 = vector.shape_cast %146 : vector<16x8xf32> to vector<1x16x8xf32>
    tpu.vector_store %arg8[%c0_168, %c0_169, %c0_170], %149 {strides = array<i32>} : memref<1x16x128xf32, #tpu.memory_space<vmem>>, vector<1x16x8xf32>,
    %150 = vector.extract_strided_slice %144 {offsets = [0, 1, 0], sizes = [16, 1, 8], strides = [1, 1, 1]} : vector<16x16x8xf32> to vector<16x1x8xf32>
    %151 = vector.shape_cast %150 : vector<16x1x8xf32> to vector<16x8xf32>
    %c0_171 = arith.constant 0 : index
    %c0_172 = arith.constant 0 : index
    %c8_173 = arith.constant 8 : index
    %152 = vector.load %arg8[%c0_171, %c0_172, %c8_173] : memref<1x16x128xf32, #tpu.memory_space<vmem>>, vector<1x16x8xf32>
    %153 = vector.shape_cast %152 : vector<1x16x8xf32> to vector<16x8xf32>
    %154 = vector.shape_cast %151 : vector<16x8xf32> to vector<1x16x8xf32>
    tpu.vector_store %arg8[%c0_171, %c0_172, %c8_173], %154 {strides = array<i32>} : memref<1x16x128xf32, #tpu.memory_space<vmem>>, vector<1x16x8xf32>,
    %155 = vector.extract_strided_slice %144 {offsets = [0, 2, 0], sizes = [16, 1, 8], strides = [1, 1, 1]} : vector<16x16x8xf32> to vector<16x1x8xf32>
    %156 = vector.shape_cast %155 : vector<16x1x8xf32> to vector<16x8xf32>
    %c0_174 = arith.constant 0 : index
    %c0_175 = arith.constant 0 : index
    %c16 = arith.constant 16 : index
    %157 = vector.load %arg8[%c0_174, %c0_175, %c16] : memref<1x16x128xf32, #tpu.memory_space<vmem>>, vector<1x16x8xf32>
    %158 = vector.shape_cast %157 : vector<1x16x8xf32> to vector<16x8xf32>
    %159 = vector.shape_cast %156 : vector<16x8xf32> to vector<1x16x8xf32>
    tpu.vector_store %arg8[%c0_174, %c0_175, %c16], %159 {strides = array<i32>} : memref<1x16x128xf32, #tpu.memory_space<vmem>>, vector<1x16x8xf32>,
    %160 = vector.extract_strided_slice %144 {offsets = [0, 3, 0], sizes = [16, 1, 8], strides = [1, 1, 1]} : vector<16x16x8xf32> to vector<16x1x8xf32>
    %161 = vector.shape_cast %160 : vector<16x1x8xf32> to vector<16x8xf32>
    %c0_176 = arith.constant 0 : index
    %c0_177 = arith.constant 0 : index
    %c24 = arith.constant 24 : index
    %162 = vector.load %arg8[%c0_176, %c0_177, %c24] : memref<1x16x128xf32, #tpu.memory_space<vmem>>, vector<1x16x8xf32>
    %163 = vector.shape_cast %162 : vector<1x16x8xf32> to vector<16x8xf32>
    %164 = vector.shape_cast %161 : vector<16x8xf32> to vector<1x16x8xf32>
    tpu.vector_store %arg8[%c0_176, %c0_177, %c24], %164 {strides = array<i32>} : memref<1x16x128xf32, #tpu.memory_space<vmem>>, vector<1x16x8xf32>,
    %165 = vector.extract_strided_slice %144 {offsets = [0, 4, 0], sizes = [16, 1, 8], strides = [1, 1, 1]} : vector<16x16x8xf32> to vector<16x1x8xf32>
    %166 = vector.shape_cast %165 : vector<16x1x8xf32> to vector<16x8xf32>
    %c0_178 = arith.constant 0 : index
    %c0_179 = arith.constant 0 : index
    %c32 = arith.constant 32 : index
    %167 = vector.load %arg8[%c0_178, %c0_179, %c32] : memref<1x16x128xf32, #tpu.memory_space<vmem>>, vector<1x16x8xf32>
    %168 = vector.shape_cast %167 : vector<1x16x8xf32> to vector<16x8xf32>
    %169 = vector.shape_cast %166 : vector<16x8xf32> to vector<1x16x8xf32>
    tpu.vector_store %arg8[%c0_178, %c0_179, %c32], %169 {strides = array<i32>} : memref<1x16x128xf32, #tpu.memory_space<vmem>>, vector<1x16x8xf32>,
    %170 = vector.extract_strided_slice %144 {offsets = [0, 5, 0], sizes = [16, 1, 8], strides = [1, 1, 1]} : vector<16x16x8xf32> to vector<16x1x8xf32>
    %171 = vector.shape_cast %170 : vector<16x1x8xf32> to vector<16x8xf32>
    %c0_180 = arith.constant 0 : index
    %c0_181 = arith.constant 0 : index
    %c40 = arith.constant 40 : index
    %172 = vector.load %arg8[%c0_180, %c0_181, %c40] : memref<1x16x128xf32, #tpu.memory_space<vmem>>, vector<1x16x8xf32>
    %173 = vector.shape_cast %172 : vector<1x16x8xf32> to vector<16x8xf32>
    %174 = vector.shape_cast %171 : vector<16x8xf32> to vector<1x16x8xf32>
    tpu.vector_store %arg8[%c0_180, %c0_181, %c40], %174 {strides = array<i32>} : memref<1x16x128xf32, #tpu.memory_space<vmem>>, vector<1x16x8xf32>,
    %175 = vector.extract_strided_slice %144 {offsets = [0, 6, 0], sizes = [16, 1, 8], strides = [1, 1, 1]} : vector<16x16x8xf32> to vector<16x1x8xf32>
    %176 = vector.shape_cast %175 : vector<16x1x8xf32> to vector<16x8xf32>
    %c0_182 = arith.constant 0 : index
    %c0_183 = arith.constant 0 : index
    %c48 = arith.constant 48 : index
    %177 = vector.load %arg8[%c0_182, %c0_183, %c48] : memref<1x16x128xf32, #tpu.memory_space<vmem>>, vector<1x16x8xf32>
    %178 = vector.shape_cast %177 : vector<1x16x8xf32> to vector<16x8xf32>
    %179 = vector.shape_cast %176 : vector<16x8xf32> to vector<1x16x8xf32>
    tpu.vector_store %arg8[%c0_182, %c0_183, %c48], %179 {strides = array<i32>} : memref<1x16x128xf32, #tpu.memory_space<vmem>>, vector<1x16x8xf32>,
    %180 = vector.extract_strided_slice %144 {offsets = [0, 7, 0], sizes = [16, 1, 8], strides = [1, 1, 1]} : vector<16x16x8xf32> to vector<16x1x8xf32>
    %181 = vector.shape_cast %180 : vector<16x1x8xf32> to vector<16x8xf32>
    %c0_184 = arith.constant 0 : index
    %c0_185 = arith.constant 0 : index
    %c56 = arith.constant 56 : index
    %182 = vector.load %arg8[%c0_184, %c0_185, %c56] : memref<1x16x128xf32, #tpu.memory_space<vmem>>, vector<1x16x8xf32>
    %183 = vector.shape_cast %182 : vector<1x16x8xf32> to vector<16x8xf32>
    %184 = vector.shape_cast %181 : vector<16x8xf32> to vector<1x16x8xf32>
    tpu.vector_store %arg8[%c0_184, %c0_185, %c56], %184 {strides = array<i32>} : memref<1x16x128xf32, #tpu.memory_space<vmem>>, vector<1x16x8xf32>,
    %185 = vector.extract_strided_slice %144 {offsets = [0, 8, 0], sizes = [16, 1, 8], strides = [1, 1, 1]} : vector<16x16x8xf32> to vector<16x1x8xf32>
    %186 = vector.shape_cast %185 : vector<16x1x8xf32> to vector<16x8xf32>
    %c0_186 = arith.constant 0 : index
    %c0_187 = arith.constant 0 : index
    %c64 = arith.constant 64 : index
    %187 = vector.load %arg8[%c0_186, %c0_187, %c64] : memref<1x16x128xf32, #tpu.memory_space<vmem>>, vector<1x16x8xf32>
    %188 = vector.shape_cast %187 : vector<1x16x8xf32> to vector<16x8xf32>
    %189 = vector.shape_cast %186 : vector<16x8xf32> to vector<1x16x8xf32>
    tpu.vector_store %arg8[%c0_186, %c0_187, %c64], %189 {strides = array<i32>} : memref<1x16x128xf32, #tpu.memory_space<vmem>>, vector<1x16x8xf32>,
    %190 = vector.extract_strided_slice %144 {offsets = [0, 9, 0], sizes = [16, 1, 8], strides = [1, 1, 1]} : vector<16x16x8xf32> to vector<16x1x8xf32>
    %191 = vector.shape_cast %190 : vector<16x1x8xf32> to vector<16x8xf32>
    %c0_188 = arith.constant 0 : index
    %c0_189 = arith.constant 0 : index
    %c72 = arith.constant 72 : index
    %192 = vector.load %arg8[%c0_188, %c0_189, %c72] : memref<1x16x128xf32, #tpu.memory_space<vmem>>, vector<1x16x8xf32>
    %193 = vector.shape_cast %192 : vector<1x16x8xf32> to vector<16x8xf32>
    %194 = vector.shape_cast %191 : vector<16x8xf32> to vector<1x16x8xf32>
    tpu.vector_store %arg8[%c0_188, %c0_189, %c72], %194 {strides = array<i32>} : memref<1x16x128xf32, #tpu.memory_space<vmem>>, vector<1x16x8xf32>,
    %195 = vector.extract_strided_slice %144 {offsets = [0, 10, 0], sizes = [16, 1, 8], strides = [1, 1, 1]} : vector<16x16x8xf32> to vector<16x1x8xf32>
    %196 = vector.shape_cast %195 : vector<16x1x8xf32> to vector<16x8xf32>
    %c0_190 = arith.constant 0 : index
    %c0_191 = arith.constant 0 : index
    %c80 = arith.constant 80 : index
    %197 = vector.load %arg8[%c0_190, %c0_191, %c80] : memref<1x16x128xf32, #tpu.memory_space<vmem>>, vector<1x16x8xf32>
    %198 = vector.shape_cast %197 : vector<1x16x8xf32> to vector<16x8xf32>
    %199 = vector.shape_cast %196 : vector<16x8xf32> to vector<1x16x8xf32>
    tpu.vector_store %arg8[%c0_190, %c0_191, %c80], %199 {strides = array<i32>} : memref<1x16x128xf32, #tpu.memory_space<vmem>>, vector<1x16x8xf32>,
    %200 = vector.extract_strided_slice %144 {offsets = [0, 11, 0], sizes = [16, 1, 8], strides = [1, 1, 1]} : vector<16x16x8xf32> to vector<16x1x8xf32>
    %201 = vector.shape_cast %200 : vector<16x1x8xf32> to vector<16x8xf32>
    %c0_192 = arith.constant 0 : index
    %c0_193 = arith.constant 0 : index
    %c88 = arith.constant 88 : index
    %202 = vector.load %arg8[%c0_192, %c0_193, %c88] : memref<1x16x128xf32, #tpu.memory_space<vmem>>, vector<1x16x8xf32>
    %203 = vector.shape_cast %202 : vector<1x16x8xf32> to vector<16x8xf32>
    %204 = vector.shape_cast %201 : vector<16x8xf32> to vector<1x16x8xf32>
    tpu.vector_store %arg8[%c0_192, %c0_193, %c88], %204 {strides = array<i32>} : memref<1x16x128xf32, #tpu.memory_space<vmem>>, vector<1x16x8xf32>,
    %205 = vector.extract_strided_slice %144 {offsets = [0, 12, 0], sizes = [16, 1, 8], strides = [1, 1, 1]} : vector<16x16x8xf32> to vector<16x1x8xf32>
    %206 = vector.shape_cast %205 : vector<16x1x8xf32> to vector<16x8xf32>
    %c0_194 = arith.constant 0 : index
    %c0_195 = arith.constant 0 : index
    %c96 = arith.constant 96 : index
    %207 = vector.load %arg8[%c0_194, %c0_195, %c96] : memref<1x16x128xf32, #tpu.memory_space<vmem>>, vector<1x16x8xf32>
    %208 = vector.shape_cast %207 : vector<1x16x8xf32> to vector<16x8xf32>
    %209 = vector.shape_cast %206 : vector<16x8xf32> to vector<1x16x8xf32>
    tpu.vector_store %arg8[%c0_194, %c0_195, %c96], %209 {strides = array<i32>} : memref<1x16x128xf32, #tpu.memory_space<vmem>>, vector<1x16x8xf32>,
    %210 = vector.extract_strided_slice %144 {offsets = [0, 13, 0], sizes = [16, 1, 8], strides = [1, 1, 1]} : vector<16x16x8xf32> to vector<16x1x8xf32>
    %211 = vector.shape_cast %210 : vector<16x1x8xf32> to vector<16x8xf32>
    %c0_196 = arith.constant 0 : index
    %c0_197 = arith.constant 0 : index
    %c104 = arith.constant 104 : index
    %212 = vector.load %arg8[%c0_196, %c0_197, %c104] : memref<1x16x128xf32, #tpu.memory_space<vmem>>, vector<1x16x8xf32>
    %213 = vector.shape_cast %212 : vector<1x16x8xf32> to vector<16x8xf32>
    %214 = vector.shape_cast %211 : vector<16x8xf32> to vector<1x16x8xf32>
    tpu.vector_store %arg8[%c0_196, %c0_197, %c104], %214 {strides = array<i32>} : memref<1x16x128xf32, #tpu.memory_space<vmem>>, vector<1x16x8xf32>,
    %215 = vector.extract_strided_slice %144 {offsets = [0, 14, 0], sizes = [16, 1, 8], strides = [1, 1, 1]} : vector<16x16x8xf32> to vector<16x1x8xf32>
    %216 = vector.shape_cast %215 : vector<16x1x8xf32> to vector<16x8xf32>
    %c0_198 = arith.constant 0 : index
    %c0_199 = arith.constant 0 : index
    %c112 = arith.constant 112 : index
    %217 = vector.load %arg8[%c0_198, %c0_199, %c112] : memref<1x16x128xf32, #tpu.memory_space<vmem>>, vector<1x16x8xf32>
    %218 = vector.shape_cast %217 : vector<1x16x8xf32> to vector<16x8xf32>
    %219 = vector.shape_cast %216 : vector<16x8xf32> to vector<1x16x8xf32>
    tpu.vector_store %arg8[%c0_198, %c0_199, %c112], %219 {strides = array<i32>} : memref<1x16x128xf32, #tpu.memory_space<vmem>>, vector<1x16x8xf32>,
    %220 = vector.extract_strided_slice %144 {offsets = [0, 15, 0], sizes = [16, 1, 8], strides = [1, 1, 1]} : vector<16x16x8xf32> to vector<16x1x8xf32>
    %221 = vector.shape_cast %220 : vector<16x1x8xf32> to vector<16x8xf32>
    %c0_200 = arith.constant 0 : index
    %c0_201 = arith.constant 0 : index
    %c120 = arith.constant 120 : index
    %222 = vector.load %arg8[%c0_200, %c0_201, %c120] : memref<1x16x128xf32, #tpu.memory_space<vmem>>, vector<1x16x8xf32>
    %223 = vector.shape_cast %222 : vector<1x16x8xf32> to vector<16x8xf32>
    %224 = vector.shape_cast %221 : vector<16x8xf32> to vector<1x16x8xf32>
    tpu.vector_store %arg8[%c0_200, %c0_201, %c120], %224 {strides = array<i32>} : memref<1x16x128xf32, #tpu.memory_space<vmem>>, vector<1x16x8xf32>,
    return
  }
  func.func @transform_0(%arg0: i32) -> (i32, i32, i32, i32) {
    %c0_i32 = arith.constant 0 : i32
    %c0_i32_0 = arith.constant 0 : i32
    %c0_i32_1 = arith.constant 0 : i32
    %c0_i32_2 = arith.constant 0 : i32
    return %arg0, %c0_i32, %c0_i32_0, %c0_i32_1 : i32, i32, i32, i32
  }
  func.func @transform_1(%arg0: i32) -> (i32, i32, i32) {
    %c0_i32 = arith.constant 0 : i32
    %c0_i32_0 = arith.constant 0 : i32
    %c0_i32_1 = arith.constant 0 : i32
    %c0_i32_2 = arith.constant 0 : i32
    return %c0_i32, %c0_i32_0, %c0_i32_1 : i32, i32, i32
  }
  func.func @transform_2(%arg0: i32) -> (i32, i32) {
    %c0_i32 = arith.constant 0 : i32
    %c0_i32_0 = arith.constant 0 : i32
    %c0_i32_1 = arith.constant 0 : i32
    return %c0_i32, %c0_i32_0 : i32, i32
  }
  func.func @transform_3(%arg0: i32) -> (i32, i32, i32) {
    %c0_i32 = arith.constant 0 : i32
    %c0_i32_0 = arith.constant 0 : i32
    %c0_i32_1 = arith.constant 0 : i32
    %c0_i32_2 = arith.constant 0 : i32
    return %c0_i32, %c0_i32_0, %c0_i32_1 : i32, i32, i32
  }
  func.func @transform_4(%arg0: i32) -> (i32, i32) {
    %c0_i32 = arith.constant 0 : i32
    %c0_i32_0 = arith.constant 0 : i32
    %c0_i32_1 = arith.constant 0 : i32
    return %c0_i32, %c0_i32_0 : i32, i32
  }
  func.func @transform_5(%arg0: i32) -> (i32, i32) {
    %c0_i32 = arith.constant 0 : i32
    %c0_i32_0 = arith.constant 0 : i32
    %c0_i32_1 = arith.constant 0 : i32
    return %c0_i32, %c0_i32_0 : i32, i32
  }
  func.func @transform_6(%arg0: i32) -> (i32, i32) {
    %c0_i32 = arith.constant 0 : i32
    %c0_i32_0 = arith.constant 0 : i32
    %c0_i32_1 = arith.constant 0 : i32
    return %c0_i32, %c0_i32_0 : i32, i32
  }
  func.func @transform_7(%arg0: i32) -> (i32, i32, i32) {
    %c0_i32 = arith.constant 0 : i32
    %c0_i32_0 = arith.constant 0 : i32
    %c0_i32_1 = arith.constant 0 : i32
    return %arg0, %c0_i32, %c0_i32_0 : i32, i32, i32
  }
}

</mosaic_0001>

<bundles_post_ra>
// kernel: resnet_block_forward.1
= control target key start
LH: loop header
LB: loop body
LE: loop exit
PB: predicated region body
PF: predicated region fallthrough
CT: control target
= control target key end

     0   :  { %s7012_s24 = smov 0   ;;  %s10237_s0 = inlined_call_operand.vmem [shape: f32[2,16,16,4], index: 0, kind: input, shape index: {}]   ;;  %s10238_s1 = inlined_call_operand.vmem [shape: f32[9,4,8], index: 1, kind: input, shape index: {}]   ;;  %s10239_s2 = inlined_call_operand.vmem [shape: f32[1,8], index: 2, kind: input, shape index: {}]   ;;  %s10240_s3 = inlined_call_operand.vmem [shape: f32[9,8,8], index: 3, kind: input, shape index: {}]   ;;  %s10241_s4 = inlined_call_operand.vmem [shape: f32[1,8], index: 4, kind: input, shape index: {}]   ;;  %s10242_s5 = inlined_call_operand.vmem [shape: f32[4,8], index: 5, kind: input, shape index: {}]   ;;  %s10243_s6 = inlined_call_operand.vmem [shape: f32[1,8], index: 6, kind: input, shape index: {}]   ;;  %s10244_s7 = inlined_call_operand.vmem [shape: f32[2,16,128], index: 7, kind: output, shape index: {}]  }
   0x1 LB: > { %s6259_s25 = sadd.s32 4294967295, %s6954_s24   ;;  %p6263_p0 = scmp.ge.s32.totalorder %s6954_s24, 1  ;;  %s6954_s24 = sphi %s7012_s24, %s17_s24  }
   0x2   : > { %p237_p1 = scmp.lt.s32.totalorder %s6954_s24, 3 }
   0x4   : > { %p238_p2 = pnand %p6263_p0, %p237_p1 }
   0x6   : > { %241 = sbr.rel (%p238_p2) target bundleno = 1709 (0x6ad), region = 48 }
   0xb   : > { %v6268_v0 = vld [vmem:[%s10238_s1 + $0x4] sm:$0xf]  ;;  %vm553_vm0 = vcmask 1043456   ;;  %vm311_vm1 = vcmask 31744   ;;  %p269_p3 = scmp.lt.s32.totalorder %s6259_s25, 1  ;;  %v10245_v1 = vmov 0.0  }
   0xc   : > { %6269 = vmatpush.msk.msra.mxu0 %vm553_vm0, %v6268_v0  ;;  %312 = vst.msk [vmem:[#allocation2] sm:$0xff] %vm311_vm1, %v10245_v1  ;;  %6906 = vmatpush.msk.msra.mxu3 %vm553_vm0, %v6268_v0  ;;  %v422_v2 = vld [vmem:[%s10238_s1] sm:$0xf]  ;;  %v6335_v3 = vld [vmem:[%s10238_s1 + $0x8] sm:$0xf]  ;;  %vm314_vm2 = vcmask 25600  }
   0xd   : > { %313 = vst.msk [vmem:[#allocation2 + $0x8] sm:$0xff] %vm311_vm1, %v10245_v1  ;;  %s10614_s25 = smov (!%p269_p3, %s6259_s25), 1  ;;  %6336 = vmatpush.msk.msra.mxu2 %vm553_vm0, %v6335_v3  ;;  %6302 = vmatpush.msk.msra.mxu1 %vm553_vm0, %v422_v2  ;;  %vm320_vm3 = vcmask 24576   ;;  %v6403_v8 = vld [vmem:[%s10238_s1 + $0x10] sm:$0xf]  ;;  %vm2897_vm4 = vcmask 64512  }
   0xe   : > { %6907 = vmatpush.msk.msrb.mxu3 %vm553_vm0, %v422_v2  ;;  %317 = vst.msk [vmem:[#allocation2 + $0x198] sm:$0xff] %vm311_vm1, %v10245_v1  ;;  %s6904_s9 = sshll.u32 %s10614_s25, 8  ;;  %6404 = vmatpush.msk.msrb.mxu0 %vm553_vm0, %v6403_v8  ;;  %vm2906_vm5 = vcmask 57344   ;;  %vm2900_vm6 = vcmask 58368   ;;  %s6957_s11 = smov 56   ;;  %vm5739_vm7 = vcmask 1047559  }
   0xf   : > { %318 = vst.msk [vmem:[#allocation2 + $0x1a0] sm:$0xff] %vm311_vm1, %v10245_v1  ;;  %s7048_s12 = scalar_lea.vmem %s10237_s0, %s6904_s9  ;;  %vm5736_vm8 = vcmask 1046534   ;;  %vm5733_vm9 = vcmask 1045509   ;;  %vm5730_vm10 = vcmask 1044484   ;;  %vm5727_vm11 = vcmask 1043459   ;;  %s6959_s13 = smov 112  }
  0x10   : > { %315 = vst.msk [vmem:[#allocation2 + $0x10] sm:$0x3] %vm314_vm2, %v10245_v1  ;;  %v7052_v4 = vld [vmem:[%s7048_s12 + $0xb0] sm:$0xff]  ;;  %v7056_v5 = vld [vmem:[%s7048_s12 + $0xb8] sm:$0xff]  ;;  %v7144_v15 = vld [vmem:[%s7048_s12] sm:$0xff]  ;;  %vm5724_vm12 = vcmask 1042434  }
  0x11   : > { %10324 = vst [vmem:[#allocation4_spill] sm:$0xff] %v7052_v4  ;;  %v7149_v16 = vld [vmem:[%s7048_s12 + $0xc0] sm:$0xff]  ;;  %v7154_v17 = vld [vmem:[%s7048_s12 + $0x8] sm:$0xff]  ;;  %v7164_v19 = vld [vmem:[%s7048_s12 + $0x10] sm:$0xff]  ;;  %vm5721_vm13 = vcmask 1041409   ;;  %s6960_s14 = smov 40  }
  0x12   : > { %319 = vst.msk [vmem:[#allocation2 + $0x1a8] sm:$0x3] %vm314_vm2, %v10245_v1  ;;  %v7159_v18 = vld [vmem:[%s7048_s12 + $0xc8] sm:$0xff]  ;;  %v7169_v20 = vld [vmem:[%s7048_s12 + $0xd0] sm:$0xff]  ;;  %v7174_v21 = vld [vmem:[%s7048_s12 + $0x18] sm:$0xff]  ;;  %s6961_s15 = smov 104  }
  0x13   : > { %10325 = vst [vmem:[#allocation5_spill] sm:$0xff] %v7056_v5  ;;  %v7179_v22 = vld [vmem:[%s7048_s12 + $0xd8] sm:$0xff]  ;;  %v7184_v23 = vld [vmem:[%s7048_s12 + $0x20] sm:$0xff]  ;;  %v7198_v27 = vld [vmem:[%s7048_s12 + $0x28] sm:$0xff]  ;;  %s6962_s16 = smov 32   ;;  %s6963_s17 = smov 96  }
  0x14   : > { %380 = vst.msk [vmem:[#allocation2 + $0x121] sm:$0xff] %vm311_vm1, %v7052_v4  ;;  %v423_v6 = vld [vmem:[#allocation2 + $0x1] sm:$0xff]  ;;  %v7227_v35 = vld [vmem:[%s7048_s12 + $0x30] sm:$0xff]  ;;  %v7245_v40 = vld [vmem:[%s7048_s12 + $0x38] sm:$0xff]  ;;  %s6964_s18 = smov 24   ;;  %s6965_s19 = smov 88  }
  0x15   : > { %381 = vst.msk [vmem:[#allocation2 + $0x129] sm:$0xff] %vm311_vm1, %v7056_v5  ;;  %v882_v7 = vld [vmem:[#allocation2 + $0x2] sm:$0xff]  ;;  %6270 = vmatmul.msk.f32.vlgmr.msra.gmra.mxu0 %vm311_vm1, %v423_v6  ;;  %v7299_v55 = vld [vmem:[%s7048_s12 + $0x50] sm:$0xff]  ;;  %v7317_v60 = vld [vmem:[%s7048_s12 + $0x58] sm:$0xff]  ;;  %s6966_s20 = smov 16   ;;  %s6967_s21 = smov 80  }
  0x16   : > { %321 = vst.msk [vmem:[#allocation2] sm:$0x1] %vm320_vm3, %v10245_v1  ;;  %6337 = vmatmul.msk.f32.vlgmr.msra.gmra.mxu2 %vm311_vm1, %v882_v7  ;;  %v391_v13 = vld [vmem:[#allocation2 + $0x8] sm:$0xff]  ;;  %v7189_v24 = vld [vmem:[%s7048_s12 + $0xe0] sm:$0xff]  ;;  %v7455_v5 = vld [vmem:[%s7048_s12 + $0x90] sm:$0xff]  ;;  %s6968_s22 = smov 8  }
  0x17   : > { %322 = vst.msk [vmem:[#allocation2 + $0x18] sm:$0x1] %vm320_vm3, %v10245_v1  ;;  %v424_v10 = vld [vmem:[#allocation2 + $0x9] sm:$0xff]  ;;  %v7263_v45 = vld [vmem:[%s7048_s12 + $0x40] sm:$0xff]  ;;  %s6969_s23 = smov 72   ;;  %s6905_s26 = sshll.u32 %s10614_s25, 4 }
  0x18   : > { %323 = vst.msk [vmem:[#allocation2 + $0x30] sm:$0x1] %vm320_vm3, %v10245_v1  ;;  %v7220_v33 = vld [vmem:[%s7048_s12 + $0xe8] sm:$0xff]  ;;  %v7335_v2 = vld [vmem:[%s7048_s12 + $0x60] sm:$0xff]  ;;  %s9909_s29 = scalar_lea.vmem %s10244_s7, %s6905_s26  ;;  %s6970_s25 = smov 64   ;;  %vm5781_vm14 = vcmask 130113  }
  0x19   : > { %324 = vst.msk [vmem:[#allocation2 + $0x48] sm:$0x1] %vm320_vm3, %v10245_v1  ;;  %v7281_v50 = vld [vmem:[%s7048_s12 + $0x48] sm:$0xff]  ;;  %vm5809_vm15 = vcmask 195714   ;;  %vm5893_vm2 = vcmask 392517   ;;  %s6971_s26 = smov 120  }
  0x1a   : > { %325 = vst.msk [vmem:[#allocation2 + $0x60] sm:$0x1] %vm320_vm3, %v10245_v1 }
  0x1b   : > { %v447_v9 = vld [vmem:[#allocation2 + $0x121] sm:$0xff]  ;;  %326 = vst.msk [vmem:[#allocation2 + $0x78] sm:$0x1] %vm320_vm3, %v10245_v1 }
  0x1c   : > { %6294 = vmatmul.msk.f32.vlgmr.msra.gmra.mxu3 %vm311_vm1, %v447_v9  ;;  %327 = vst.msk [vmem:[#allocation2 + $0x90] sm:$0x1] %vm320_vm3, %v10245_v1  ;;  %v448_v12 = vld [vmem:[#allocation2 + $0x129] sm:$0xff] }
  0x1d   : > { %v390_v11 = vld [vmem:[#allocation2] sm:$0xff]  ;;  %328 = vst.msk [vmem:[#allocation2 + $0xa8] sm:$0x1] %vm320_vm3, %v10245_v1  ;;  %6908 = vmatpush.msk.msra.mxu3 %vm553_vm0, %v6335_v3  ;;  %6271 = vmatmul.msk.f32.gmra.mxu0 %vm311_vm1, %v424_v10  ;;  %v415_v63 = vld [vmem:[#allocation2 + $0x128] sm:$0xff] }
  0x1e   : > { %6303 = vmatmul.msk.f32.vlgmr.msra.gmra.mxu1 %vm311_vm1, %v390_v11  ;;  %329 = vst.msk [vmem:[#allocation2 + $0xc0] sm:$0x1] %vm320_vm3, %v10245_v1  ;;  %v7353_v9 = vld [vmem:[%s7048_s12 + $0x68] sm:$0xff] }
  0x1f   : > { %330 = vst.msk [vmem:[#allocation2 + $0xd8] sm:$0x1] %vm320_vm3, %v10245_v1 }
  0x20   : > { %331 = vst.msk [vmem:[#allocation2 + $0xf0] sm:$0x1] %vm320_vm3, %v10245_v1 }
  0x21   : > { %332 = vst.msk [vmem:[#allocation2 + $0x108] sm:$0x1] %vm320_vm3, %v10245_v1 }
  0x22   : > { %333 = vst.msk [vmem:[#allocation2 + $0x120] sm:$0x1] %vm320_vm3, %v10245_v1 }
  0x23   : > { %334 = vst.msk [vmem:[#allocation2 + $0x138] sm:$0x1] %vm320_vm3, %v10245_v1 }
  0x24   : > { %6295 = vmatmul.msk.f32.gmra.mxu3 %vm311_vm1, %v448_v12  ;;  %335 = vst.msk [vmem:[#allocation2 + $0x150] sm:$0x1] %vm320_vm3, %v10245_v1 }
  0x25   : > { %336 = vst.msk [vmem:[#allocation2 + $0x168] sm:$0x1] %vm320_vm3, %v10245_v1 }
  0x26   : > { %337 = vst.msk [vmem:[#allocation2 + $0x180] sm:$0x1] %vm320_vm3, %v10245_v1  ;;  %6304 = vmatmul.msk.f32.gmra.mxu1 %vm311_vm1, %v391_v13 }
  0x27   : > { %338 = vst.msk [vmem:[#allocation2 + $0x198] sm:$0x1] %vm320_vm3, %v10245_v1 }
  0x28   : > { %339 = vst.msk [vmem:[#allocation2 + $0x11] sm:$0x1] %vm320_vm3, %v10245_v1 }
  0x29   : > { %340 = vst.msk [vmem:[#allocation2 + $0x29] sm:$0x1] %vm320_vm3, %v10245_v1  ;;  %v414_v58 = vld [vmem:[#allocation2 + $0x120] sm:$0xff] }
  0x2a   : > { %341 = vst.msk [vmem:[#allocation2 + $0x41] sm:$0x1] %vm320_vm3, %v10245_v1 }
  0x2b   : > { %342 = vst.msk [vmem:[#allocation2 + $0x59] sm:$0x1] %vm320_vm3, %v10245_v1 }
  0x2c   : > { %343 = vst.msk [vmem:[#allocation2 + $0x71] sm:$0x1] %vm320_vm3, %v10245_v1 }
  0x2d   : > { %344 = vst.msk [vmem:[#allocation2 + $0x89] sm:$0x1] %vm320_vm3, %v10245_v1 }
  0x2e   : > { %345 = vst.msk [vmem:[#allocation2 + $0xa1] sm:$0x1] %vm320_vm3, %v10245_v1 }
  0x2f   : > { %346 = vst.msk [vmem:[#allocation2 + $0xb9] sm:$0x1] %vm320_vm3, %v10245_v1  ;;  %v883_v14 = vld [vmem:[#allocation2 + $0xa] sm:$0xff] }
  0x30   : > { %347 = vst.msk [vmem:[#allocation2 + $0xd1] sm:$0x1] %vm320_vm3, %v10245_v1  ;;  %6338 = vmatmul.msk.f32.gmra.mxu2 %vm311_vm1, %v883_v14  ;;  %v7371_v14 = vld [vmem:[%s7048_s12 + $0x70] sm:$0xff] }
  0x31   : > { %348 = vst.msk [vmem:[#allocation2 + $0xe9] sm:$0x1] %vm320_vm3, %v10245_v1 }
  0x32   : > { %349 = vst.msk [vmem:[#allocation2 + $0x101] sm:$0x1] %vm320_vm3, %v10245_v1 }
  0x33   : > { %350 = vst.msk [vmem:[#allocation2 + $0x119] sm:$0x1] %vm320_vm3, %v10245_v1 }
  0x34   : > { %351 = vst.msk [vmem:[#allocation2 + $0x131] sm:$0x1] %vm320_vm3, %v10245_v1 }
  0x35   : > { %352 = vst.msk [vmem:[#allocation2 + $0x149] sm:$0x1] %vm320_vm3, %v10245_v1 }
  0x36   : > { %353 = vst.msk [vmem:[#allocation2 + $0x161] sm:$0x1] %vm320_vm3, %v10245_v1 }
  0x37   : > { %354 = vst.msk [vmem:[#allocation2 + $0x179] sm:$0x1] %vm320_vm3, %v10245_v1 }
  0x38   : > { %10326 = vst [vmem:[#allocation6_spill] sm:$0xff] %v7144_v15 }
  0x39   : > { %355 = vst.msk [vmem:[#allocation2 + $0x191] sm:$0x1] %vm320_vm3, %v10245_v1 }
  0x3a   : > { %10327 = vst [vmem:[#allocation7_spill] sm:$0xff] %v7149_v16 }
  0x3b   : > { %356 = vst.msk [vmem:[#allocation2 + $0x1a9] sm:$0x1] %vm320_vm3, %v10245_v1  ;;  %v7411_v1 = vld [vmem:[%s7048_s12 + $0x80] sm:$0xff]  ;;  %vm5921_vm3 = vcmask 458118  }
  0x3c   : > { %10328 = vst [vmem:[#allocation8_spill] sm:$0xff] %v7154_v17 }
  0x3d   : > { %358 = vst.msk [vmem:[#allocation2 + $0x19] sm:$0xff] %vm311_vm1, %v7144_v15 }
  0x3e   : > { %10329 = vst [vmem:[#allocation9_spill] sm:$0xff] %v7159_v18 }
  0x3f   : > { %382 = vst.msk [vmem:[#allocation2 + $0x139] sm:$0xff] %vm311_vm1, %v7149_v16 }
  0x40   : > { %10330 = vst [vmem:[#allocation10_spill] sm:$0xff] %v7164_v19 }
  0x41   : > { %359 = vst.msk [vmem:[#allocation2 + $0x21] sm:$0xff] %vm311_vm1, %v7154_v17 }
  0x42   : > { %10331 = vst [vmem:[#allocation11_spill] sm:$0xff] %v7169_v20 }
  0x43   : > { %383 = vst.msk [vmem:[#allocation2 + $0x141] sm:$0xff] %vm311_vm1, %v7159_v18 }
  0x44   : > { %10332 = vst [vmem:[#allocation12_spill] sm:$0xff] %v7174_v21  ;;  %v7191_v25 = vld [vmem:[#allocation2 + $0x19] sm:$0xff] }
  0x45   : > { %360 = vst.msk [vmem:[#allocation2 + $0x31] sm:$0xff] %vm311_vm1, %v7164_v19  ;;  %v7193_v26 = vld [vmem:[#allocation2 + $0x18] sm:$0xff]  ;;  %6272 = vmatmul.msk.f32.gmra.mxu0 %vm311_vm1, %v7191_v25 }
  0x46   : > { %10333 = vst [vmem:[#allocation13_spill] sm:$0xff] %v7179_v22  ;;  %v449_v28 = vld [vmem:[#allocation2 + $0x139] sm:$0xff]  ;;  %6305 = vmatmul.msk.f32.gmra.mxu1 %vm311_vm1, %v7193_v26 }
  0x47   : > { %384 = vst.msk [vmem:[#allocation2 + $0x151] sm:$0xff] %vm311_vm1, %v7169_v20  ;;  %6296 = vmatmul.msk.f32.gmra.mxu3 %vm311_vm1, %v449_v28  ;;  %v416_v7 = vld [vmem:[#allocation2 + $0x138] sm:$0xff] }
  0x48   : > { %10334 = vst [vmem:[#allocation14_spill] sm:$0xff] %v7184_v23  ;;  %v7207_v29 = vld [vmem:[#allocation2 + $0x1a] sm:$0xff]  ;;  %v7222_v34 = vld [vmem:[#allocation2 + $0x22] sm:$0xff] }
  0x49   : > { %361 = vst.msk [vmem:[#allocation2 + $0x39] sm:$0xff] %vm311_vm1, %v7174_v21  ;;  %6339 = vmatmul.msk.f32.gmra.mxu2 %vm311_vm1, %v7207_v29  ;;  %v7215_v30 = vld [vmem:[#allocation2 + $0x21] sm:$0xff] }
  0x4a   : > { %10335 = vst [vmem:[#allocation15_spill] sm:$0xff] %v7189_v24  ;;  %v7217_v31 = vld [vmem:[#allocation2 + $0x20] sm:$0xff] }
  0x4b   : > { %385 = vst.msk [vmem:[#allocation2 + $0x159] sm:$0xff] %vm311_vm1, %v7179_v22  ;;  %v450_v32 = vld [vmem:[#allocation2 + $0x141] sm:$0xff] }
  0x4c   : > { %10336 = vst [vmem:[#allocation16_spill] sm:$0xff] %v7198_v27  ;;  %v7238_v36 = vld [vmem:[#allocation2 + $0x31] sm:$0xff]  ;;  %v417_v12 = vld [vmem:[#allocation2 + $0x140] sm:$0xff] }
  0x4d   : > { %362 = vst.msk [vmem:[#allocation2 + $0x49] sm:$0xff] %vm311_vm1, %v7184_v23  ;;  %6273 = vmatmul.msk.f32.gmra.mxu0 %vm311_vm1, %v7215_v30  ;;  %v7240_v37 = vld [vmem:[#allocation2 + $0x30] sm:$0xff]  ;;  %v7532_v15 = vld [vmem:[#allocation2 + $0x13a] sm:$0xff] }
  0x4e   : > { %386 = vst.msk [vmem:[#allocation2 + $0x169] sm:$0xff] %vm311_vm1, %v7189_v24  ;;  %6306 = vmatmul.msk.f32.gmra.mxu1 %vm311_vm1, %v7217_v31  ;;  %v451_v38 = vld [vmem:[#allocation2 + $0x151] sm:$0xff] }
  0x4f   : > { %363 = vst.msk [vmem:[#allocation2 + $0x51] sm:$0xff] %vm311_vm1, %v7198_v27  ;;  %6297 = vmatmul.msk.f32.gmra.mxu3 %vm311_vm1, %v450_v32  ;;  %v6437_v24 = vld [vmem:[%s10238_s1 + $0x14] sm:$0xf] }
  0x50   : > { %10337 = vst [vmem:[#allocation17_spill] sm:$0xff] %v7220_v33  ;;  %v7242_v39 = vld [vmem:[#allocation2 + $0x32] sm:$0xff]  ;;  %v7260_v44 = vld [vmem:[#allocation2 + $0x3a] sm:$0xff]  ;;  %6438 = vmatpush.msk.msrb.mxu1 %vm553_vm0, %v6437_v24 }
  0x51   : > { %387 = vst.msk [vmem:[#allocation2 + $0x171] sm:$0xff] %vm311_vm1, %v7220_v33  ;;  %6340 = vmatmul.msk.f32.gmra.mxu2 %vm311_vm1, %v7222_v34  ;;  %v7256_v41 = vld [vmem:[#allocation2 + $0x39] sm:$0xff] }
  0x52   : > { %10338 = vst [vmem:[#allocation18_spill] sm:$0xff] %v7227_v35  ;;  %v7258_v42 = vld [vmem:[#allocation2 + $0x38] sm:$0xff] }
  0x53   : > { %364 = vst.msk [vmem:[#allocation2 + $0x61] sm:$0xff] %vm311_vm1, %v7227_v35  ;;  %v452_v43 = vld [vmem:[#allocation2 + $0x159] sm:$0xff] }
  0x54   : > { %10339 = vst [vmem:[#allocation19_spill] sm:$0xff] %v7245_v40  ;;  %v7274_v46 = vld [vmem:[#allocation2 + $0x49] sm:$0xff] }
  0x55   : > { %6274 = vmatmul.msk.f32.gmra.mxu0 %vm311_vm1, %v7238_v36  ;;  %365 = vst.msk [vmem:[#allocation2 + $0x69] sm:$0xff] %vm311_vm1, %v7245_v40  ;;  %v7276_v47 = vld [vmem:[#allocation2 + $0x48] sm:$0xff]  ;;  %v7508_v40 = vld [vmem:[%s7048_s12 + $0xa0] sm:$0xff] }
  0x56   : > { %6307 = vmatmul.msk.f32.gmra.mxu1 %vm311_vm1, %v7240_v37  ;;  %10340 = vst [vmem:[#allocation20_spill] sm:$0xff] %v7263_v45  ;;  %v453_v48 = vld [vmem:[#allocation2 + $0x169] sm:$0xff]  ;;  %v7292_v51 = vld [vmem:[#allocation2 + $0x51] sm:$0xff] }
  0x57   : > { %6298 = vmatmul.msk.f32.gmra.mxu3 %vm311_vm1, %v451_v38  ;;  %366 = vst.msk [vmem:[#allocation2 + $0x79] sm:$0xff] %vm311_vm1, %v7263_v45  ;;  %v7278_v49 = vld [vmem:[#allocation2 + $0x4a] sm:$0xff]  ;;  %v7296_v54 = vld [vmem:[#allocation2 + $0x52] sm:$0xff] }
  0x58   : > { %10341 = vst [vmem:[#allocation21_spill] sm:$0xff] %v7281_v50  ;;  %v7294_v52 = vld [vmem:[#allocation2 + $0x50] sm:$0xff]  ;;  %v420_v22 = vld [vmem:[#allocation2 + $0x168] sm:$0xff] }
  0x59   : > { %6341 = vmatmul.msk.f32.gmra.mxu2 %vm311_vm1, %v7242_v39  ;;  %367 = vst.msk [vmem:[#allocation2 + $0x81] sm:$0xff] %vm311_vm1, %v7281_v50  ;;  %v454_v53 = vld [vmem:[#allocation2 + $0x171] sm:$0xff] }
  0x5a   : > { %10342 = vst [vmem:[#allocation22_spill] sm:$0xff] %v7299_v55  ;;  %v7310_v56 = vld [vmem:[#allocation2 + $0x61] sm:$0xff]  ;;  %v418_v38 = vld [vmem:[#allocation2 + $0x150] sm:$0xff] }
  0x5b   : > { %368 = vst.msk [vmem:[#allocation2 + $0x91] sm:$0xff] %vm311_vm1, %v7299_v55  ;;  %v7312_v57 = vld [vmem:[#allocation2 + $0x60] sm:$0xff]  ;;  %v421_v18 = vld [vmem:[#allocation2 + $0x170] sm:$0xff] }
  0x5c   : > { %v7314_v59 = vld [vmem:[#allocation2 + $0x62] sm:$0xff]  ;;  %10343 = vst [vmem:[#allocation23_spill] sm:$0xff] %v7317_v60  ;;  %v7332_v0 = vld [vmem:[#allocation2 + $0x6a] sm:$0xff] }
  0x5d   : > { %6275 = vmatmul.msk.f32.gmra.mxu0 %vm311_vm1, %v7256_v41  ;;  %369 = vst.msk [vmem:[#allocation2 + $0x99] sm:$0xff] %vm311_vm1, %v7317_v60  ;;  %v7328_v61 = vld [vmem:[#allocation2 + $0x69] sm:$0xff] }
  0x5e   : > { %6308 = vmatmul.msk.f32.gmra.mxu1 %vm311_vm1, %v7258_v42  ;;  %v7330_v62 = vld [vmem:[#allocation2 + $0x68] sm:$0xff]  ;;  %10344 = vst [vmem:[#allocation24_spill] sm:$0xff] %v7335_v2  ;;  %v7346_v3 = vld [vmem:[#allocation2 + $0x79] sm:$0xff] }
  0x5f   : > { %6299 = vmatmul.msk.f32.gmra.mxu3 %vm311_vm1, %v452_v43  ;;  %370 = vst.msk [vmem:[#allocation2 + $0xa9] sm:$0xff] %vm311_vm1, %v7335_v2  ;;  %v7348_v6 = vld [vmem:[#allocation2 + $0x78] sm:$0xff]  ;;  %v7503_v45 = vld [vmem:[#allocation2 + $0x12a] sm:$0xff] }
  0x60   : > { %v7350_v8 = vld [vmem:[#allocation2 + $0x7a] sm:$0xff]  ;;  %10345 = vst [vmem:[#allocation25_spill] sm:$0xff] %v7353_v9  ;;  %v7368_v13 = vld [vmem:[#allocation2 + $0x82] sm:$0xff] }
  0x61   : > { %6342 = vmatmul.msk.f32.gmra.mxu2 %vm311_vm1, %v7260_v44  ;;  %371 = vst.msk [vmem:[#allocation2 + $0xb1] sm:$0xff] %vm311_vm1, %v7353_v9  ;;  %v7364_v10 = vld [vmem:[#allocation2 + $0x81] sm:$0xff]  ;;  %v7479_v9 = vld [vmem:[%s7048_s12 + $0x98] sm:$0xff] }
  0x62   : > { %v7366_v11 = vld [vmem:[#allocation2 + $0x80] sm:$0xff]  ;;  %10346 = vst [vmem:[#allocation26_spill] sm:$0xff] %v7371_v14  ;;  %v7382_v28 = vld [vmem:[#allocation2 + $0x91] sm:$0xff] }
  0x63   : > { %372 = vst.msk [vmem:[#allocation2 + $0xc1] sm:$0xff] %vm311_vm1, %v7371_v14  ;;  %v7384_v32 = vld [vmem:[#allocation2 + $0x90] sm:$0xff] }
  0x64   : > { %v7386_v43 = vld [vmem:[#allocation2 + $0x92] sm:$0xff]  ;;  %10348 = vst [vmem:[#allocation28_spill] sm:$0xff] %v7411_v1 }
  0x65   : > { %6276 = vmatmul.msk.f32.gmra.mxu0 %vm311_vm1, %v7274_v46  ;;  %374 = vst.msk [vmem:[#allocation2 + $0xd9] sm:$0xff] %vm311_vm1, %v7411_v1 }
  0x66   : > { %6309 = vmatmul.msk.f32.gmra.mxu1 %vm311_vm1, %v7276_v47  ;;  %v7428_v33 = vld [vmem:[#allocation2 + $0xa8] sm:$0xff]  ;;  %10350 = vst [vmem:[#allocation30_spill] sm:$0xff] %v7455_v5 }
  0x67   : > { %6300 = vmatmul.msk.f32.gmra.mxu3 %vm311_vm1, %v453_v48  ;;  %v7389_v48 = vld [vmem:[%s7048_s12 + $0x78] sm:$0xff]  ;;  %376 = vst.msk [vmem:[#allocation2 + $0xf1] sm:$0xff] %vm311_vm1, %v7455_v5 }
  0x68   : > { %10347 = vst [vmem:[#allocation27_spill] sm:$0xff] %v7389_v48  ;;  %v7434_v20 = vld [vmem:[#allocation2 + $0xaa] sm:$0xff]  ;;  %v7452_v16 = vld [vmem:[#allocation2 + $0xb2] sm:$0xff] }
  0x69   : > { %6343 = vmatmul.msk.f32.gmra.mxu2 %vm311_vm1, %v7278_v49  ;;  %373 = vst.msk [vmem:[#allocation2 + $0xc9] sm:$0xff] %vm311_vm1, %v7389_v48  ;;  %v7450_v24 = vld [vmem:[#allocation2 + $0xb0] sm:$0xff]  ;;  %v7474_v48 = vld [vmem:[#allocation2 + $0x122] sm:$0xff] }
  0x6a   : > { %v7472_v1 = vld [vmem:[#allocation2 + $0xc0] sm:$0xff]  ;;  %10353 = vst [vmem:[#allocation33_spill] sm:$0xff] %v7474_v48 }
  0x6b   : > { %10354 = vst [vmem:[#allocation34_spill] sm:$0xff] %v7479_v9 }
  0x6c   : > { %377 = vst.msk [vmem:[#allocation2 + $0xf9] sm:$0xff] %vm311_vm1, %v7479_v9  ;;  %v7526_v21 = vld [vmem:[#allocation2 + $0xd9] sm:$0xff] }
  0x6d   : > { %6277 = vmatmul.msk.f32.gmra.mxu0 %vm311_vm1, %v7292_v51  ;;  %10358 = vst [vmem:[#allocation38_spill] sm:$0xff] %v7503_v45  ;;  %v7530_v17 = vld [vmem:[#allocation2 + $0xd8] sm:$0xff] }
  0x6e   : > { %6310 = vmatmul.msk.f32.gmra.mxu1 %vm311_vm1, %v7294_v52  ;;  %10360 = vst [vmem:[#allocation40_spill] sm:$0xff] %v7508_v40 }
  0x6f   : > { %6301 = vmatmul.msk.f32.gmra.mxu3 %vm311_vm1, %v454_v53  ;;  %v6369_v53 = vld [vmem:[%s10238_s1 + $0xc] sm:$0xf]  ;;  %378 = vst.msk [vmem:[#allocation2 + $0x109] sm:$0xff] %vm311_vm1, %v7508_v40 }
  0x70   : > { %v7476_v14 = vld [vmem:[#allocation2 + $0xc2] sm:$0xff]  ;;  %v7505_v9 = vld [vmem:[#allocation2 + $0xca] sm:$0xff]  ;;  %10363 = vst [vmem:[#allocation43_spill] sm:$0xff] %v7526_v21 }
  0x71   : > { %6344 = vmatmul.msk.f32.gmra.mxu2 %vm311_vm1, %v7296_v54  ;;  %v7499_v55 = vld [vmem:[#allocation2 + $0xc9] sm:$0xff]  ;;  %10359 = vst [vmem:[#allocation39_spill] sm:$0xff] %v7505_v9 }
  0x72   : > { %v7501_v50 = vld [vmem:[#allocation2 + $0xc8] sm:$0xff]  ;;  %10365 = vst [vmem:[#allocation45_spill] sm:$0xff] %v7532_v15 }
  0x75   : > { %6278 = vmatmul.msk.f32.gmra.mxu0 %vm311_vm1, %v7310_v56 }
  0x76   : > { %6311 = vmatmul.msk.f32.gmra.mxu1 %vm311_vm1, %v7312_v57 }
  0x77   : > { %6327 = vmatmul.msk.f32.vlgmr.msrb.gmra.mxu3 %vm311_vm1, %v414_v58  ;;  %v7404_v58 = vld [vmem:[#allocation2 + $0x99] sm:$0xff] }
  0x78   : > { %6370 = vmatpush.msk.msrb.mxu3 %vm553_vm0, %v6369_v53  ;;  %v7426_v53 = vld [vmem:[#allocation2 + $0xa9] sm:$0xff] }
  0x79   : > { %6345 = vmatmul.msk.f32.gmra.mxu2 %vm311_vm1, %v7314_v59 }
  0x7d   : > { %6279 = vmatmul.msk.f32.gmra.mxu0 %vm311_vm1, %v7328_v61 }
  0x7e   : > { %6312 = vmatmul.msk.f32.gmra.mxu1 %vm311_vm1, %v7330_v62 }
  0x7f   : > { %6328 = vmatmul.msk.f32.gmra.mxu3 %vm311_vm1, %v415_v63  ;;  %v7406_v63 = vld [vmem:[#allocation2 + $0x98] sm:$0xff] }
  0x81   : > { %6346 = vmatmul.msk.f32.gmra.mxu2 %vm311_vm1, %v7332_v0 }
  0x85   : > { %6280 = vmatmul.msk.f32.gmra.mxu0 %vm311_vm1, %v7346_v3 }
  0x86   : > { %6313 = vmatmul.msk.f32.gmra.mxu1 %vm311_vm1, %v7348_v6 }
  0x87   : > { %6329 = vmatmul.msk.f32.gmra.mxu3 %vm311_vm1, %v416_v7  ;;  %v419_v7 = vld [vmem:[#allocation2 + $0x158] sm:$0xff] }
  0x89   : > { %6347 = vmatmul.msk.f32.gmra.mxu2 %vm311_vm1, %v7350_v8 }
  0x8d   : > { %6281 = vmatmul.msk.f32.gmra.mxu0 %vm311_vm1, %v7364_v10 }
  0x8e   : > { %6314 = vmatmul.msk.f32.gmra.mxu1 %vm311_vm1, %v7366_v11 }
  0x8f   : > { %6330 = vmatmul.msk.f32.gmra.mxu3 %vm311_vm1, %v417_v12  ;;  %v7408_v12 = vld [vmem:[#allocation2 + $0x9a] sm:$0xff] }
  0x91   : > { %6348 = vmatmul.msk.f32.gmra.mxu2 %vm311_vm1, %v7368_v13 }
  0x95   : > { %6282 = vmatmul.msk.f32.gmra.mxu0 %vm311_vm1, %v7382_v28 }
  0x96   : > { %6315 = vmatmul.msk.f32.gmra.mxu1 %vm311_vm1, %v7384_v32 }
  0x97   : > { %6331 = vmatmul.msk.f32.gmra.mxu3 %vm311_vm1, %v418_v38  ;;  %v6471_v38 = vld [vmem:[%s10238_s1 + $0x18] sm:$0xf] }
  0x98   : > { %6472 = vmatpush.msk.msrb.mxu2 %vm553_vm0, %v6471_v38  ;;  %v7448_v38 = vld [vmem:[#allocation2 + $0xb1] sm:$0xff] }
  0x99   : > { %6349 = vmatmul.msk.f32.gmra.mxu2 %vm311_vm1, %v7386_v43  ;;  %v7491_v5 = vpop.f32.mrf.mxu2 }
  0x9a   : > { %10355 = vst [vmem:[#allocation35_spill] sm:$0xff] %v7491_v5 }
  0x9b   : > { %v7466_v4 = vpop.f32.mrf.mxu1 }
  0x9c   : > { %10352 = vst [vmem:[#allocation32_spill] sm:$0xff] %v7466_v4  ;;  %v7587_v4 = vld [vmem:[#allocation2 + $0xf2] sm:$0xff] }
  0x9d   : > { %6283 = vmatmul.msk.f32.gmra.mxu0 %vm311_vm1, %v7404_v58  ;;  %10381 = vst [vmem:[#allocation61_spill] sm:$0xff] %v7587_v4 }
  0x9e   : > { %6316 = vmatmul.msk.f32.gmra.mxu1 %vm311_vm1, %v7406_v63 }
  0x9f   : > { %6332 = vmatmul.msk.f32.gmra.mxu3 %vm311_vm1, %v419_v7  ;;  %v7437_v7 = vld [vmem:[%s7048_s12 + $0x88] sm:$0xff] }
  0xa0   : > { %10349 = vst [vmem:[#allocation29_spill] sm:$0xff] %v7437_v7 }
  0xa1   : > { %6350 = vmatmul.msk.f32.gmra.mxu2 %vm311_vm1, %v7408_v12  ;;  %375 = vst.msk [vmem:[#allocation2 + $0xe1] sm:$0xff] %vm311_vm1, %v7437_v7  ;;  %v7470_v7 = vld [vmem:[#allocation2 + $0xc1] sm:$0xff] }
  0xa3   : > { %v7497_v60 = vpop.f32.mrf.mxu1 }
  0xa4   : > { %10357 = vst [vmem:[#allocation37_spill] sm:$0xff] %v7497_v60 }
  0xa5   : > { %6284 = vmatmul.msk.f32.gmra.mxu0 %vm311_vm1, %v7426_v53 }
  0xa6   : > { %6317 = vmatmul.msk.f32.gmra.mxu1 %vm311_vm1, %v7428_v33 }
  0xa7   : > { %6333 = vmatmul.msk.f32.gmra.mxu3 %vm311_vm1, %v420_v22  ;;  %v7463_v22 = vpop.f32.mrf.mxu0 }
  0xa8   : > { %10351 = vst [vmem:[#allocation31_spill] sm:$0xff] %v7463_v22  ;;  %v7534_v40 = vld [vmem:[#allocation2 + $0xda] sm:$0xff]  ;;  %v7633_v22 = vld [vmem:[#allocation2 + $0x108] sm:$0xff] }
  0xa9   : > { %6351 = vmatmul.msk.f32.gmra.mxu2 %vm311_vm1, %v7434_v20  ;;  %10366 = vst [vmem:[#allocation46_spill] sm:$0xff] %v7534_v40  ;;  %v7557_v60 = vld [vmem:[#allocation2 + $0xe0] sm:$0xff] }
  0xaa   : > { %10371 = vst [vmem:[#allocation51_spill] sm:$0xff] %v7557_v60 }
  0xab   : > { %10392 = vst [vmem:[#allocation72_spill] sm:$0xff] %v7633_v22 }
  0xad   : > { %6285 = vmatmul.msk.f32.gmra.mxu0 %vm311_vm1, %v7448_v38 }
  0xae   : > { %6318 = vmatmul.msk.f32.gmra.mxu1 %vm311_vm1, %v7450_v24 }
  0xaf   : > { %6334 = vmatmul.msk.f32.gmra.mxu3 %vm311_vm1, %v421_v18  ;;  %v7483_v18 = vpop.f32.mrf.mxu3  ;;  %v7495_v2 = vpop.f32.mrf.mxu0 }
  0xb0   : > { %10356 = vst [vmem:[#allocation36_spill] sm:$0xff] %v7495_v2  ;;  %v7559_v2 = vld [vmem:[#allocation2 + $0x142] sm:$0xff] }
  0xb1   : > { %6352 = vmatmul.msk.f32.gmra.mxu2 %vm311_vm1, %v7452_v16  ;;  %10372 = vst [vmem:[#allocation52_spill] sm:$0xff] %v7559_v2 }
  0xb3   : > { %v7522_v27 = vpop.f32.mrf.mxu2 }
  0xb4   : > { %10361 = vst [vmem:[#allocation41_spill] sm:$0xff] %v7522_v27 }
  0xb5   : > { %6286 = vmatmul.msk.f32.gmra.mxu0 %vm311_vm1, %v7470_v7 }
  0xb6   : > { %6319 = vmatmul.msk.f32.gmra.mxu1 %vm311_vm1, %v7472_v1 }
  0xb7   : > { %6361 = vmatmul.msk.f32.vlgmr.msra.gmra.mxu3 %vm311_vm1, %v7474_v48  ;;  %v7518_v35 = vpop.f32.mrf.mxu3 }
  0xb9   : > { %6353 = vmatmul.msk.f32.gmra.mxu2 %vm311_vm1, %v7476_v14 }
  0xbd   : > { %6287 = vmatmul.msk.f32.gmra.mxu0 %vm311_vm1, %v7499_v55 }
  0xbe   : > { %6320 = vmatmul.msk.f32.gmra.mxu1 %vm311_vm1, %v7501_v50 }
  0xbf   : > { %6362 = vmatmul.msk.f32.gmra.mxu3 %vm311_vm1, %v7503_v45  ;;  %v7537_v45 = vld [vmem:[%s7048_s12 + $0xa8] sm:$0xff] }
  0xc0   : > { %10367 = vst [vmem:[#allocation47_spill] sm:$0xff] %v7537_v45 }
  0xc1   : > { %6354 = vmatmul.msk.f32.gmra.mxu2 %vm311_vm1, %v7505_v9  ;;  %379 = vst.msk [vmem:[#allocation2 + $0x111] sm:$0xff] %vm311_vm1, %v7537_v45  ;;  %v7563_v45 = vld [vmem:[#allocation2 + $0xe2] sm:$0xff] }
  0xc2   : > { %v7524_v23 = vpop.f32.mrf.mxu0  ;;  %10374 = vst [vmem:[#allocation54_spill] sm:$0xff] %v7563_v45 }
  0xc3   : > { %10362 = vst [vmem:[#allocation42_spill] sm:$0xff] %v7524_v23  ;;  %v7528_v19 = vpop.f32.mrf.mxu1  ;;  %v7553_v23 = vld [vmem:[#allocation2 + $0xe1] sm:$0xff] }
  0xc4   : > { %10364 = vst [vmem:[#allocation44_spill] sm:$0xff] %v7528_v19 }
  0xc5   : > { %6288 = vmatmul.msk.f32.gmra.mxu0 %vm311_vm1, %v7526_v21  ;;  %10369 = vst [vmem:[#allocation49_spill] sm:$0xff] %v7553_v23 }
  0xc6   : > { %6321 = vmatmul.msk.f32.gmra.mxu1 %vm311_vm1, %v7530_v17 }
  0xc7   : > { %6363 = vmatmul.msk.f32.gmra.mxu3 %vm311_vm1, %v7532_v15 }
  0xc9   : > { %6355 = vmatmul.msk.f32.gmra.mxu2 %vm311_vm1, %v7534_v40  ;;  %v7581_v40 = vld [vmem:[#allocation2 + $0xf0] sm:$0xff] }
  0xca   : > { %v7549_v48 = vpop.f32.mrf.mxu3  ;;  %v7551_v19 = vpop.f32.mrf.mxu0  ;;  %10378 = vst [vmem:[#allocation58_spill] sm:$0xff] %v7581_v40 }
  0xcb   : > { %10368 = vst [vmem:[#allocation48_spill] sm:$0xff] %v7551_v19  ;;  %v7561_v5 = vpop.f32.mrf.mxu1 }
  0xcc   : > { %v7555_v27 = vpop.f32.mrf.mxu2  ;;  %10373 = vst [vmem:[#allocation53_spill] sm:$0xff] %v7561_v5 }
  0xcd   : > { %10370 = vst [vmem:[#allocation50_spill] sm:$0xff] %v7555_v27  ;;  %6289 = vmatmul.msk.f32.gmra.mxu0 %vm311_vm1, %v7553_v23  ;;  %v7577_v27 = vld [vmem:[#allocation2 + $0xf1] sm:$0xff] }
  0xce   : > { %6322 = vmatmul.msk.f32.gmra.mxu1 %vm311_vm1, %v7557_v60  ;;  %10376 = vst [vmem:[#allocation56_spill] sm:$0xff] %v7577_v27  ;;  %v7583_v23 = vld [vmem:[#allocation2 + $0x152] sm:$0xff] }
  0xcf   : > { %6364 = vmatmul.msk.f32.gmra.mxu3 %vm311_vm1, %v7559_v2  ;;  %10379 = vst [vmem:[#allocation59_spill] sm:$0xff] %v7583_v23  ;;  %v7661_v60 = vld [vmem:[#allocation2 + $0x110] sm:$0xff] }
  0xd1   : > { %6356 = vmatmul.msk.f32.gmra.mxu2 %vm311_vm1, %v7563_v45  ;;  %v7605_v45 = vld [vmem:[#allocation2 + $0xf8] sm:$0xff] }
  0xd2   : > { %v7573_v15 = vpop.f32.mrf.mxu3  ;;  %v7575_v19 = vpop.f32.mrf.mxu0  ;;  %10385 = vst [vmem:[#allocation65_spill] sm:$0xff] %v7605_v45 }
  0xd3   : > { %10375 = vst [vmem:[#allocation55_spill] sm:$0xff] %v7575_v19  ;;  %v7585_v21 = vpop.f32.mrf.mxu1 }
  0xd4   : > { %v7579_v5 = vpop.f32.mrf.mxu2  ;;  %10380 = vst [vmem:[#allocation60_spill] sm:$0xff] %v7585_v21 }
  0xd5   : > { %10377 = vst [vmem:[#allocation57_spill] sm:$0xff] %v7579_v5  ;;  %6290 = vmatmul.msk.f32.gmra.mxu0 %vm311_vm1, %v7577_v27  ;;  %v7601_v5 = vld [vmem:[#allocation2 + $0xf9] sm:$0xff] }
  0xd6   : > { %6323 = vmatmul.msk.f32.gmra.mxu1 %vm311_vm1, %v7581_v40  ;;  %10383 = vst [vmem:[#allocation63_spill] sm:$0xff] %v7601_v5  ;;  %v6505_v27 = vld [vmem:[%s10238_s1 + $0x1c] sm:$0xf] }
  0xd7   : > { %6365 = vmatmul.msk.f32.gmra.mxu3 %vm311_vm1, %v7583_v23  ;;  %v7610_v40 = vld [vmem:[#allocation2 + $0x15a] sm:$0xff] }
  0xd8   : > { %10386 = vst [vmem:[#allocation66_spill] sm:$0xff] %v7610_v40  ;;  %6506 = vmatpush.msk.msra.mxu3 %vm553_vm0, %v6505_v27 }
  0xd9   : > { %6357 = vmatmul.msk.f32.gmra.mxu2 %vm311_vm1, %v7587_v4  ;;  %v7615_v4 = vld [vmem:[#allocation2 + $0xfa] sm:$0xff] }
  0xda   : > { %v7597_v2 = vpop.f32.mrf.mxu3  ;;  %v7599_v19 = vpop.f32.mrf.mxu0  ;;  %10388 = vst [vmem:[#allocation68_spill] sm:$0xff] %v7615_v4 }
  0xdb   : > { %10382 = vst [vmem:[#allocation62_spill] sm:$0xff] %v7599_v19  ;;  %v7612_v23 = vpop.f32.mrf.mxu1 }
  0xdc   : > { %v7603_v21 = vpop.f32.mrf.mxu2  ;;  %10387 = vst [vmem:[#allocation67_spill] sm:$0xff] %v7612_v23  ;;  %v7629_v23 = vld [vmem:[#allocation2 + $0x109] sm:$0xff] }
  0xdd   : > { %10384 = vst [vmem:[#allocation64_spill] sm:$0xff] %v7603_v21  ;;  %6291 = vmatmul.msk.f32.gmra.mxu0 %vm311_vm1, %v7601_v5  ;;  %v6539_v5 = vld [vmem:[%s10238_s1 + $0x20] sm:$0xf] }
  0xde   : > { %6324 = vmatmul.msk.f32.gmra.mxu1 %vm311_vm1, %v7605_v45  ;;  %10390 = vst [vmem:[#allocation70_spill] sm:$0xff] %v7629_v23  ;;  %v7638_v45 = vld [vmem:[#allocation2 + $0x16a] sm:$0xff]  ;;  %6540 = vmatpush.msk.msra.mxu0 %vm553_vm0, %v6539_v5 }
  0xdf   : > { %6366 = vmatmul.msk.f32.gmra.mxu3 %vm311_vm1, %v7610_v40  ;;  %10393 = vst [vmem:[#allocation73_spill] sm:$0xff] %v7638_v45 }
  0xe1   : > { %6358 = vmatmul.msk.f32.gmra.mxu2 %vm311_vm1, %v7615_v4  ;;  %v7643_v4 = vld [vmem:[#allocation2 + $0x10a] sm:$0xff] }
  0xe2   : > { %v7625_v19 = vpop.f32.mrf.mxu3  ;;  %v7627_v21 = vpop.f32.mrf.mxu0 }
  0xe3   : > { %10389 = vst [vmem:[#allocation69_spill] sm:$0xff] %v7627_v21  ;;  %v7640_v40 = vpop.f32.mrf.mxu1 }
  0xe4   : > { %v7631_v27 = vpop.f32.mrf.mxu2  ;;  %10394 = vst [vmem:[#allocation74_spill] sm:$0xff] %v7640_v40  ;;  %v7657_v40 = vld [vmem:[#allocation2 + $0x111] sm:$0xff] }
  0xe5   : > { %10391 = vst [vmem:[#allocation71_spill] sm:$0xff] %v7631_v27  ;;  %6292 = vmatmul.msk.f32.gmra.mxu0 %vm311_vm1, %v7629_v23  ;;  %v7663_v23 = vld [vmem:[#allocation2 + $0x172] sm:$0xff] }
  0xe6   : > { %6325 = vmatmul.msk.f32.gmra.mxu1 %vm311_vm1, %v7633_v22  ;;  %10397 = vst [vmem:[#allocation77_spill] sm:$0xff] %v7663_v23  ;;  %v7667_v22 = vld [vmem:[#allocation2 + $0x112] sm:$0xff] }
  0xe7   : > { %6367 = vmatmul.msk.f32.gmra.mxu3 %vm311_vm1, %v7638_v45  ;;  %10399 = vst [vmem:[#allocation79_spill] sm:$0xff] %v7667_v22 }
  0xe9   : > { %6359 = vmatmul.msk.f32.gmra.mxu2 %vm311_vm1, %v7643_v4 }
  0xea   : > { %v7653_v21 = vpop.f32.mrf.mxu3  ;;  %v7655_v27 = vpop.f32.mrf.mxu0 }
  0xeb   : > { %10395 = vst [vmem:[#allocation75_spill] sm:$0xff] %v7655_v27  ;;  %v7665_v9 = vpop.f32.mrf.mxu1 }
  0xec   : > { %v7659_v5 = vpop.f32.mrf.mxu2  ;;  %10398 = vst [vmem:[#allocation78_spill] sm:$0xff] %v7665_v9 }
  0xed   : > { %10396 = vst [vmem:[#allocation76_spill] sm:$0xff] %v7659_v5  ;;  %6293 = vmatmul.msk.f32.gmra.mxu0 %vm311_vm1, %v7657_v40 }
  0xee   : > { %6326 = vmatmul.msk.f32.gmra.mxu1 %vm311_vm1, %v7661_v60 }
  0xef   : > { %6368 = vmatmul.msk.f32.gmra.mxu3 %vm311_vm1, %v7663_v23 }
  0xf1   : > { %6360 = vmatmul.msk.f32.gmra.mxu2 %vm311_vm1, %v7667_v22 }
  0xf2   : > { %v7677_v45 = vpop.f32.mrf.mxu3  ;;  %v7679_v27 = vpop.f32.mrf.mxu0 }
  0xf3   : > { %10400 = vst [vmem:[#allocation80_spill] sm:$0xff] %v7679_v27  ;;  %v7683_v9 = vpop.f32.mrf.mxu1 }
  0xf4   : > { %v7681_v5 = vpop.f32.mrf.mxu2 }
  0xf5   : > { %10401 = vst [vmem:[#allocation81_spill] sm:$0xff] %v7681_v5  ;;  %6405 = vmatmul.msk.f32.vlgmr.msrb.gmra.mxu0 %vm311_vm1, %v7191_v25 }
  0xf6   : > { %6439 = vmatmul.msk.f32.vlgmr.msrb.gmra.mxu1 %vm311_vm1, %v7207_v29 }
  0xf7   : > { %6371 = vmatmul.msk.f32.vlgmr.msrb.gmra.mxu3 %vm311_vm1, %v7193_v26 }
  0xf9   : > { %6473 = vmatmul.msk.f32.vlgmr.msrb.gmra.mxu2 %vm311_vm1, %v7240_v37 }
  0xfa   : > { %v7693_v23 = vpop.f32.mrf.mxu3  ;;  %v7695_v22 = vpop.f32.mrf.mxu0 }
  0xfb   : > { %10402 = vst [vmem:[#allocation82_spill] sm:$0xff] %v7695_v22  ;;  %v7699_v5 = vpop.f32.mrf.mxu1 }
  0xfc   : > { %v7697_v27 = vpop.f32.mrf.mxu2  ;;  %10403 = vst [vmem:[#allocation83_spill] sm:$0xff] %v7699_v5 }
  0xfd   : > { %6406 = vmatmul.msk.f32.gmra.mxu0 %vm311_vm1, %v7215_v30 }
  0xfe   : > { %6440 = vmatmul.msk.f32.gmra.mxu1 %vm311_vm1, %v7222_v34 }
  0xff   : > { %6372 = vmatmul.msk.f32.gmra.mxu3 %vm311_vm1, %v7217_v31 }
 0x101   : > { %6474 = vmatmul.msk.f32.gmra.mxu2 %vm311_vm1, %v7258_v42 }
 0x102   : > { %v861_v25 = vpop.f32.mrf.mxu3  ;;  %v7709_v26 = vpop.f32.mrf.mxu0 }
 0x103   : > { %v7712_v29 = vadd.f32 %v861_v25, %v7518_v35  ;;  %v7716_v5 = vpop.f32.mrf.mxu1 }
 0x104   : > { %v7714_v22 = vpop.f32.mrf.mxu2 }
 0x105   : > { %6407 = vmatmul.msk.f32.gmra.mxu0 %vm311_vm1, %v7238_v36 }
 0x106   : > { %6441 = vmatmul.msk.f32.gmra.mxu1 %vm311_vm1, %v7242_v39 }
 0x107   : > { %6373 = vmatmul.msk.f32.gmra.mxu3 %vm311_vm1, %v7240_v37 }
 0x109   : > { %6475 = vmatmul.msk.f32.gmra.mxu2 %vm311_vm1, %v7276_v47 }
 0x10a   : > { %v864_v30 = vpop.f32.mrf.mxu3  ;;  %v7726_v31 = vpop.f32.mrf.mxu0 }
 0x10b   : > { %v7729_v34 = vadd.f32 %v864_v30, %v7549_v48  ;;  %v7733_v25 = vpop.f32.mrf.mxu1 }
 0x10c   : > { %v7731_v35 = vpop.f32.mrf.mxu2 }
 0x10d   : > { %6408 = vmatmul.msk.f32.gmra.mxu0 %vm311_vm1, %v7256_v41 }
 0x10e   : > { %6442 = vmatmul.msk.f32.gmra.mxu1 %vm311_vm1, %v7260_v44 }
 0x10f   : > { %6374 = vmatmul.msk.f32.gmra.mxu3 %vm311_vm1, %v7258_v42 }
 0x111   : > { %6476 = vmatmul.msk.f32.gmra.mxu2 %vm311_vm1, %v7294_v52 }
 0x112   : > { %v867_v36 = vpop.f32.mrf.mxu3  ;;  %v7743_v37 = vpop.f32.mrf.mxu0 }
 0x113   : > { %v7746_v39 = vadd.f32 %v867_v36, %v7573_v15  ;;  %v7750_v30 = vpop.f32.mrf.mxu1 }
 0x114   : > { %v7748_v48 = vpop.f32.mrf.mxu2 }
 0x115   : > { %6409 = vmatmul.msk.f32.gmra.mxu0 %vm311_vm1, %v7274_v46 }
 0x116   : > { %6443 = vmatmul.msk.f32.gmra.mxu1 %vm311_vm1, %v7278_v49 }
 0x117   : > { %6375 = vmatmul.msk.f32.gmra.mxu3 %vm311_vm1, %v7276_v47 }
 0x119   : > { %6477 = vmatmul.msk.f32.gmra.mxu2 %vm311_vm1, %v7312_v57 }
 0x11a   : > { %v870_v41 = vpop.f32.mrf.mxu3  ;;  %v7760_v42 = vpop.f32.mrf.mxu0 }
 0x11b   : > { %v7763_v15 = vadd.f32 %v870_v41, %v7597_v2  ;;  %v7767_v36 = vpop.f32.mrf.mxu1 }
 0x11c   : > { %v7765_v44 = vpop.f32.mrf.mxu2 }
 0x11d   : > { %6410 = vmatmul.msk.f32.gmra.mxu0 %vm311_vm1, %v7292_v51 }
 0x11e   : > { %6444 = vmatmul.msk.f32.gmra.mxu1 %vm311_vm1, %v7296_v54 }
 0x11f   : > { %6376 = vmatmul.msk.f32.gmra.mxu3 %vm311_vm1, %v7294_v52 }
 0x121   : > { %6478 = vmatmul.msk.f32.gmra.mxu2 %vm311_vm1, %v7330_v62 }
 0x122   : > { %v873_v46 = vpop.f32.mrf.mxu3  ;;  %v7777_v47 = vpop.f32.mrf.mxu0 }
 0x123   : > { %v7780_v49 = vadd.f32 %v873_v46, %v7625_v19  ;;  %v7784_v41 = vpop.f32.mrf.mxu1 }
 0x124   : > { %v7782_v2 = vpop.f32.mrf.mxu2 }
 0x125   : > { %6411 = vmatmul.msk.f32.gmra.mxu0 %vm311_vm1, %v7310_v56 }
 0x126   : > { %6445 = vmatmul.msk.f32.gmra.mxu1 %vm311_vm1, %v7314_v59 }
 0x127   : > { %6377 = vmatmul.msk.f32.gmra.mxu3 %vm311_vm1, %v7312_v57 }
 0x129   : > { %6479 = vmatmul.msk.f32.gmra.mxu2 %vm311_vm1, %v7348_v6 }
 0x12a   : > { %v876_v51 = vpop.f32.mrf.mxu3  ;;  %v7794_v52 = vpop.f32.mrf.mxu0 }
 0x12b   : > { %v7797_v19 = vadd.f32 %v876_v51, %v7653_v21  ;;  %v7801_v46 = vpop.f32.mrf.mxu1 }
 0x12c   : > { %v7799_v54 = vpop.f32.mrf.mxu2 }
 0x12d   : > { %6412 = vmatmul.msk.f32.gmra.mxu0 %vm311_vm1, %v7328_v61 }
 0x12e   : > { %6446 = vmatmul.msk.f32.gmra.mxu1 %vm311_vm1, %v7332_v0 }
 0x12f   : > { %6378 = vmatmul.msk.f32.gmra.mxu3 %vm311_vm1, %v7330_v62 }
 0x131   : > { %6480 = vmatmul.msk.f32.gmra.mxu2 %vm311_vm1, %v7366_v11 }
 0x132   : > { %v879_v56 = vpop.f32.mrf.mxu3  ;;  %v7811_v57 = vpop.f32.mrf.mxu0 }
 0x133   : > { %v7814_v21 = vadd.f32 %v879_v56, %v7677_v45  ;;  %v7818_v51 = vpop.f32.mrf.mxu1  ;;  %v859_v45 = vadd.f32 %v7693_v23, %v7483_v18 }
 0x134   : > { %v7816_v59 = vpop.f32.mrf.mxu2 }
 0x135   : > { %6413 = vmatmul.msk.f32.gmra.mxu0 %vm311_vm1, %v7346_v3 }
 0x136   : > { %6447 = vmatmul.msk.f32.gmra.mxu1 %vm311_vm1, %v7350_v8 }
 0x137   : > { %6379 = vmatmul.msk.f32.gmra.mxu3 %vm311_vm1, %v7348_v6 }
 0x139   : > { %6481 = vmatmul.msk.f32.gmra.mxu2 %vm311_vm1, %v7384_v32 }
 0x13a   : > { %v1104_v61 = vpop.f32.mrf.mxu3  ;;  %v7830_v62 = vpop.f32.mrf.mxu0 }
 0x13b   : > { %v7832_v0 = vadd.f32 %v1104_v61, %v859_v45  ;;  %v7836_v3 = vpop.f32.mrf.mxu1 }
 0x13c   : > { %v7834_v56 = vpop.f32.mrf.mxu2 }
 0x13d   : > { %10404 = vst [vmem:[#allocation84_spill] sm:$0xff] %v7832_v0  ;;  %6414 = vmatmul.msk.f32.gmra.mxu0 %vm311_vm1, %v7364_v10 }
 0x13e   : > { %6448 = vmatmul.msk.f32.gmra.mxu1 %vm311_vm1, %v7368_v13 }
 0x13f   : > { %6380 = vmatmul.msk.f32.gmra.mxu3 %vm311_vm1, %v7366_v11 }
 0x141   : > { %6482 = vmatmul.msk.f32.gmra.mxu2 %vm311_vm1, %v7406_v63 }
 0x142   : > { %v1107_v23 = vpop.f32.mrf.mxu3  ;;  %v7846_v6 = vpop.f32.mrf.mxu0 }
 0x143   : > { %v7849_v8 = vadd.f32 %v1107_v23, %v7712_v29  ;;  %v7853_v45 = vpop.f32.mrf.mxu1 }
 0x144   : > { %v7851_v18 = vpop.f32.mrf.mxu2 }
 0x145   : > { %10405 = vst [vmem:[#allocation85_spill] sm:$0xff] %v7849_v8  ;;  %6415 = vmatmul.msk.f32.gmra.mxu0 %vm311_vm1, %v7382_v28 }
 0x146   : > { %6449 = vmatmul.msk.f32.gmra.mxu1 %vm311_vm1, %v7386_v43 }
 0x147   : > { %6381 = vmatmul.msk.f32.gmra.mxu3 %vm311_vm1, %v7384_v32 }
 0x149   : > { %6483 = vmatmul.msk.f32.gmra.mxu2 %vm311_vm1, %v7428_v33 }
 0x14a   : > { %v1110_v10 = vpop.f32.mrf.mxu3  ;;  %v7863_v11 = vpop.f32.mrf.mxu0 }
 0x14b   : > { %v7866_v13 = vadd.f32 %v1110_v10, %v7729_v34  ;;  %v7870_v61 = vpop.f32.mrf.mxu1 }
 0x14c   : > { %v7868_v29 = vpop.f32.mrf.mxu2 }
 0x14d   : > { %10406 = vst [vmem:[#allocation86_spill] sm:$0xff] %v7866_v13  ;;  %6416 = vmatmul.msk.f32.gmra.mxu0 %vm311_vm1, %v7404_v58 }
 0x14e   : > { %6450 = vmatmul.msk.f32.gmra.mxu1 %vm311_vm1, %v7408_v12 }
 0x14f   : > { %6382 = vmatmul.msk.f32.gmra.mxu3 %vm311_vm1, %v7406_v63 }
 0x151   : > { %6484 = vmatmul.msk.f32.gmra.mxu2 %vm311_vm1, %v7450_v24 }
 0x152   : > { %v1113_v28 = vpop.f32.mrf.mxu3  ;;  %v7880_v32 = vpop.f32.mrf.mxu0 }
 0x153   : > { %v7883_v43 = vadd.f32 %v1113_v28, %v7746_v39  ;;  %v7887_v23 = vpop.f32.mrf.mxu1 }
 0x154   : > { %v7885_v34 = vpop.f32.mrf.mxu2 }
 0x155   : > { %10407 = vst [vmem:[#allocation87_spill] sm:$0xff] %v7883_v43  ;;  %6417 = vmatmul.msk.f32.gmra.mxu0 %vm311_vm1, %v7426_v53  ;;  %v10422_v43 = vld [vmem:[#allocation43_spill] sm:$0xff] }
 0x156   : > { %6451 = vmatmul.msk.f32.gmra.mxu1 %vm311_vm1, %v7434_v20  ;;  %v3008_v20 = vld [vmem:[%s10240_s3] sm:$0xff] }
 0x157   : > { %6383 = vmatmul.msk.f32.gmra.mxu3 %vm311_vm1, %v7428_v33  ;;  %3363 = vmatpush.msra.mxu2 %v3008_v20 }
 0x159   : > { %6485 = vmatmul.msk.f32.gmra.mxu2 %vm311_vm1, %v7472_v1 }
 0x15a   : > { %v1116_v58 = vpop.f32.mrf.mxu3  ;;  %v7897_v63 = vpop.f32.mrf.mxu0 }
 0x15b   : > { %v7900_v12 = vadd.f32 %v1116_v58, %v7763_v15  ;;  %v7904_v10 = vpop.f32.mrf.mxu1 }
 0x15c   : > { %v7902_v39 = vpop.f32.mrf.mxu2 }
 0x15d   : > { %10408 = vst [vmem:[#allocation88_spill] sm:$0xff] %v7900_v12  ;;  %6418 = vmatmul.msk.f32.gmra.mxu0 %vm311_vm1, %v7448_v38  ;;  %v10421_v12 = vld [vmem:[#allocation32_spill] sm:$0xff] }
 0x15e   : > { %6452 = vmatmul.msk.f32.gmra.mxu1 %vm311_vm1, %v7452_v16  ;;  %v6573_v16 = vld [vmem:[%s10240_s3 + $0x8] sm:$0xff] }
 0x15f   : > { %6384 = vmatmul.msk.f32.gmra.mxu3 %vm311_vm1, %v7450_v24  ;;  %3154 = vmatpush.msra.mxu1 %v6573_v16 }
 0x161   : > { %6486 = vmatmul.msk.f32.gmra.mxu2 %vm311_vm1, %v7501_v50 }
 0x162   : > { %v1119_v33 = vpop.f32.mrf.mxu3  ;;  %v7917_v53 = vpop.f32.mrf.mxu0 }
 0x163   : > { %10409 = vst [vmem:[#allocation89_spill] sm:$0xff] %v7917_v53  ;;  %v7920_v15 = vadd.f32 %v1119_v33, %v7780_v49  ;;  %v7927_v28 = vpop.f32.mrf.mxu1 }
 0x164   : > { %v7922_v38 = vpop.f32.mrf.mxu2  ;;  %10411 = vst [vmem:[#allocation91_spill] sm:$0xff] %v7927_v28  ;;  %v10434_v28 = vld [vmem:[#allocation44_spill] sm:$0xff] }
 0x165   : > { %10410 = vst [vmem:[#allocation90_spill] sm:$0xff] %v7920_v15  ;;  %6419 = vmatmul.msk.f32.gmra.mxu0 %vm311_vm1, %v7470_v7  ;;  %v10420_v15 = vld [vmem:[#allocation31_spill] sm:$0xff] }
 0x166   : > { %6453 = vmatmul.msk.f32.gmra.mxu1 %vm311_vm1, %v7476_v14  ;;  %v10416_v14 = vld [vmem:[#allocation39_spill] sm:$0xff] }
 0x167   : > { %6385 = vmatmul.msk.f32.gmra.mxu3 %vm311_vm1, %v7472_v1  ;;  %v10417_v1 = vld [vmem:[#allocation51_spill] sm:$0xff] }
 0x169   : > { %6487 = vmatmul.msk.f32.gmra.mxu2 %vm311_vm1, %v7530_v17 }
 0x16a   : > { %v1122_v24 = vpop.f32.mrf.mxu3  ;;  %v7937_v49 = vpop.f32.mrf.mxu0 }
 0x16b   : > { %10412 = vst [vmem:[#allocation92_spill] sm:$0xff] %v7937_v49  ;;  %v7940_v58 = vadd.f32 %v1122_v24, %v7797_v19  ;;  %v7944_v33 = vpop.f32.mrf.mxu1  ;;  %v10428_v49 = vld [vmem:[#allocation49_spill] sm:$0xff] }
 0x16c   : > { %v7942_v20 = vpop.f32.mrf.mxu2  ;;  %10415 = vst [vmem:[#allocation95_spill] sm:$0xff] %v7944_v33 }
 0x16d   : > { %10413 = vst [vmem:[#allocation93_spill] sm:$0xff] %v7940_v58  ;;  %6420 = vmatmul.msk.f32.gmra.mxu0 %vm311_vm1, %v7499_v55  ;;  %v787_v55 = vadd.f32 %v10421_v12, %v10420_v15  ;;  %v10426_v12 = vld [vmem:[#allocation36_spill] sm:$0xff]  ;;  %v10427_v15 = vld [vmem:[#allocation37_spill] sm:$0xff] }
 0x16e   : > { %10414 = vst [vmem:[#allocation94_spill] sm:$0xff] %v7942_v20  ;;  %6454 = vmatmul.msk.f32.gmra.mxu1 %vm311_vm1, %v10416_v14  ;;  %v10423_v14 = vld [vmem:[#allocation46_spill] sm:$0xff]  ;;  %v790_v33 = vadd.f32 %v10427_v15, %v10426_v12 }
 0x16f   : > { %6386 = vmatmul.msk.f32.gmra.mxu3 %vm311_vm1, %v7501_v50  ;;  %v10424_v50 = vld [vmem:[#allocation58_spill] sm:$0xff] }
 0x171   : > { %6488 = vmatmul.msk.f32.gmra.mxu2 %vm311_vm1, %v10417_v1 }
 0x172   : > { %v1125_v7 = vpop.f32.mrf.mxu3  ;;  %v1588_v16 = vpop.f32.mrf.mxu0 }
 0x173   : > { %v7955_v19 = vadd.f32 %v1125_v7, %v7814_v21  ;;  %v1866_v58 = vpop.f32.mrf.mxu1  ;;  %v10425_v21 = vld [vmem:[#allocation35_spill] sm:$0xff] }
 0x174   : > { %v7957_v24 = vpop.f32.mrf.mxu2  ;;  %v1128_v7 = vadd.f32 %v10425_v21, %v787_v55  ;;  %v10430_v55 = vld [vmem:[#allocation65_spill] sm:$0xff] }
 0x175   : > { %10418 = vst [vmem:[#allocation39_spill] sm:$0xff] %v7955_v19  ;;  %6421 = vmatmul.msk.f32.gmra.mxu0 %vm311_vm1, %v10422_v43 }
 0x176   : > { %10419 = vst [vmem:[#allocation51_spill] sm:$0xff] %v7957_v24  ;;  %6455 = vmatmul.msk.f32.gmra.mxu1 %vm311_vm1, %v10423_v14  ;;  %v10429_v14 = vld [vmem:[#allocation54_spill] sm:$0xff] }
 0x177   : > { %6387 = vmatmul.msk.f32.gmra.mxu3 %vm311_vm1, %v7530_v17 }
 0x179   : > { %6489 = vmatmul.msk.f32.gmra.mxu2 %vm311_vm1, %v10424_v50 }
 0x17a   : > { %v1310_v19 = vpop.f32.mrf.mxu3  ;;  %v1591_v13 = vpop.f32.mrf.mxu0 }
 0x17b   : > { %v1406_v8 = vadd.f32 %v1310_v19, %v1128_v7  ;;  %v1869_v24 = vpop.f32.mrf.mxu1  ;;  %v10431_v19 = vld [vmem:[#allocation41_spill] sm:$0xff] }
 0x17c   : > { %v2145_v0 = vpop.f32.mrf.mxu2  ;;  %v1129_v21 = vadd.f32 %v10431_v19, %v790_v33 }
 0x17d   : > { %v1684_v43 = vadd.f32 %v1588_v16, %v1406_v8  ;;  %6422 = vmatmul.msk.f32.gmra.mxu0 %vm311_vm1, %v10428_v49  ;;  %v10433_v49 = vld [vmem:[#allocation42_spill] sm:$0xff] }
 0x17e   : > { %6456 = vmatmul.msk.f32.gmra.mxu1 %vm311_vm1, %v10429_v14  ;;  %v793_v53 = vadd.f32 %v10434_v28, %v10433_v49  ;;  %v10439_v49 = vld [vmem:[#allocation48_spill] sm:$0xff] }
 0x17f   : > { %v1962_v17 = vadd.f32 %v1866_v58, %v1684_v43  ;;  %6388 = vmatmul.msk.f32.gmra.mxu3 %vm311_vm1, %v10417_v1  ;;  %v10435_v58 = vld [vmem:[#allocation56_spill] sm:$0xff]  ;;  %v10436_v1 = vld [vmem:[#allocation61_spill] sm:$0xff] }
 0x181   : > { %6490 = vmatmul.msk.f32.gmra.mxu2 %vm311_vm1, %v10430_v55  ;;  %v7981_v7 = vadd.f32 %v2145_v0, %v1962_v17  ;;  %v10437_v0 = vld [vmem:[#allocation72_spill] sm:$0xff] }
 0x182   : > { %v1313_v20 = vpop.f32.mrf.mxu3  ;;  %v1594_v12 = vpop.f32.mrf.mxu0 }
 0x183   : > { %10432 = vst [vmem:[#allocation31_spill] sm:$0xff] %v7981_v7  ;;  %v1407_v8 = vadd.f32 %v1313_v20, %v1129_v21  ;;  %v1872_v15 = vpop.f32.mrf.mxu1  ;;  %v10438_v20 = vld [vmem:[#allocation50_spill] sm:$0xff] }
 0x184   : > { %v2148_v16 = vpop.f32.mrf.mxu2  ;;  %v1130_v33 = vadd.f32 %v10438_v20, %v793_v53  ;;  %v10443_v53 = vld [vmem:[#allocation57_spill] sm:$0xff] }
 0x185   : > { %v1685_v14 = vadd.f32 %v1591_v13, %v1407_v8  ;;  %6423 = vmatmul.msk.f32.gmra.mxu0 %vm311_vm1, %v10435_v58  ;;  %v10440_v58 = vld [vmem:[#allocation53_spill] sm:$0xff] }
 0x186   : > { %6457 = vmatmul.msk.f32.gmra.mxu1 %vm311_vm1, %v10436_v1  ;;  %v796_v7 = vadd.f32 %v10440_v58, %v10439_v49  ;;  %v10446_v49 = vld [vmem:[#allocation60_spill] sm:$0xff] }
 0x187   : > { %v1963_v43 = vadd.f32 %v1869_v24, %v1685_v14  ;;  %6389 = vmatmul.msk.f32.gmra.mxu3 %vm311_vm1, %v10424_v50  ;;  %v10441_v24 = vld [vmem:[#allocation63_spill] sm:$0xff]  ;;  %v10442_v50 = vld [vmem:[#allocation68_spill] sm:$0xff] }
 0x189   : > { %6491 = vmatmul.msk.f32.gmra.mxu2 %vm311_vm1, %v10437_v0  ;;  %v7994_v17 = vadd.f32 %v2148_v16, %v1963_v43  ;;  %v1131_v16 = vadd.f32 %v10443_v53, %v796_v7  ;;  %v10448_v7 = vld [vmem:[#allocation64_spill] sm:$0xff] }
 0x18a   : > { %v1316_v19 = vpop.f32.mrf.mxu3  ;;  %v1597_v28 = vpop.f32.mrf.mxu0 }
 0x18b   : > { %v1408_v13 = vadd.f32 %v1316_v19, %v1130_v33  ;;  %v1875_v8 = vpop.f32.mrf.mxu1 }
 0x18c   : > { %v2151_v21 = vpop.f32.mrf.mxu2 }
 0x18d   : > { %v1686_v1 = vadd.f32 %v1594_v12, %v1408_v13  ;;  %6424 = vmatmul.msk.f32.gmra.mxu0 %vm311_vm1, %v10441_v24  ;;  %v10445_v13 = vld [vmem:[#allocation55_spill] sm:$0xff] }
 0x18e   : > { %6458 = vmatmul.msk.f32.gmra.mxu1 %vm311_vm1, %v10442_v50  ;;  %v799_v58 = vadd.f32 %v10446_v49, %v10445_v13  ;;  %v2015_v50 = vld [vmem:[#allocation2 + $0x120] sm:$0xff]  ;;  %v10450_v13 = vld [vmem:[#allocation67_spill] sm:$0xff] }
 0x18f   : > { %v1964_v14 = vadd.f32 %v1872_v15, %v1686_v1  ;;  %6390 = vmatmul.msk.f32.gmra.mxu3 %vm311_vm1, %v10430_v55  ;;  %v10447_v15 = vld [vmem:[#allocation70_spill] sm:$0xff] }
 0x191   : > { %6492 = vmatmul.msk.f32.gmra.mxu2 %vm311_vm1, %v7661_v60  ;;  %v8007_v43 = vadd.f32 %v2151_v21, %v1964_v14  ;;  %v1132_v21 = vadd.f32 %v10448_v7, %v799_v58  ;;  %v8033_v7 = vld [vmem:[#allocation2 + $0x121] sm:$0xff] }
 0x192   : > { %v1319_v20 = vpop.f32.mrf.mxu3  ;;  %v1600_v33 = vpop.f32.mrf.mxu0 }
 0x193   : > { %10444 = vst [vmem:[#allocation32_spill] sm:$0xff] %v8007_v43  ;;  %v1409_v12 = vadd.f32 %v1319_v20, %v1131_v16  ;;  %v1878_v55 = vpop.f32.mrf.mxu1  ;;  %v2016_v43 = vld [vmem:[#allocation2 + $0x128] sm:$0xff] }
 0x194   : > { %v2154_v19 = vpop.f32.mrf.mxu2 }
 0x195   : > { %v1687_v24 = vadd.f32 %v1597_v28, %v1409_v12  ;;  %6425 = vmatmul.msk.f32.gmra.mxu0 %vm311_vm1, %v10447_v15  ;;  %v10449_v12 = vld [vmem:[#allocation62_spill] sm:$0xff] }
 0x196   : > { %6459 = vmatmul.msk.f32.gmra.mxu1 %vm311_vm1, %v7643_v4  ;;  %v802_v49 = vadd.f32 %v10450_v13, %v10449_v12  ;;  %v10451_v4 = vld [vmem:[#allocation79_spill] sm:$0xff] }
 0x197   : > { %v1965_v1 = vadd.f32 %v1875_v8, %v1687_v24  ;;  %6391 = vmatmul.msk.f32.gmra.mxu3 %vm311_vm1, %v10437_v0  ;;  %v2017_v13 = vld [vmem:[#allocation2 + $0x138] sm:$0xff] }
 0x199   : > { %6493 = vmatmul.msk.f32.gmra.mxu2 %vm311_vm1, %v2015_v50  ;;  %v8019_v14 = vadd.f32 %v2154_v19, %v1965_v1  ;;  %v10452_v19 = vld [vmem:[#allocation71_spill] sm:$0xff] }
 0x19a   : > { %v1322_v53 = vpop.f32.mrf.mxu3  ;;  %v1603_v28 = vpop.f32.mrf.mxu0  ;;  %v1133_v58 = vadd.f32 %v10452_v19, %v802_v49 }
 0x19b   : > { %v1410_v16 = vadd.f32 %v1322_v53, %v1132_v21  ;;  %v1881_v8 = vpop.f32.mrf.mxu1  ;;  %v10454_v53 = vld [vmem:[#allocation69_spill] sm:$0xff] }
 0x19c   : > { %v2157_v20 = vpop.f32.mrf.mxu2 }
 0x19d   : > { %v1688_v15 = vadd.f32 %v1600_v33, %v1410_v16  ;;  %6426 = vmatmul.msk.f32.gmra.mxu0 %vm311_vm1, %v7657_v40  ;;  %v10455_v16 = vld [vmem:[#allocation74_spill] sm:$0xff] }
 0x19e   : > { %6460 = vmatmul.msk.f32.gmra.mxu1 %vm311_vm1, %v10451_v4  ;;  %v805_v12 = vadd.f32 %v10455_v16, %v10454_v53  ;;  %v10458_v53 = vld [vmem:[#allocation75_spill] sm:$0xff]  ;;  %v10459_v16 = vld [vmem:[#allocation78_spill] sm:$0xff] }
 0x19f   : > { %v1966_v0 = vadd.f32 %v1878_v55, %v1688_v15  ;;  %6392 = vmatmul.msk.f32.gmra.mxu3 %vm311_vm1, %v7661_v60  ;;  %v10456_v60 = vld [vmem:[#allocation33_spill] sm:$0xff] }
 0x1a1   : > { %6494 = vmatmul.msk.f32.gmra.mxu2 %vm311_vm1, %v2016_v43  ;;  %v8031_v24 = vadd.f32 %v2157_v20, %v1966_v0  ;;  %v10457_v20 = vld [vmem:[#allocation76_spill] sm:$0xff] }
 0x1a2   : > { %v1325_v1 = vpop.f32.mrf.mxu3  ;;  %v1606_v33 = vpop.f32.mrf.mxu0  ;;  %v1134_v15 = vadd.f32 %v10457_v20, %v805_v12  ;;  %v10461_v12 = vld [vmem:[#allocation81_spill] sm:$0xff] }
 0x1a3   : > { %10453 = vst [vmem:[#allocation43_spill] sm:$0xff] %v8031_v24  ;;  %v1411_v21 = vadd.f32 %v1325_v1, %v1133_v58  ;;  %v1884_v19 = vpop.f32.mrf.mxu1  ;;  %v808_v24 = vadd.f32 %v10459_v16, %v10458_v53  ;;  %v10462_v53 = vld [vmem:[#allocation80_spill] sm:$0xff] }
 0x1a4   : > { %v2160_v40 = vpop.f32.mrf.mxu2  ;;  %v811_v16 = vadd.f32 %v7683_v9, %v10462_v53  ;;  %v8073_v9 = vld [vmem:[%s7048_s12 + $0xf0] sm:$0xff] }
 0x1a5   : > { %v1689_v55 = vadd.f32 %v1603_v28, %v1411_v21  ;;  %6427 = vmatmul.msk.f32.gmra.mxu0 %vm311_vm1, %v8033_v7  ;;  %v8046_v28 = vld [vmem:[#allocation2 + $0x129] sm:$0xff]  ;;  %10464 = vst [vmem:[#allocation46_spill] sm:$0xff] %v8073_v9 }
 0x1a6   : > { %6461 = vmatmul.msk.f32.gmra.mxu1 %vm311_vm1, %v10456_v60  ;;  %388 = vst.msk [vmem:[#allocation2 + $0x181] sm:$0xff] %vm311_vm1, %v8073_v9 }
 0x1a7   : > { %v1967_v49 = vadd.f32 %v1881_v8, %v1689_v55  ;;  %6393 = vmatmul.msk.f32.gmra.mxu3 %vm311_vm1, %v2015_v50  ;;  %v2018_v8 = vld [vmem:[#allocation2 + $0x140] sm:$0xff]  ;;  %v10460_v50 = vld [vmem:[#allocation38_spill] sm:$0xff]  ;;  %v1135_v55 = vadd.f32 %v10461_v12, %v808_v24 }
 0x1a9   : > { %6495 = vmatmul.msk.f32.gmra.mxu2 %vm311_vm1, %v2017_v13  ;;  %v8044_v4 = vadd.f32 %v2160_v40, %v1967_v49 }
 0x1aa   : > { %v1328_v0 = vpop.f32.mrf.mxu3  ;;  %v1609_v58 = vpop.f32.mrf.mxu0 }
 0x1ab   : > { %v1412_v1 = vadd.f32 %v1328_v0, %v1134_v15 }
 0x1ac   : > { %v2163_v21 = vpop.f32.mrf.mxu2 }
 0x1ad   : > { %v1690_v60 = vadd.f32 %v1606_v33, %v1412_v1  ;;  %6428 = vmatmul.msk.f32.gmra.mxu0 %vm311_vm1, %v8046_v28  ;;  %v8059_v33 = vld [vmem:[#allocation2 + $0x139] sm:$0xff]  ;;  %v1887_v1 = vpop.f32.mrf.mxu1 }
 0x1ae   : > { %6462 = vmatmul.msk.f32.gmra.mxu1 %vm311_vm1, %v10460_v50 }
 0x1af   : > { %v1968_v40 = vadd.f32 %v1884_v19, %v1690_v60  ;;  %6394 = vmatmul.msk.f32.gmra.mxu3 %vm311_vm1, %v2016_v43  ;;  %v2019_v19 = vld [vmem:[#allocation2 + $0x150] sm:$0xff]  ;;  %v10463_v60 = vld [vmem:[#allocation45_spill] sm:$0xff] }
 0x1b1   : > { %6496 = vmatmul.msk.f32.gmra.mxu2 %vm311_vm1, %v2018_v8  ;;  %v8057_v49 = vadd.f32 %v2163_v21, %v1968_v40  ;;  %v1136_v21 = vadd.f32 %v7697_v27, %v811_v16  ;;  %v10467_v27 = vld [vmem:[#allocation52_spill] sm:$0xff] }
 0x1b2   : > { %v1331_v20 = vpop.f32.mrf.mxu3  ;;  %v1612_v15 = vpop.f32.mrf.mxu0 }
 0x1b3   : > { %v1413_v0 = vadd.f32 %v1331_v20, %v1135_v55  ;;  %v8077_v55 = vld [vmem:[#allocation2 + $0x141] sm:$0xff] }
 0x1b4   : > { %v2166_v43 = vpop.f32.mrf.mxu2 }
 0x1b5   : > { %v1691_v50 = vadd.f32 %v1609_v58, %v1413_v0  ;;  %6429 = vmatmul.msk.f32.gmra.mxu0 %vm311_vm1, %v8059_v33  ;;  %v10465_v0 = vld [vmem:[#allocation82_spill] sm:$0xff] }
 0x1b6   : > { %6463 = vmatmul.msk.f32.gmra.mxu1 %vm311_vm1, %v10463_v60 }
 0x1b7   : > { %v1969_v24 = vadd.f32 %v1887_v1, %v1691_v50  ;;  %6395 = vmatmul.msk.f32.gmra.mxu3 %vm311_vm1, %v2017_v13  ;;  %v10466_v1 = vld [vmem:[#allocation83_spill] sm:$0xff] }
 0x1b8   : > { %v814_v13 = vadd.f32 %v10466_v1, %v10465_v0  ;;  %v2020_v50 = vld [vmem:[#allocation2 + $0x158] sm:$0xff] }
 0x1b9   : > { %6497 = vmatmul.msk.f32.gmra.mxu2 %vm311_vm1, %v2019_v19  ;;  %v8070_v40 = vadd.f32 %v2166_v43, %v1969_v24  ;;  %v8091_v43 = vld [vmem:[%s7048_s12 + $0xf8] sm:$0xff]  ;;  %s6958_s12 = smov 48  }
 0x1ba   : > { %v1334_v58 = vpop.f32.mrf.mxu3  ;;  %v1615_v12 = vpop.f32.mrf.mxu0  ;;  %v1137_v16 = vadd.f32 %v7714_v22, %v814_v13  ;;  %10468 = vst [vmem:[#allocation58_spill] sm:$0xff] %v8091_v43  ;;  %v8095_v24 = vld [vmem:[#allocation2 + $0x151] sm:$0xff] }
 0x1bb   : > { %v1414_v20 = vadd.f32 %v1334_v58, %v1136_v21  ;;  %389 = vst.msk [vmem:[#allocation2 + $0x189] sm:$0xff] %vm311_vm1, %v8091_v43  ;;  %v817_v58 = vadd.f32 %v7716_v5, %v7709_v26  ;;  %v10469_v22 = vld [vmem:[#allocation59_spill] sm:$0xff]  ;;  %v820_v26 = vadd.f32 %v7733_v25, %v7726_v31  ;;  %v823_v25 = vadd.f32 %v7750_v30, %v7743_v37 }
 0x1bc   : > { %v826_v30 = vadd.f32 %v7767_v36, %v7760_v42 }
 0x1bd   : > { %v8081_v53 = vadd.f32 %v1612_v15, %v1414_v20  ;;  %6430 = vmatmul.msk.f32.gmra.mxu0 %vm311_vm1, %v8077_v55  ;;  %v1138_v0 = vadd.f32 %v7731_v35, %v817_v58  ;;  %v1139_v35 = vadd.f32 %v7748_v48, %v820_v26  ;;  %v8121_v58 = vld [vmem:[#allocation2 + $0x169] sm:$0xff]  ;;  %v1140_v48 = vadd.f32 %v7765_v44, %v823_v25  ;;  %v2025_v25 = vld [vmem:[#allocation2 + $0x198] sm:$0xff] }
 0x1be   : > { %6464 = vmatmul.msk.f32.gmra.mxu1 %vm311_vm1, %v10467_v27  ;;  %v8108_v27 = vld [vmem:[#allocation2 + $0x159] sm:$0xff]  ;;  %v1141_v44 = vadd.f32 %v7782_v2, %v826_v30 }
 0x1bf   : > { %6396 = vmatmul.msk.f32.gmra.mxu3 %vm311_vm1, %v2018_v8  ;;  %v2021_v8 = vld [vmem:[#allocation2 + $0x168] sm:$0xff] }
 0x1c1   : > { %6498 = vmatmul.msk.f32.gmra.mxu2 %vm311_vm1, %v2020_v50 }
 0x1c2   : > { %v1337_v60 = vpop.f32.mrf.mxu3  ;;  %v1618_v15 = vpop.f32.mrf.mxu0  ;;  %v2024_v26 = vld [vmem:[#allocation2 + $0x188] sm:$0xff] }
 0x1c3   : > { %v1415_v21 = vadd.f32 %v1337_v60, %v1137_v16  ;;  %v2022_v16 = vld [vmem:[#allocation2 + $0x170] sm:$0xff]  ;;  %v8149_v36 = vld [vmem:[#allocation2 + $0x182] sm:$0xff] }
 0x1c4   : > { %v10470_v60 = vld [vmem:[#allocation66_spill] sm:$0xff] }
 0x1c5   : > { %v8099_v20 = vadd.f32 %v1615_v12, %v1415_v21  ;;  %6431 = vmatmul.msk.f32.gmra.mxu0 %vm311_vm1, %v8095_v24 }
 0x1c6   : > { %6465 = vmatmul.msk.f32.gmra.mxu1 %vm311_vm1, %v10469_v22  ;;  %v2023_v22 = vld [vmem:[#allocation2 + $0x180] sm:$0xff] }
 0x1c7   : > { %6397 = vmatmul.msk.f32.gmra.mxu3 %vm311_vm1, %v2019_v19 }
 0x1c9   : > { %6499 = vmatmul.msk.f32.gmra.mxu2 %vm311_vm1, %v2021_v8 }
 0x1ca   : > { %v1340_v1 = vpop.f32.mrf.mxu3  ;;  %v1621_v13 = vpop.f32.mrf.mxu0 }
 0x1cb   : > { %v1416_v5 = vadd.f32 %v1340_v1, %v1138_v0  ;;  %v10471_v0 = vld [vmem:[#allocation73_spill] sm:$0xff] }
 0x1cd   : > { %v8112_v12 = vadd.f32 %v1618_v15, %v1416_v5  ;;  %6432 = vmatmul.msk.f32.gmra.mxu0 %vm311_vm1, %v8108_v27  ;;  %v8134_v5 = vld [vmem:[#allocation2 + $0x171] sm:$0xff] }
 0x1ce   : > { %6466 = vmatmul.msk.f32.gmra.mxu1 %vm311_vm1, %v10470_v60  ;;  %v10472_v60 = vld [vmem:[#allocation77_spill] sm:$0xff] }
 0x1cf   : > { %6398 = vmatmul.msk.f32.gmra.mxu3 %vm311_vm1, %v2020_v50 }
 0x1d1   : > { %6500 = vmatmul.msk.f32.gmra.mxu2 %vm311_vm1, %v2022_v16 }
 0x1d2   : > { %v1343_v19 = vpop.f32.mrf.mxu3  ;;  %v1624_v21 = vpop.f32.mrf.mxu0 }
 0x1d3   : > { %v1417_v31 = vadd.f32 %v1343_v19, %v1139_v35  ;;  %v8147_v19 = vld [vmem:[#allocation2 + $0x181] sm:$0xff] }
 0x1d5   : > { %v8125_v15 = vadd.f32 %v1621_v13, %v1417_v31  ;;  %6433 = vmatmul.msk.f32.gmra.mxu0 %vm311_vm1, %v8121_v58 }
 0x1d6   : > { %6467 = vmatmul.msk.f32.gmra.mxu1 %vm311_vm1, %v10471_v0 }
 0x1d7   : > { %6399 = vmatmul.msk.f32.gmra.mxu3 %vm311_vm1, %v2021_v8 }
 0x1d9   : > { %6501 = vmatmul.msk.f32.gmra.mxu2 %vm311_vm1, %v2023_v22 }
 0x1da   : > { %v1346_v50 = vpop.f32.mrf.mxu3  ;;  %v1627_v1 = vpop.f32.mrf.mxu0 }
 0x1db   : > { %v1418_v37 = vadd.f32 %v1346_v50, %v1140_v48  ;;  %v8162_v48 = vld [vmem:[#allocation2 + $0x189] sm:$0xff]  ;;  %v832_v50 = vadd.f32 %v7801_v46, %v7794_v52  ;;  %v2273_v52 = vld [vmem:[#allocation2 + $0x31] sm:$0xff]  ;;  %v835_v46 = vadd.f32 %v7818_v51, %v7811_v57 }
 0x1dd   : > { %v8138_v13 = vadd.f32 %v1624_v21, %v1418_v37  ;;  %6434 = vmatmul.msk.f32.gmra.mxu0 %vm311_vm1, %v8134_v5  ;;  %v829_v21 = vadd.f32 %v7784_v41, %v7777_v47  ;;  %v8164_v41 = vld [vmem:[#allocation2 + $0x18a] sm:$0xff]  ;;  %v2026_v37 = vld [vmem:[#allocation2 + $0x1a0] sm:$0xff] }
 0x1de   : > { %6468 = vmatmul.msk.f32.gmra.mxu1 %vm311_vm1, %v10472_v60  ;;  %v2551_v60 = vld [vmem:[#allocation2 + $0x32] sm:$0xff] }
 0x1df   : > { %6400 = vmatmul.msk.f32.gmra.mxu3 %vm311_vm1, %v2022_v16  ;;  %v1142_v2 = vadd.f32 %v7799_v54, %v829_v21  ;;  %v1143_v54 = vadd.f32 %v7816_v59, %v832_v50  ;;  %v2552_v21 = vld [vmem:[#allocation2 + $0x3a] sm:$0xff]  ;;  %v2275_v50 = vld [vmem:[#allocation2 + $0x49] sm:$0xff] }
 0x1e1   : > { %6502 = vmatmul.msk.f32.gmra.mxu2 %vm311_vm1, %v2024_v26 }
 0x1e2   : > { %v1349_v8 = vpop.f32.mrf.mxu3  ;;  %v1630_v35 = vpop.f32.mrf.mxu0 }
 0x1e3   : > { %v1419_v42 = vadd.f32 %v1349_v8, %v1141_v44 }
 0x1e5   : > { %v8153_v31 = vadd.f32 %v1627_v1, %v1419_v42  ;;  %6435 = vmatmul.msk.f32.gmra.mxu0 %vm311_vm1, %v8147_v19 }
 0x1e6   : > { %6469 = vmatmul.msk.f32.gmra.mxu1 %vm311_vm1, %v8149_v36 }
 0x1e7   : > { %6401 = vmatmul.msk.f32.gmra.mxu3 %vm311_vm1, %v2023_v22 }
 0x1e9   : > { %6503 = vmatmul.msk.f32.gmra.mxu2 %vm311_vm1, %v2025_v25  ;;  %v2274_v25 = vld [vmem:[#allocation2 + $0x39] sm:$0xff] }
 0x1ea   : > { %v1352_v16 = vpop.f32.mrf.mxu3  ;;  %v1633_v0 = vpop.f32.mrf.mxu0 }
 0x1eb   : > { %v1420_v47 = vadd.f32 %v1352_v16, %v1142_v2  ;;  %v838_v2 = vadd.f32 %v7836_v3, %v7830_v62  ;;  %v8197_v62 = vpop.f32.mrf.mxu1 }
 0x1ed   : > { %v8168_v1 = vadd.f32 %v1630_v35, %v1420_v47  ;;  %6436 = vmatmul.msk.f32.gmra.mxu0 %vm311_vm1, %v8162_v48  ;;  %v1145_v57 = vadd.f32 %v7851_v18, %v838_v2  ;;  %v2553_v47 = vld [vmem:[#allocation2 + $0x4a] sm:$0xff] }
 0x1ee   : > { %6470 = vmatmul.msk.f32.gmra.mxu1 %vm311_vm1, %v8164_v41 }
 0x1ef   : > { %6402 = vmatmul.msk.f32.gmra.mxu3 %vm311_vm1, %v2024_v26  ;;  %v1144_v26 = vadd.f32 %v7834_v56, %v835_v46 }
 0x1f1   : > { %6504 = vmatmul.msk.f32.gmra.mxu2 %vm311_vm1, %v2026_v37  ;;  %v841_v37 = vadd.f32 %v7853_v45, %v7846_v6  ;;  %v8204_v6 = vpop.f32.mrf.mxu2 }
 0x1f2   : > { %v1355_v22 = vpop.f32.mrf.mxu3  ;;  %v1636_v30 = vpop.f32.mrf.mxu0 }
 0x1f3   : > { %v1421_v44 = vadd.f32 %v1355_v22, %v1143_v54  ;;  %v1146_v3 = vadd.f32 %v7868_v29, %v841_v37 }
 0x1f5   : > { %v8179_v8 = vadd.f32 %v1633_v0, %v1421_v44  ;;  %6541 = vmatmul.msk.f32.vlgmr.msra.gmra.mxu0 %vm311_vm1, %v2551_v60  ;;  %v2276_v44 = vld [vmem:[#allocation2 + $0x51] sm:$0xff] }
 0x1f7   : > { %6507 = vmatmul.msk.f32.vlgmr.msra.gmra.mxu3 %vm311_vm1, %v2273_v52  ;;  %v844_v52 = vadd.f32 %v7870_v61, %v7863_v11  ;;  %v847_v11 = vadd.f32 %v7887_v23, %v7880_v32  ;;  %v850_v32 = vadd.f32 %v7904_v10, %v7897_v63  ;;  %v10478_v10 = vld [vmem:[#allocation94_spill] sm:$0xff] }
 0x1f9   : > { %v1147_v45 = vadd.f32 %v7885_v34, %v844_v52  ;;  %v1148_v34 = vadd.f32 %v7902_v39, %v847_v11  ;;  %v2280_v11 = vld [vmem:[#allocation2 + $0x81] sm:$0xff] }
 0x1fa   : > { %v1358_v35 = vpop.f32.mrf.mxu3  ;;  %v1639_v42 = vpop.f32.mrf.mxu0 }
 0x1fb   : > { %v1422_v59 = vadd.f32 %v1358_v35, %v1144_v26  ;;  %v8209_v26 = vpop.f32.mrf.mxu1 }
 0x1fd   : > { %v8186_v16 = vadd.f32 %v1636_v30, %v1422_v59  ;;  %6542 = vmatmul.msk.f32.gmra.mxu0 %vm311_vm1, %v2552_v21  ;;  %v2554_v30 = vld [vmem:[#allocation2 + $0x52] sm:$0xff]  ;;  %v2277_v59 = vld [vmem:[#allocation2 + $0x61] sm:$0xff] }
 0x1ff   : > { %6508 = vmatmul.msk.f32.gmra.mxu3 %vm311_vm1, %v2274_v25  ;;  %v8217_v25 = vpop.f32.mrf.mxu2 }
 0x202   : > { %v1361_v51 = vpop.f32.mrf.mxu3  ;;  %v1642_v0 = vpop.f32.mrf.mxu0 }
 0x203   : > { %v1423_v56 = vadd.f32 %v1361_v51, %v1145_v57  ;;  %v2556_v51 = vld [vmem:[#allocation2 + $0x6a] sm:$0xff] }
 0x205   : > { %v8193_v54 = vadd.f32 %v1639_v42, %v1423_v56  ;;  %6543 = vmatmul.msk.f32.gmra.mxu0 %vm311_vm1, %v2553_v47  ;;  %v2555_v42 = vld [vmem:[#allocation2 + $0x62] sm:$0xff]  ;;  %v8220_v47 = vpop.f32.mrf.mxu1 }
 0x206   : > { %v2278_v56 = vld [vmem:[#allocation2 + $0x69] sm:$0xff] }
 0x207   : > { %6509 = vmatmul.msk.f32.gmra.mxu3 %vm311_vm1, %v2275_v50  ;;  %v1149_v50 = vadd.f32 %v7922_v38, %v850_v32  ;;  %v8229_v37 = vpop.f32.mrf.mxu2 }
 0x20a   : > { %v1364_v22 = vpop.f32.mrf.mxu3  ;;  %v1645_v18 = vpop.f32.mrf.mxu0 }
 0x20b   : > { %v1424_v60 = vadd.f32 %v1364_v22, %v1146_v3  ;;  %v2557_v22 = vld [vmem:[#allocation2 + $0x7a] sm:$0xff] }
 0x20d   : > { %v8202_v46 = vadd.f32 %v1642_v0, %v1424_v60  ;;  %6544 = vmatmul.msk.f32.gmra.mxu0 %vm311_vm1, %v2554_v30  ;;  %v2279_v30 = vld [vmem:[#allocation2 + $0x79] sm:$0xff]  ;;  %v10475_v60 = vld [vmem:[#allocation89_spill] sm:$0xff]  ;;  %v8235_v63 = vpop.f32.mrf.mxu1 }
 0x20f   : > { %6510 = vmatmul.msk.f32.gmra.mxu3 %vm311_vm1, %v2276_v44  ;;  %v10476_v44 = vld [vmem:[#allocation91_spill] sm:$0xff] }
 0x210   : > { %v853_v52 = vadd.f32 %v10476_v44, %v10475_v60 }
 0x212   : > { %v1367_v29 = vpop.f32.mrf.mxu3  ;;  %v1648_v35 = vpop.f32.mrf.mxu0  ;;  %v1150_v38 = vadd.f32 %v10478_v10, %v853_v52 }
 0x213   : > { %v1425_v21 = vadd.f32 %v1367_v29, %v1147_v45 }
 0x215   : > { %v8213_v61 = vadd.f32 %v1645_v18, %v1425_v21  ;;  %6545 = vmatmul.msk.f32.gmra.mxu0 %vm311_vm1, %v2555_v42  ;;  %v2558_v42 = vld [vmem:[#allocation2 + $0x82] sm:$0xff] }
 0x217   : > { %10473 = vst [vmem:[#allocation35_spill] sm:$0xff] %v8213_v61  ;;  %6511 = vmatmul.msk.f32.gmra.mxu3 %vm311_vm1, %v2277_v59  ;;  %v8240_v59 = vpop.f32.mrf.mxu2 }
 0x21a   : > { %v1370_v2 = vpop.f32.mrf.mxu3  ;;  %v1651_v57 = vpop.f32.mrf.mxu0 }
 0x21b   : > { %v1426_v0 = vadd.f32 %v1370_v2, %v1148_v34  ;;  %v10479_v34 = vld [vmem:[#allocation92_spill] sm:$0xff]  ;;  %v10480_v2 = vld [vmem:[#allocation95_spill] sm:$0xff] }
 0x21d   : > { %v8224_v23 = vadd.f32 %v1648_v35, %v1426_v0  ;;  %6546 = vmatmul.msk.f32.gmra.mxu0 %vm311_vm1, %v2556_v51  ;;  %v856_v51 = vadd.f32 %v10480_v2, %v10479_v34  ;;  %v8248_v0 = vpop.f32.mrf.mxu1 }
 0x21f   : > { %10474 = vst [vmem:[#allocation36_spill] sm:$0xff] %v8224_v23  ;;  %6512 = vmatmul.msk.f32.gmra.mxu3 %vm311_vm1, %v2278_v56  ;;  %v10482_v56 = vld [vmem:[#allocation51_spill] sm:$0xff]  ;;  %v8253_v44 = vpop.f32.mrf.mxu2 }
 0x220   : > { %v1151_v32 = vadd.f32 %v10482_v56, %v856_v51  ;;  %v2561_v51 = vld [vmem:[#allocation2 + $0xaa] sm:$0xff] }
 0x221   : > { %v10486_v56 = vld [vmem:[#allocation85_spill] sm:$0xff] }
 0x222   : > { %v1373_v39 = vpop.f32.mrf.mxu3  ;;  %v1654_v3 = vpop.f32.mrf.mxu0 }
 0x223   : > { %v1427_v18 = vadd.f32 %v1373_v39, %v1149_v50 }
 0x225   : > { %v8233_v45 = vadd.f32 %v1651_v57, %v1427_v18  ;;  %6547 = vmatmul.msk.f32.gmra.mxu0 %vm311_vm1, %v2557_v22  ;;  %v2559_v22 = vld [vmem:[#allocation2 + $0x92] sm:$0xff] }
 0x227   : > { %10477 = vst [vmem:[#allocation37_spill] sm:$0xff] %v8233_v45  ;;  %6513 = vmatmul.msk.f32.gmra.mxu3 %vm311_vm1, %v2279_v30  ;;  %v2281_v30 = vld [vmem:[#allocation2 + $0x91] sm:$0xff] }
 0x22a   : > { %v1376_v29 = vpop.f32.mrf.mxu3  ;;  %v1657_v35 = vpop.f32.mrf.mxu0 }
 0x22b   : > { %v1428_v21 = vadd.f32 %v1376_v29, %v1150_v38  ;;  %v2560_v38 = vld [vmem:[#allocation2 + $0x9a] sm:$0xff] }
 0x22c   : > { %v10484_v29 = vld [vmem:[#allocation84_spill] sm:$0xff] }
 0x22d   : > { %v8244_v57 = vadd.f32 %v1654_v3, %v1428_v21  ;;  %6548 = vmatmul.msk.f32.gmra.mxu0 %vm311_vm1, %v2558_v42  ;;  %v8257_v3 = vpop.f32.mrf.mxu1  ;;  %v2282_v21 = vld [vmem:[#allocation2 + $0x99] sm:$0xff] }
 0x22f   : > { %10481 = vst [vmem:[#allocation49_spill] sm:$0xff] %v8244_v57  ;;  %6514 = vmatmul.msk.f32.gmra.mxu3 %vm311_vm1, %v2280_v11  ;;  %v2290_v57 = vld [vmem:[#allocation2 + $0xf9] sm:$0xff] }
 0x232   : > { %v1379_v50 = vpop.f32.mrf.mxu3  ;;  %v1660_v39 = vpop.f32.mrf.mxu0 }
 0x233   : > { %v1429_v18 = vadd.f32 %v1379_v50, %v1151_v32 }
 0x235   : > { %v8251_v60 = vadd.f32 %v1657_v35, %v1429_v18  ;;  %6549 = vmatmul.msk.f32.gmra.mxu0 %vm311_vm1, %v2559_v22  ;;  %v8264_v35 = vpop.f32.mrf.mxu2  ;;  %v8267_v50 = vpop.f32.mrf.mxu1  ;;  %v2283_v22 = vld [vmem:[#allocation2 + $0xa9] sm:$0xff] }
 0x237   : > { %10483 = vst [vmem:[#allocation54_spill] sm:$0xff] %v8251_v60  ;;  %6515 = vmatmul.msk.f32.gmra.mxu3 %vm311_vm1, %v2281_v30 }
 0x23a   : > { %v1382_v52 = vpop.f32.mrf.mxu3  ;;  %v1663_v10 = vpop.f32.mrf.mxu0 }
 0x23b   : > { %v1430_v42 = vadd.f32 %v1382_v52, %v10484_v29  ;;  %v10488_v29 = vld [vmem:[#allocation86_spill] sm:$0xff] }
 0x23d   : > { %v8260_v11 = vadd.f32 %v1660_v39, %v1430_v42  ;;  %6550 = vmatmul.msk.f32.gmra.mxu0 %vm311_vm1, %v2560_v38  ;;  %v8273_v39 = vpop.f32.mrf.mxu2  ;;  %v2562_v38 = vld [vmem:[#allocation2 + $0xb2] sm:$0xff] }
 0x23f   : > { %10485 = vst [vmem:[#allocation65_spill] sm:$0xff] %v8260_v11  ;;  %6516 = vmatmul.msk.f32.gmra.mxu3 %vm311_vm1, %v2282_v21  ;;  %v2284_v21 = vld [vmem:[#allocation2 + $0xb1] sm:$0xff] }
 0x242   : > { %v1385_v34 = vpop.f32.mrf.mxu3  ;;  %v1666_v2 = vpop.f32.mrf.mxu0 }
 0x243   : > { %v1431_v32 = vadd.f32 %v1385_v34, %v10486_v56  ;;  %v8278_v34 = vpop.f32.mrf.mxu1  ;;  %v2563_v56 = vld [vmem:[#allocation2 + $0xc2] sm:$0xff] }
 0x245   : > { %v8269_v18 = vadd.f32 %v1663_v10, %v1431_v32  ;;  %6551 = vmatmul.msk.f32.gmra.mxu0 %vm311_vm1, %v2561_v51  ;;  %v10490_v32 = vld [vmem:[#allocation87_spill] sm:$0xff]  ;;  %v8283_v9 = vpop.f32.mrf.mxu2 }
 0x247   : > { %10487 = vst [vmem:[#allocation41_spill] sm:$0xff] %v8269_v18  ;;  %6517 = vmatmul.msk.f32.gmra.mxu3 %vm311_vm1, %v2283_v22  ;;  %v2285_v18 = vld [vmem:[#allocation2 + $0xc1] sm:$0xff] }
 0x24a   : > { %v1388_v30 = vpop.f32.mrf.mxu3  ;;  %v1669_v52 = vpop.f32.mrf.mxu0 }
 0x24b   : > { %v1432_v42 = vadd.f32 %v1388_v30, %v10488_v29  ;;  %v10492_v30 = vmov 0.0  }
 0x24c   : > { %2898 = vst.msk [vmem:[#allocation3] sm:$0xff] %vm2897_vm4, %v10492_v30 }
 0x24d   : > { %v8276_v43 = vadd.f32 %v1666_v2, %v1432_v42  ;;  %6552 = vmatmul.msk.f32.gmra.mxu0 %vm311_vm1, %v2562_v38  ;;  %v6638_v2 = vld [vmem:[%s10240_s3 + $0x10] sm:$0xff]  ;;  %2907 = vst.msk [vmem:[#allocation3] sm:$0x1] %vm2906_vm5, %v10492_v30 }
 0x24e   : > { %2899 = vst.msk [vmem:[#allocation3 + $0x8] sm:$0xff] %vm2897_vm4, %v10492_v30  ;;  %3606 = vmatpush.msrb.mxu3 %v6638_v2  ;;  %v2564_v42 = vld [vmem:[#allocation2 + $0xca] sm:$0xff] }
 0x24f   : > { %10489 = vst [vmem:[#allocation42_spill] sm:$0xff] %v8276_v43  ;;  %6518 = vmatmul.msk.f32.gmra.mxu3 %vm311_vm1, %v2284_v21  ;;  %v10493_v21 = vld [vmem:[#allocation88_spill] sm:$0xff] }
 0x250   : > { %2903 = vst.msk [vmem:[#allocation3 + $0x198] sm:$0xff] %vm2897_vm4, %v10492_v30 }
 0x251   : > { %2904 = vst.msk [vmem:[#allocation3 + $0x1a0] sm:$0xff] %vm2897_vm4, %v10492_v30 }
 0x252   : > { %v1391_v10 = vpop.f32.mrf.mxu3  ;;  %v1672_v51 = vpop.f32.mrf.mxu0  ;;  %2908 = vst.msk [vmem:[#allocation3 + $0x18] sm:$0x1] %vm2906_vm5, %v10492_v30 }
 0x253   : > { %v1433_v22 = vadd.f32 %v1391_v10, %v10490_v32  ;;  %2909 = vst.msk [vmem:[#allocation3 + $0x30] sm:$0x1] %vm2906_vm5, %v10492_v30  ;;  %v2286_v10 = vld [vmem:[#allocation2 + $0xc9] sm:$0xff] }
 0x254   : > { %2910 = vst.msk [vmem:[#allocation3 + $0x48] sm:$0x1] %vm2906_vm5, %v10492_v30  ;;  %v2976_v32 = vld [vmem:[#allocation3] sm:$0xff] }
 0x255   : > { %v8285_v11 = vadd.f32 %v1669_v52, %v1433_v22  ;;  %6553 = vmatmul.msk.f32.gmra.mxu0 %vm311_vm1, %v2563_v56  ;;  %v8298_v52 = vpop.f32.mrf.mxu1  ;;  %2911 = vst.msk [vmem:[#allocation3 + $0x60] sm:$0x1] %vm2906_vm5, %v10492_v30  ;;  %v8315_v22 = vpop.f32.mrf.mxu2  ;;  %6606 = vmatmul.msk.f32.vlgmr.msra.gmra.mxu2 %vm2897_vm4, %v2976_v32  ;;  %v6737_v32 = vld [vmem:[%s10240_s3 + $0x28] sm:$0xff] }
 0x256   : > { %2912 = vst.msk [vmem:[#allocation3 + $0x78] sm:$0x1] %vm2906_vm5, %v10492_v30  ;;  %4431 = vmatpush.msrb.mxu2 %v6737_v32 }
 0x257   : > { %10491 = vst [vmem:[#allocation44_spill] sm:$0xff] %v8285_v11  ;;  %6519 = vmatmul.msk.f32.gmra.mxu3 %vm311_vm1, %v2285_v18  ;;  %v2977_v11 = vld [vmem:[#allocation3 + $0x8] sm:$0xff] }
 0x258   : > { %2913 = vst.msk [vmem:[#allocation3 + $0x90] sm:$0x1] %vm2906_vm5, %v10492_v30 }
 0x259   : > { %2914 = vst.msk [vmem:[#allocation3 + $0xa8] sm:$0x1] %vm2906_vm5, %v10492_v30 }
 0x25a   : > { %v1394_v38 = vpop.f32.mrf.mxu3  ;;  %v1675_v29 = vpop.f32.mrf.mxu0  ;;  %2915 = vst.msk [vmem:[#allocation3 + $0xc0] sm:$0x1] %vm2906_vm5, %v10492_v30 }
 0x25b   : > { %v1434_v18 = vadd.f32 %v1394_v38, %v10493_v21  ;;  %2916 = vst.msk [vmem:[#allocation3 + $0xd8] sm:$0x1] %vm2906_vm5, %v10492_v30  ;;  %v2565_v21 = vld [vmem:[#allocation2 + $0xda] sm:$0xff] }
 0x25c   : > { %2917 = vst.msk [vmem:[#allocation3 + $0xf0] sm:$0x1] %vm2906_vm5, %v10492_v30 }
 0x25d   : > { %v8311_v56 = vadd.f32 %v1672_v51, %v1434_v18  ;;  %6554 = vmatmul.msk.f32.gmra.mxu0 %vm311_vm1, %v2564_v42  ;;  %v3009_v51 = vld [vmem:[#allocation3 + $0x1] sm:$0xff]  ;;  %v8329_v2 = vpop.f32.mrf.mxu1  ;;  %2918 = vst.msk [vmem:[#allocation3 + $0x108] sm:$0x1] %vm2906_vm5, %v10492_v30  ;;  %6607 = vmatmul.msk.f32.gmra.mxu2 %vm2897_vm4, %v2977_v11  ;;  %v8358_v32 = vpop.f32.mrf.mxu2  ;;  %v10497_v11 = vld [vmem:[#allocation93_spill] sm:$0xff] }
 0x25e   : > { %6574 = vmatmul.msk.f32.vlgmr.msra.gmra.mxu1 %vm2897_vm4, %v3009_v51  ;;  %v10495_v18 = vld [vmem:[#allocation90_spill] sm:$0xff]  ;;  %v6671_v51 = vld [vmem:[%s10240_s3 + $0x18] sm:$0xff]  ;;  %2919 = vst.msk [vmem:[#allocation3 + $0x120] sm:$0x1] %vm2906_vm5, %v10492_v30 }
 0x25f   : > { %10494 = vst [vmem:[#allocation56_spill] sm:$0xff] %v8311_v56  ;;  %6520 = vmatmul.msk.f32.gmra.mxu3 %vm311_vm1, %v2286_v10  ;;  %v2287_v56 = vld [vmem:[#allocation2 + $0xd9] sm:$0xff]  ;;  %3881 = vmatpush.msrb.mxu0 %v6671_v51 }
 0x260   : > { %2920 = vst.msk [vmem:[#allocation3 + $0x138] sm:$0x1] %vm2906_vm5, %v10492_v30 }
 0x261   : > { %2921 = vst.msk [vmem:[#allocation3 + $0x150] sm:$0x1] %vm2906_vm5, %v10492_v30 }
 0x262   : > { %v1397_v38 = vpop.f32.mrf.mxu3  ;;  %v1678_v42 = vpop.f32.mrf.mxu0  ;;  %2922 = vst.msk [vmem:[#allocation3 + $0x168] sm:$0x1] %vm2906_vm5, %v10492_v30 }
 0x263   : > { %v1435_v10 = vadd.f32 %v1397_v38, %v10495_v18  ;;  %v6704_v38 = vld [vmem:[%s10240_s3 + $0x20] sm:$0xff]  ;;  %2923 = vst.msk [vmem:[#allocation3 + $0x180] sm:$0x1] %vm2906_vm5, %v10492_v30 }
 0x264   : > { %4156 = vmatpush.msrb.mxu1 %v6704_v38  ;;  %2926 = vst.msk [vmem:[#allocation3 + $0x29] sm:$0x1] %vm2906_vm5, %v10492_v30  ;;  %v2288_v38 = vld [vmem:[#allocation2 + $0xe1] sm:$0xff] }
 0x265   : > { %v8347_v18 = vadd.f32 %v1675_v29, %v1435_v10  ;;  %6555 = vmatmul.msk.f32.gmra.mxu0 %vm311_vm1, %v2565_v21  ;;  %v2566_v10 = vld [vmem:[#allocation2 + $0xe2] sm:$0xff]  ;;  %2927 = vst.msk [vmem:[#allocation3 + $0x41] sm:$0x1] %vm2906_vm5, %v10492_v30 }
 0x266   : > { %2928 = vst.msk [vmem:[#allocation3 + $0x59] sm:$0x1] %vm2906_vm5, %v10492_v30 }
 0x267   : > { %10496 = vst [vmem:[#allocation61_spill] sm:$0xff] %v8347_v18  ;;  %6521 = vmatmul.msk.f32.gmra.mxu3 %vm311_vm1, %v2287_v56  ;;  %v8369_v56 = vpop.f32.mrf.mxu1 }
 0x268   : > { %10498 = vst [vmem:[#allocation72_spill] sm:$0xff] %v8369_v56 }
 0x269   : > { %2929 = vst.msk [vmem:[#allocation3 + $0x71] sm:$0x1] %vm2906_vm5, %v10492_v30 }
 0x26a   : > { %v1400_v29 = vpop.f32.mrf.mxu3  ;;  %v1681_v21 = vpop.f32.mrf.mxu0  ;;  %2930 = vst.msk [vmem:[#allocation3 + $0x89] sm:$0x1] %vm2906_vm5, %v10492_v30 }
 0x26b   : > { %v1436_v51 = vadd.f32 %v1400_v29, %v10497_v11  ;;  %2931 = vst.msk [vmem:[#allocation3 + $0xa1] sm:$0x1] %vm2906_vm5, %v10492_v30  ;;  %v2567_v11 = vld [vmem:[#allocation2 + $0xf2] sm:$0xff] }
 0x26c   : > { %2932 = vst.msk [vmem:[#allocation3 + $0xb9] sm:$0x1] %vm2906_vm5, %v10492_v30 }
 0x26d   : > { %v8373_v18 = vadd.f32 %v1678_v42, %v1436_v51  ;;  %6556 = vmatmul.msk.f32.gmra.mxu0 %vm311_vm1, %v2566_v10  ;;  %2933 = vst.msk [vmem:[#allocation3 + $0xd1] sm:$0x1] %vm2906_vm5, %v10492_v30  ;;  %v8387_v42 = vpop.f32.mrf.mxu2  ;;  %v10501_v51 = vld [vmem:[#allocation39_spill] sm:$0xff] }
 0x26e   : > { %10500 = vst [vmem:[#allocation48_spill] sm:$0xff] %v8387_v42 }
 0x26f   : > { %10499 = vst [vmem:[#allocation50_spill] sm:$0xff] %v8373_v18  ;;  %6522 = vmatmul.msk.f32.gmra.mxu3 %vm311_vm1, %v2288_v38  ;;  %v2289_v38 = vld [vmem:[#allocation2 + $0xf1] sm:$0xff]  ;;  %v8400_v60 = vpop.f32.mrf.mxu1 }
 0x270   : > { %2934 = vst.msk [vmem:[#allocation3 + $0xe9] sm:$0x1] %vm2906_vm5, %v10492_v30 }
 0x271   : > { %2935 = vst.msk [vmem:[#allocation3 + $0x101] sm:$0x1] %vm2906_vm5, %v10492_v30 }
 0x272   : > { %v1403_v29 = vpop.f32.mrf.mxu3  ;;  %v2701_v10 = vpop.f32.mrf.mxu0  ;;  %2936 = vst.msk [vmem:[#allocation3 + $0x119] sm:$0x1] %vm2906_vm5, %v10492_v30 }
 0x273   : > { %v1437_v18 = vadd.f32 %v1403_v29, %v10501_v51  ;;  %2937 = vst.msk [vmem:[#allocation3 + $0x131] sm:$0x1] %vm2906_vm5, %v10492_v30  ;;  %v2568_v29 = vld [vmem:[#allocation2 + $0xfa] sm:$0xff] }
 0x274   : > { %10503 = vst [vmem:[#allocation63_spill] sm:$0xff] %v8400_v60 }
 0x275   : > { %v8396_v43 = vadd.f32 %v1681_v21, %v1437_v18  ;;  %6557 = vmatmul.msk.f32.gmra.mxu0 %vm311_vm1, %v2567_v11  ;;  %2938 = vst.msk [vmem:[#allocation3 + $0x149] sm:$0x1] %vm2906_vm5, %v10492_v30  ;;  %v10504_v11 = vld [vmem:[#allocation31_spill] sm:$0xff] }
 0x276   : > { %2939 = vst.msk [vmem:[#allocation3 + $0x161] sm:$0x1] %vm2906_vm5, %v10492_v30 }
 0x277   : > { %10502 = vst [vmem:[#allocation53_spill] sm:$0xff] %v8396_v43  ;;  %6523 = vmatmul.msk.f32.gmra.mxu3 %vm311_vm1, %v2289_v38  ;;  %v8418_v38 = vld [vmem:[%s10239_s2] ss:$0 sm:$0xff]  ;;  %v8421_v43 = vpop.f32.mrf.mxu2 }
 0x278   : > { %2940 = vst.msk [vmem:[#allocation3 + $0x179] sm:$0x1] %vm2906_vm5, %v10492_v30 }
 0x279   : > { %2941 = vst.msk [vmem:[#allocation3 + $0x191] sm:$0x1] %vm2906_vm5, %v10492_v30 }
 0x27a   : > { %v2423_v18 = vpop.f32.mrf.mxu3  ;;  %2924 = vst.msk [vmem:[#allocation3 + $0x198] sm:$0x1] %vm2906_vm5, %v10492_v30  ;;  %v2704_v21 = vpop.f32.mrf.mxu0 }
 0x27b   : > { %v2519_v51 = vadd.f32 %v2423_v18, %v10504_v11  ;;  %2901 = vst.msk [vmem:[#allocation3 + $0x10] sm:$0x3] %vm2900_vm6, %v10492_v30  ;;  %v8431_v11 = vpop.f32.mrf.mxu1 }
 0x27c   : > { %10505 = vst [vmem:[#allocation68_spill] sm:$0xff] %v8421_v43 }
 0x27d   : > { %2905 = vst.msk [vmem:[#allocation3 + $0x1a8] sm:$0x3] %vm2900_vm6, %v10492_v30  ;;  %v2797_v45 = vadd.f32 %v2701_v10, %v2519_v51  ;;  %6558 = vmatmul.msk.f32.gmra.mxu0 %vm311_vm1, %v2568_v29  ;;  %v2569_v51 = vld [vmem:[#allocation2 + $0x10a] sm:$0xff]  ;;  %vm5811_vm6 = vcmask 195712  }
 0x27e   : > { %2925 = vst.msk [vmem:[#allocation3 + $0x11] sm:$0x1] %vm2906_vm5, %v10492_v30  ;;  %v2291_v29 = vld [vmem:[#allocation2 + $0x109] sm:$0xff] }
 0x27f   : > { %2942 = vst.msk [vmem:[#allocation3 + $0x1a9] sm:$0x1] %vm2906_vm5, %v10492_v30  ;;  %v2833_v18 = vadd.f32 %v8418_v38, %v2797_v45  ;;  %6524 = vmatmul.msk.f32.gmra.mxu3 %vm311_vm1, %v2290_v57  ;;  %v8436_v30 = vpop.f32.mrf.mxu2  ;;  %vm5949_vm5 = vcmask 523719  }
 0x280   : > { %10506 = vst [vmem:[#allocation57_spill] sm:$0xff] %v8431_v11 }
 0x281   : > { %v2865_v23 = vmax.f32 %v2833_v18, 0.0  ;;  %10507 = vst [vmem:[#allocation55_spill] sm:$0xff] %v8436_v30 }
 0x282   : > { %v2426_v43 = vpop.f32.mrf.mxu3  ;;  %v3010_v60 = vld [vmem:[#allocation3 + $0x9] sm:$0xff]  ;;  %v2707_v10 = vpop.f32.mrf.mxu0 }
 0x283   : > { %2944 = vst.msk [vmem:[#allocation3 + $0x19] sm:$0xff] %vm2897_vm4, %v2865_v23  ;;  %v2520_v61 = vadd.f32 %v2426_v43, %v7994_v17  ;;  %6575 = vmatmul.msk.f32.gmra.mxu1 %vm2897_vm4, %v3010_v60  ;;  %v8441_v18 = vpop.f32.mrf.mxu1  ;;  %v2570_v43 = vld [vmem:[#allocation2 + $0x112] sm:$0xff] }
 0x284   : > { %10508 = vst [vmem:[#allocation60_spill] sm:$0xff] %v8441_v18 }
 0x285   : > { %v2798_v42 = vadd.f32 %v2704_v21, %v2520_v61  ;;  %6559 = vmatmul.msk.f32.gmra.mxu0 %vm311_vm1, %v2569_v51  ;;  %v10509_v61 = vld [vmem:[#allocation32_spill] sm:$0xff] }
 0x287   : > { %v2834_v45 = vadd.f32 %v8418_v38, %v2798_v42  ;;  %6525 = vmatmul.msk.f32.gmra.mxu3 %vm311_vm1, %v2291_v29  ;;  %v2292_v42 = vld [vmem:[#allocation2 + $0x111] sm:$0xff]  ;;  %v8453_v29 = vpop.f32.mrf.mxu2 }
 0x289   : > { %v2866_v57 = vmax.f32 %v2834_v45, 0.0 }
 0x28a   : > { %v2429_v23 = vpop.f32.mrf.mxu3  ;;  %v3011_v11 = vld [vmem:[#allocation3 + $0x19] sm:$0xff]  ;;  %v2710_v17 = vpop.f32.mrf.mxu0 }
 0x28b   : > { %v8443_v56 = vld [vmem:[#allocation3 + $0x18] sm:$0xff]  ;;  %2945 = vst.msk [vmem:[#allocation3 + $0x21] sm:$0xff] %vm2897_vm4, %v2866_v57  ;;  %v2521_v60 = vadd.f32 %v2429_v23, %v10509_v61  ;;  %6576 = vmatmul.msk.f32.gmra.mxu1 %vm2897_vm4, %v3011_v11 }
 0x28c   : > { %6608 = vmatmul.msk.f32.gmra.mxu2 %vm2897_vm4, %v8443_v56  ;;  %v2571_v23 = vld [vmem:[#allocation2 + $0x122] sm:$0xff] }
 0x28d   : > { %v2799_v21 = vadd.f32 %v2707_v10, %v2521_v60  ;;  %6560 = vmatmul.msk.f32.gmra.mxu0 %vm311_vm1, %v2570_v43  ;;  %v8462_v10 = vpop.f32.mrf.mxu1 }
 0x28e   : > { %10510 = vst [vmem:[#allocation70_spill] sm:$0xff] %v8462_v10  ;;  %v10512_v10 = vld [vmem:[#allocation43_spill] sm:$0xff] }
 0x28f   : > { %v2835_v51 = vadd.f32 %v8418_v38, %v2799_v21  ;;  %6526 = vmatmul.msk.f32.gmra.mxu3 %vm311_vm1, %v2292_v42  ;;  %v8468_v21 = vpop.f32.mrf.mxu2 }
 0x290   : > { %10511 = vst [vmem:[#allocation64_spill] sm:$0xff] %v8468_v21 }
 0x291   : > { %v2867_v45 = vmax.f32 %v2835_v51, 0.0 }
 0x292   : > { %v2432_v57 = vpop.f32.mrf.mxu3  ;;  %v3012_v18 = vld [vmem:[#allocation3 + $0x21] sm:$0xff]  ;;  %v2713_v11 = vpop.f32.mrf.mxu0 }
 0x293   : > { %v8455_v30 = vld [vmem:[#allocation3 + $0x20] sm:$0xff]  ;;  %2946 = vst.msk [vmem:[#allocation3 + $0x31] sm:$0xff] %vm2897_vm4, %v2867_v45  ;;  %v2522_v61 = vadd.f32 %v2432_v57, %v8019_v14  ;;  %6577 = vmatmul.msk.f32.gmra.mxu1 %vm2897_vm4, %v3012_v18 }
 0x294   : > { %6609 = vmatmul.msk.f32.gmra.mxu2 %vm2897_vm4, %v8455_v30  ;;  %v2572_v57 = vld [vmem:[#allocation2 + $0x12a] sm:$0xff] }
 0x295   : > { %v2800_v43 = vadd.f32 %v2710_v17, %v2522_v61  ;;  %6561 = vmatmul.msk.f32.gmra.mxu0 %vm311_vm1, %v2571_v23 }
 0x297   : > { %v2836_v60 = vadd.f32 %v8418_v38, %v2800_v43  ;;  %6527 = vmatmul.msk.f32.gmra.mxu3 %vm311_vm1, %v8033_v7  ;;  %v8477_v7 = vpop.f32.mrf.mxu1 }
 0x299   : > { %v2868_v42 = vmax.f32 %v2836_v60, 0.0 }
 0x29a   : > { %v2435_v51 = vpop.f32.mrf.mxu3  ;;  %v3013_v14 = vld [vmem:[#allocation3 + $0x31] sm:$0xff]  ;;  %v2716_v18 = vpop.f32.mrf.mxu0 }
 0x29b   : > { %v8470_v45 = vld [vmem:[#allocation3 + $0x30] sm:$0xff]  ;;  %2947 = vst.msk [vmem:[#allocation3 + $0x39] sm:$0xff] %vm2897_vm4, %v2868_v42  ;;  %v2523_v17 = vadd.f32 %v2435_v51, %v10512_v10  ;;  %6578 = vmatmul.msk.f32.gmra.mxu1 %vm2897_vm4, %v3013_v14  ;;  %v8490_v14 = vpop.f32.mrf.mxu2 }
 0x29c   : > { %6610 = vmatmul.msk.f32.gmra.mxu2 %vm2897_vm4, %v8470_v45  ;;  %v2573_v51 = vld [vmem:[#allocation2 + $0x13a] sm:$0xff] }
 0x29d   : > { %v2801_v23 = vadd.f32 %v2713_v11, %v2523_v17  ;;  %6562 = vmatmul.msk.f32.gmra.mxu0 %vm311_vm1, %v2572_v57 }
 0x29f   : > { %v2837_v61 = vadd.f32 %v8418_v38, %v2801_v23  ;;  %6528 = vmatmul.msk.f32.gmra.mxu3 %vm311_vm1, %v8046_v28  ;;  %v8496_v17 = vpop.f32.mrf.mxu1 }
 0x2a1   : > { %v2869_v43 = vmax.f32 %v2837_v61, 0.0 }
 0x2a2   : > { %v2438_v60 = vpop.f32.mrf.mxu3  ;;  %v3014_v42 = vld [vmem:[#allocation3 + $0x39] sm:$0xff]  ;;  %v2719_v10 = vpop.f32.mrf.mxu0 }
 0x2a3   : > { %v8483_v21 = vld [vmem:[#allocation3 + $0x38] sm:$0xff]  ;;  %2948 = vst.msk [vmem:[#allocation3 + $0x49] sm:$0xff] %vm2897_vm4, %v2869_v43  ;;  %v2524_v11 = vadd.f32 %v2438_v60, %v8044_v4  ;;  %6579 = vmatmul.msk.f32.gmra.mxu1 %vm2897_vm4, %v3014_v42 }
 0x2a4   : > { %6611 = vmatmul.msk.f32.gmra.mxu2 %vm2897_vm4, %v8483_v21  ;;  %v2574_v42 = vld [vmem:[#allocation2 + $0x142] sm:$0xff] }
 0x2a5   : > { %v2802_v57 = vadd.f32 %v2716_v18, %v2524_v11  ;;  %6563 = vmatmul.msk.f32.gmra.mxu0 %vm311_vm1, %v2573_v51 }
 0x2a7   : > { %v2838_v28 = vadd.f32 %v8418_v38, %v2802_v57  ;;  %6529 = vmatmul.msk.f32.gmra.mxu3 %vm311_vm1, %v8059_v33  ;;  %v8505_v33 = vpop.f32.mrf.mxu2 }
 0x2a9   : > { %v2870_v23 = vmax.f32 %v2838_v28, 0.0  ;;  %v8511_v28 = vpop.f32.mrf.mxu1 }
 0x2aa   : > { %v2441_v61 = vpop.f32.mrf.mxu3  ;;  %v3015_v4 = vld [vmem:[#allocation3 + $0x49] sm:$0xff]  ;;  %v2722_v60 = vpop.f32.mrf.mxu0  ;;  %10513 = vst [vmem:[#allocation62_spill] sm:$0xff] %v8511_v28 }
 0x2ab   : > { %v8498_v43 = vld [vmem:[#allocation3 + $0x48] sm:$0xff]  ;;  %2949 = vst.msk [vmem:[#allocation3 + $0x51] sm:$0xff] %vm2897_vm4, %v2870_v23  ;;  %v2525_v18 = vadd.f32 %v2441_v61, %v8057_v49  ;;  %6580 = vmatmul.msk.f32.gmra.mxu1 %vm2897_vm4, %v3015_v4 }
 0x2ac   : > { %6612 = vmatmul.msk.f32.gmra.mxu2 %vm2897_vm4, %v8498_v43 }
 0x2ad   : > { %v2803_v51 = vadd.f32 %v2719_v10, %v2525_v18  ;;  %6564 = vmatmul.msk.f32.gmra.mxu0 %vm311_vm1, %v2574_v42  ;;  %v2575_v10 = vld [vmem:[#allocation2 + $0x152] sm:$0xff] }
 0x2af   : > { %v2839_v11 = vadd.f32 %v8418_v38, %v2803_v51  ;;  %6530 = vmatmul.msk.f32.gmra.mxu3 %vm311_vm1, %v8077_v55  ;;  %v1970_v55 = vadd.f32 %v8197_v62, %v8081_v53  ;;  %v2576_v62 = vld [vmem:[#allocation2 + $0x15a] sm:$0xff] }
 0x2b1   : > { %v2871_v57 = vmax.f32 %v2839_v11, 0.0  ;;  %v8526_v11 = vpop.f32.mrf.mxu2 }
 0x2b2   : > { %v2444_v23 = vpop.f32.mrf.mxu3  ;;  %v3016_v49 = vld [vmem:[#allocation3 + $0x51] sm:$0xff]  ;;  %v2725_v4 = vpop.f32.mrf.mxu0 }
 0x2b3   : > { %v8513_v61 = vld [vmem:[#allocation3 + $0x50] sm:$0xff]  ;;  %2950 = vst.msk [vmem:[#allocation3 + $0x61] sm:$0xff] %vm2897_vm4, %v2871_v57  ;;  %v2526_v18 = vadd.f32 %v2444_v23, %v8070_v40  ;;  %6581 = vmatmul.msk.f32.gmra.mxu1 %vm2897_vm4, %v3016_v49  ;;  %v2249_v40 = vadd.f32 %v8204_v6, %v1970_v55  ;;  %v1971_v6 = vadd.f32 %v8209_v26, %v8099_v20  ;;  %v2577_v26 = vld [vmem:[#allocation2 + $0x16a] sm:$0xff] }
 0x2b4   : > { %6613 = vmatmul.msk.f32.gmra.mxu2 %vm2897_vm4, %v8513_v61 }
 0x2b5   : > { %v2804_v42 = vadd.f32 %v2722_v60, %v2526_v18  ;;  %6565 = vmatmul.msk.f32.gmra.mxu0 %vm311_vm1, %v2575_v10  ;;  %v2250_v55 = vadd.f32 %v8217_v25, %v1971_v6 }
 0x2b7   : > { %v2840_v51 = vadd.f32 %v8418_v38, %v2804_v42  ;;  %6531 = vmatmul.msk.f32.gmra.mxu3 %vm311_vm1, %v8095_v24  ;;  %v8535_v24 = vpop.f32.mrf.mxu1 }
 0x2b9   : > { %v2872_v57 = vmax.f32 %v2840_v51, 0.0  ;;  %v8544_v51 = vpop.f32.mrf.mxu2 }
 0x2ba   : > { %v2447_v23 = vpop.f32.mrf.mxu3  ;;  %v3017_v49 = vld [vmem:[#allocation3 + $0x61] sm:$0xff]  ;;  %v2728_v53 = vpop.f32.mrf.mxu0 }
 0x2bb   : > { %v8529_v28 = vld [vmem:[#allocation3 + $0x60] sm:$0xff]  ;;  %2951 = vst.msk [vmem:[#allocation3 + $0x69] sm:$0xff] %vm2897_vm4, %v2872_v57  ;;  %v2527_v60 = vadd.f32 %v2447_v23, %v2249_v40  ;;  %6582 = vmatmul.msk.f32.gmra.mxu1 %vm2897_vm4, %v3017_v49 }
 0x2bc   : > { %6614 = vmatmul.msk.f32.gmra.mxu2 %vm2897_vm4, %v8529_v28 }
 0x2bd   : > { %v2805_v10 = vadd.f32 %v2725_v4, %v2527_v60  ;;  %6566 = vmatmul.msk.f32.gmra.mxu0 %vm311_vm1, %v2576_v62 }
 0x2bf   : > { %v2841_v18 = vadd.f32 %v8418_v38, %v2805_v10  ;;  %6532 = vmatmul.msk.f32.gmra.mxu3 %vm311_vm1, %v8108_v27  ;;  %v1972_v27 = vadd.f32 %v8220_v47, %v8112_v12  ;;  %v8554_v49 = vpop.f32.mrf.mxu1  ;;  %v2578_v47 = vld [vmem:[#allocation2 + $0x172] sm:$0xff] }
 0x2c1   : > { %v2873_v42 = vmax.f32 %v2841_v18, 0.0  ;;  %v2251_v60 = vadd.f32 %v8229_v37, %v1972_v27 }
 0x2c2   : > { %v2450_v40 = vpop.f32.mrf.mxu3  ;;  %v3018_v57 = vld [vmem:[#allocation3 + $0x69] sm:$0xff]  ;;  %v2731_v20 = vpop.f32.mrf.mxu0 }
 0x2c3   : > { %v8546_v23 = vld [vmem:[#allocation3 + $0x68] sm:$0xff]  ;;  %2952 = vst.msk [vmem:[#allocation3 + $0x79] sm:$0xff] %vm2897_vm4, %v2873_v42  ;;  %v2528_v4 = vadd.f32 %v2450_v40, %v2250_v55  ;;  %6583 = vmatmul.msk.f32.gmra.mxu1 %vm2897_vm4, %v3018_v57  ;;  %v8567_v42 = vpop.f32.mrf.mxu2 }
 0x2c4   : > { %6615 = vmatmul.msk.f32.gmra.mxu2 %vm2897_vm4, %v8546_v23 }
 0x2c5   : > { %v2806_v25 = vadd.f32 %v2728_v53, %v2528_v4  ;;  %6567 = vmatmul.msk.f32.gmra.mxu0 %vm311_vm1, %v2577_v26 }
 0x2c7   : > { %v2842_v62 = vadd.f32 %v8418_v38, %v2806_v25  ;;  %6533 = vmatmul.msk.f32.gmra.mxu3 %vm311_vm1, %v8121_v58  ;;  %v1973_v58 = vadd.f32 %v8235_v63, %v8125_v15  ;;  %v8575_v57 = vpop.f32.mrf.mxu1 }
 0x2c9   : > { %v2874_v6 = vmax.f32 %v2842_v62, 0.0  ;;  %v2252_v26 = vadd.f32 %v8240_v59, %v1973_v58 }
 0x2ca   : > { %v2453_v10 = vpop.f32.mrf.mxu3  ;;  %v3019_v18 = vld [vmem:[#allocation3 + $0x79] sm:$0xff]  ;;  %v2734_v12 = vpop.f32.mrf.mxu0 }
 0x2cb   : > { %v8561_v55 = vld [vmem:[#allocation3 + $0x78] sm:$0xff]  ;;  %2953 = vst.msk [vmem:[#allocation3 + $0x81] sm:$0xff] %vm2897_vm4, %v2874_v6  ;;  %v2529_v53 = vadd.f32 %v2453_v10, %v2251_v60  ;;  %6584 = vmatmul.msk.f32.gmra.mxu1 %vm2897_vm4, %v3019_v18 }
 0x2cc   : > { %6616 = vmatmul.msk.f32.gmra.mxu2 %vm2897_vm4, %v8561_v55 }
 0x2cd   : > { %v2807_v37 = vadd.f32 %v2731_v20, %v2529_v53  ;;  %6568 = vmatmul.msk.f32.gmra.mxu0 %vm311_vm1, %v2578_v47  ;;  %v8589_v20 = vpop.f32.mrf.mxu2 }
 0x2cf   : > { %v2843_v40 = vadd.f32 %v8418_v38, %v2807_v37  ;;  %6534 = vmatmul.msk.f32.gmra.mxu3 %vm311_vm1, %v8134_v5  ;;  %v1974_v5 = vadd.f32 %v8248_v0, %v8138_v13  ;;  %v8597_v18 = vpop.f32.mrf.mxu1 }
 0x2d1   : > { %v2875_v4 = vmax.f32 %v2843_v40, 0.0  ;;  %v2253_v6 = vadd.f32 %v8253_v44, %v1974_v5 }
 0x2d2   : > { %v2456_v27 = vpop.f32.mrf.mxu3  ;;  %v8578_v25 = vld [vmem:[#allocation3 + $0x81] sm:$0xff]  ;;  %v2737_v15 = vpop.f32.mrf.mxu0 }
 0x2d3   : > { %v8580_v62 = vld [vmem:[#allocation3 + $0x80] sm:$0xff]  ;;  %2954 = vst.msk [vmem:[#allocation3 + $0x91] sm:$0xff] %vm2897_vm4, %v2875_v4  ;;  %v2530_v63 = vadd.f32 %v2456_v27, %v2252_v26  ;;  %6585 = vmatmul.msk.f32.gmra.mxu1 %vm2897_vm4, %v8578_v25 }
 0x2d4   : > { %6617 = vmatmul.msk.f32.gmra.mxu2 %vm2897_vm4, %v8580_v62 }
 0x2d5   : > { %v2808_v59 = vadd.f32 %v2734_v12, %v2530_v63  ;;  %6569 = vmatmul.msk.f32.gmra.mxu0 %vm311_vm1, %v8149_v36  ;;  %v8615_v58 = vpop.f32.mrf.mxu2 }
 0x2d7   : > { %v2844_v60 = vadd.f32 %v8418_v38, %v2808_v59  ;;  %6535 = vmatmul.msk.f32.gmra.mxu3 %vm311_vm1, %v8147_v19  ;;  %v1975_v19 = vadd.f32 %v8257_v3, %v8153_v31  ;;  %v2581_v3 = vld [vmem:[#allocation2 + $0x19a] sm:$0xff] }
 0x2d9   : > { %v2876_v10 = vmax.f32 %v2844_v60, 0.0  ;;  %v2254_v37 = vadd.f32 %v8264_v35, %v1975_v19  ;;  %v2303_v35 = vld [vmem:[#allocation2 + $0x199] sm:$0xff]  ;;  %v1977_v19 = vadd.f32 %v8278_v34, %v8179_v8 }
 0x2da   : > { %v2459_v47 = vpop.f32.mrf.mxu3  ;;  %v8599_v53 = vld [vmem:[#allocation3 + $0x91] sm:$0xff]  ;;  %v2740_v0 = vpop.f32.mrf.mxu0 }
 0x2db   : > { %v8601_v13 = vld [vmem:[#allocation3 + $0x90] sm:$0xff]  ;;  %2955 = vst.msk [vmem:[#allocation3 + $0x99] sm:$0xff] %vm2897_vm4, %v2876_v10  ;;  %v2531_v12 = vadd.f32 %v2459_v47, %v2253_v6  ;;  %6586 = vmatmul.msk.f32.gmra.mxu1 %vm2897_vm4, %v8599_v53 }
 0x2dc   : > { %6618 = vmatmul.msk.f32.gmra.mxu2 %vm2897_vm4, %v8601_v13 }
 0x2dd   : > { %v2809_v36 = vadd.f32 %v2737_v15, %v2531_v12  ;;  %6570 = vmatmul.msk.f32.gmra.mxu0 %vm311_vm1, %v8164_v41  ;;  %v1976_v15 = vadd.f32 %v8267_v50, %v8168_v1  ;;  %v8635_v6 = vpop.f32.mrf.mxu2  ;;  %v2582_v50 = vld [vmem:[#allocation2 + $0x1a2] sm:$0xff] }
 0x2df   : > { %v2845_v44 = vadd.f32 %v8418_v38, %v2809_v36  ;;  %6536 = vmatmul.msk.f32.gmra.mxu3 %vm311_vm1, %v8162_v48  ;;  %v8627_v48 = vpop.f32.mrf.mxu1  ;;  %v2255_v59 = vadd.f32 %v8273_v39, %v1976_v15  ;;  %v2304_v39 = vld [vmem:[#allocation2 + $0x1a1] sm:$0xff]  ;;  %v3461_v15 = vld [vmem:[#allocation3 + $0x2] sm:$0xff] }
 0x2e1   : > { %v2877_v40 = vmax.f32 %v2845_v44, 0.0 }
 0x2e2   : > { %v2462_v26 = vpop.f32.mrf.mxu3  ;;  %v8618_v4 = vld [vmem:[#allocation3 + $0x99] sm:$0xff]  ;;  %v2743_v31 = vpop.f32.mrf.mxu0 }
 0x2e3   : > { %v8620_v27 = vld [vmem:[#allocation3 + $0x98] sm:$0xff]  ;;  %2956 = vst.msk [vmem:[#allocation3 + $0xa9] sm:$0xff] %vm2897_vm4, %v2877_v40  ;;  %v2532_v41 = vadd.f32 %v2462_v26, %v2254_v37  ;;  %6587 = vmatmul.msk.f32.gmra.mxu1 %vm2897_vm4, %v8618_v4  ;;  %v2256_v40 = vadd.f32 %v8283_v9, %v1977_v19  ;;  %v1978_v9 = vadd.f32 %v8298_v52, %v8186_v16 }
 0x2e4   : > { %6619 = vmatmul.msk.f32.gmra.mxu2 %vm2897_vm4, %v8620_v27 }
 0x2e5   : > { %v2810_v63 = vadd.f32 %v2740_v0, %v2532_v41  ;;  %6571 = vmatmul.msk.f32.gmra.mxu0 %vm311_vm1, %v2581_v3 }
 0x2e7   : > { %v2846_v5 = vadd.f32 %v8418_v38, %v2810_v63  ;;  %6537 = vmatmul.msk.f32.gmra.mxu3 %vm311_vm1, %v2303_v35  ;;  %v8648_v44 = vpop.f32.mrf.mxu1 }
 0x2e9   : > { %v2878_v60 = vmax.f32 %v2846_v5, 0.0 }
 0x2ea   : > { %v2465_v10 = vpop.f32.mrf.mxu3  ;;  %v8637_v47 = vld [vmem:[#allocation3 + $0xa9] sm:$0xff]  ;;  %v2746_v1 = vpop.f32.mrf.mxu0 }
 0x2eb   : > { %10514 = vst [vmem:[#allocation67_spill] sm:$0xff] %v8637_v47  ;;  %v8639_v12 = vld [vmem:[#allocation3 + $0xa8] sm:$0xff]  ;;  %v2533_v0 = vadd.f32 %v2465_v10, %v2255_v59  ;;  %6588 = vmatmul.msk.f32.gmra.mxu1 %vm2897_vm4, %v8637_v47 }
 0x2ec   : > { %2957 = vst.msk [vmem:[#allocation3 + $0xb1] sm:$0xff] %vm2897_vm4, %v2878_v60  ;;  %6620 = vmatmul.msk.f32.gmra.mxu2 %vm2897_vm4, %v8639_v12  ;;  %v2257_v60 = vadd.f32 %v8315_v22, %v1978_v9  ;;  %v1979_v22 = vadd.f32 %v8329_v2, %v8193_v54 }
 0x2ed   : > { %v2811_v36 = vadd.f32 %v2743_v31, %v2533_v0  ;;  %6572 = vmatmul.msk.f32.gmra.mxu0 %vm311_vm1, %v2582_v50  ;;  %v8663_v31 = vpop.f32.mrf.mxu2 }
 0x2ef   : > { %v2847_v37 = vadd.f32 %v8418_v38, %v2811_v36  ;;  %6538 = vmatmul.msk.f32.gmra.mxu3 %vm311_vm1, %v2304_v39  ;;  %v8669_v5 = vpop.f32.mrf.mxu1 }
 0x2f1   : > { %v2879_v26 = vmax.f32 %v2847_v37, 0.0 }
 0x2f2   : > { %v2468_v3 = vpop.f32.mrf.mxu3  ;;  %v2749_v8 = vpop.f32.mrf.mxu0 }
 0x2f3   : > { %v8654_v41 = vld [vmem:[#allocation3 + $0xb1] sm:$0xff]  ;;  %2958 = vst.msk [vmem:[#allocation3 + $0xc1] sm:$0xff] %vm2897_vm4, %v2879_v26  ;;  %v2534_v34 = vadd.f32 %v2468_v3, %v2256_v40  ;;  %v2258_v40 = vadd.f32 %v8358_v32, %v1979_v22 }
 0x2f4   : > { %10515 = vst [vmem:[#allocation79_spill] sm:$0xff] %v8654_v41  ;;  %v8656_v35 = vld [vmem:[#allocation3 + $0xb0] sm:$0xff]  ;;  %6589 = vmatmul.msk.f32.gmra.mxu1 %vm2897_vm4, %v8654_v41 }
 0x2f5   : > { %6621 = vmatmul.msk.f32.gmra.mxu2 %vm2897_vm4, %v8656_v35  ;;  %v2812_v63 = vadd.f32 %v2746_v1, %v2534_v34  ;;  %6672 = vmatmul.msk.f32.vlgmr.msrb.gmra.mxu0 %vm2897_vm4, %v8443_v56  ;;  %v8683_v56 = vpop.f32.mrf.mxu2  ;;  %v3462_v1 = vld [vmem:[#allocation3 + $0xa] sm:$0xff] }
 0x2f7   : > { %v2848_v59 = vadd.f32 %v8418_v38, %v2812_v63  ;;  %6639 = vmatmul.msk.f32.vlgmr.msrb.gmra.mxu3 %vm2897_vm4, %v3461_v15  ;;  %v8709_v63 = vld [vmem:[#allocation3 + $0x1a] sm:$0xff] }
 0x2f9   : > { %v2880_v10 = vmax.f32 %v2848_v59, 0.0 }
 0x2fa   : > { %v2471_v50 = vpop.f32.mrf.mxu3  ;;  %v8674_v0 = vld [vmem:[#allocation3 + $0xc1] sm:$0xff]  ;;  %v2752_v16 = vpop.f32.mrf.mxu0 }
 0x2fb   : > { %10516 = vst [vmem:[#allocation71_spill] sm:$0xff] %v8674_v0  ;;  %v8676_v39 = vld [vmem:[#allocation3 + $0xc0] sm:$0xff]  ;;  %v2535_v52 = vadd.f32 %v2471_v50, %v2257_v60 }
 0x2fc   : > { %2959 = vst.msk [vmem:[#allocation3 + $0xc9] sm:$0xff] %vm2897_vm4, %v2880_v10  ;;  %6590 = vmatmul.msk.f32.gmra.mxu1 %vm2897_vm4, %v8674_v0  ;;  %v10519_v10 = vld [vmem:[#allocation48_spill] sm:$0xff] }
 0x2fd   : > { %6622 = vmatmul.msk.f32.gmra.mxu2 %vm2897_vm4, %v8676_v39  ;;  %v2813_v19 = vadd.f32 %v2749_v8, %v2535_v52  ;;  %6673 = vmatmul.msk.f32.gmra.mxu0 %vm2897_vm4, %v8455_v30  ;;  %v10518_v30 = vld [vmem:[#allocation72_spill] sm:$0xff]  ;;  %v8707_v9 = vpop.f32.mrf.mxu2 }
 0x2fe   : > { %v1980_v8 = vadd.f32 %v10518_v30, %v8202_v46 }
 0x2ff   : > { %v2849_v36 = vadd.f32 %v8418_v38, %v2813_v19  ;;  %6640 = vmatmul.msk.f32.gmra.mxu3 %vm2897_vm4, %v3462_v1  ;;  %v10521_v19 = vld [vmem:[#allocation35_spill] sm:$0xff] }
 0x300   : > { %v8691_v37 = vpop.f32.mrf.mxu1  ;;  %v2259_v50 = vadd.f32 %v10519_v10, %v1980_v8 }
 0x301   : > { %v2881_v26 = vmax.f32 %v2849_v36, 0.0  ;;  %v10522_v36 = vld [vmem:[#allocation63_spill] sm:$0xff] }
 0x302   : > { %v2474_v3 = vpop.f32.mrf.mxu3  ;;  %v2755_v54 = vpop.f32.mrf.mxu0 }
 0x303   : > { %v8694_v34 = vld [vmem:[#allocation3 + $0xc9] sm:$0xff]  ;;  %2960 = vst.msk [vmem:[#allocation3 + $0xd9] sm:$0xff] %vm2897_vm4, %v2881_v26  ;;  %v2536_v2 = vadd.f32 %v2474_v3, %v2258_v40  ;;  %v1981_v40 = vadd.f32 %v10522_v36, %v10521_v19  ;;  %v10526_v19 = vld [vmem:[#allocation57_spill] sm:$0xff] }
 0x304   : > { %10517 = vst [vmem:[#allocation69_spill] sm:$0xff] %v8694_v34  ;;  %v8696_v15 = vld [vmem:[#allocation3 + $0xc8] sm:$0xff]  ;;  %6591 = vmatmul.msk.f32.gmra.mxu1 %vm2897_vm4, %v8694_v34 }
 0x305   : > { %6623 = vmatmul.msk.f32.gmra.mxu2 %vm2897_vm4, %v8696_v15  ;;  %v2814_v32 = vadd.f32 %v2752_v16, %v2536_v2  ;;  %6674 = vmatmul.msk.f32.gmra.mxu0 %vm2897_vm4, %v8470_v45  ;;  %v8728_v2 = vld [vmem:[#allocation3 + $0x22] sm:$0xff] }
 0x307   : > { %v2850_v59 = vadd.f32 %v8418_v38, %v2814_v32  ;;  %6641 = vmatmul.msk.f32.gmra.mxu3 %vm2897_vm4, %v8709_v63 }
 0x308   : > { %v3162_v60 = vpop.f32.mrf.mxu1 }
 0x309   : > { %v2882_v52 = vmax.f32 %v2850_v59, 0.0  ;;  %v10523_v59 = vld [vmem:[#allocation68_spill] sm:$0xff] }
 0x30a   : > { %v2477_v1 = vpop.f32.mrf.mxu3  ;;  %v8715_v22 = vld [vmem:[#allocation3 + $0xd9] sm:$0xff]  ;;  %v2758_v45 = vpop.f32.mrf.mxu0  ;;  %v2260_v10 = vadd.f32 %v10523_v59, %v1981_v40 }
 0x30b   : > { %10520 = vst [vmem:[#allocation74_spill] sm:$0xff] %v8715_v22  ;;  %v8717_v46 = vld [vmem:[#allocation3 + $0xd8] sm:$0xff]  ;;  %v2537_v16 = vadd.f32 %v2477_v1, %v2259_v50 }
 0x30c   : > { %2961 = vst.msk [vmem:[#allocation3 + $0xe1] sm:$0xff] %vm2897_vm4, %v2882_v52  ;;  %6592 = vmatmul.msk.f32.gmra.mxu1 %vm2897_vm4, %v8715_v22 }
 0x30d   : > { %6624 = vmatmul.msk.f32.gmra.mxu2 %vm2897_vm4, %v8717_v46  ;;  %v2815_v26 = vadd.f32 %v2755_v54, %v2537_v16  ;;  %6675 = vmatmul.msk.f32.gmra.mxu0 %vm2897_vm4, %v8483_v21 }
 0x30f   : > { %v3371_v3 = vpop.f32.mrf.mxu2  ;;  %v2851_v30 = vadd.f32 %v8418_v38, %v2815_v26  ;;  %6642 = vmatmul.msk.f32.gmra.mxu3 %vm2897_vm4, %v8728_v2 }
 0x310   : > { %v8731_v8 = vadd.f32 %v3371_v3, %v3162_v60  ;;  %v3165_v32 = vpop.f32.mrf.mxu1  ;;  %v10525_v60 = vld [vmem:[#allocation36_spill] sm:$0xff] }
 0x311   : > { %v2883_v50 = vmax.f32 %v2851_v30, 0.0  ;;  %v1982_v36 = vadd.f32 %v10526_v19, %v10525_v60  ;;  %v8749_v3 = vld [vmem:[#allocation3 + $0x32] sm:$0xff] }
 0x312   : > { %v2480_v52 = vpop.f32.mrf.mxu3  ;;  %v2761_v21 = vpop.f32.mrf.mxu0  ;;  %v10530_v19 = vld [vmem:[#allocation60_spill] sm:$0xff] }
 0x313   : > { %v8736_v1 = vld [vmem:[#allocation3 + $0xe1] sm:$0xff]  ;;  %2962 = vst.msk [vmem:[#allocation3 + $0xf1] sm:$0xff] %vm2897_vm4, %v2883_v50  ;;  %v2538_v16 = vadd.f32 %v2480_v52, %v2260_v10 }
 0x314   : > { %10524 = vst [vmem:[#allocation33_spill] sm:$0xff] %v8736_v1  ;;  %v8738_v54 = vld [vmem:[#allocation3 + $0xe0] sm:$0xff]  ;;  %6593 = vmatmul.msk.f32.gmra.mxu1 %vm2897_vm4, %v8736_v1  ;;  %v10527_v50 = vld [vmem:[#allocation55_spill] sm:$0xff] }
 0x315   : > { %6625 = vmatmul.msk.f32.gmra.mxu2 %vm2897_vm4, %v8738_v54  ;;  %v2816_v40 = vadd.f32 %v2758_v45, %v2538_v16  ;;  %6676 = vmatmul.msk.f32.gmra.mxu0 %vm2897_vm4, %v8498_v43  ;;  %v2261_v52 = vadd.f32 %v10527_v50, %v1982_v36 }
 0x317   : > { %v3374_v26 = vpop.f32.mrf.mxu2  ;;  %v2852_v30 = vadd.f32 %v8418_v38, %v2816_v40  ;;  %6643 = vmatmul.msk.f32.gmra.mxu3 %vm2897_vm4, %v8749_v3 }
 0x318   : > { %v8752_v59 = vadd.f32 %v3374_v26, %v3165_v32  ;;  %v3168_v10 = vpop.f32.mrf.mxu1  ;;  %v10529_v32 = vld [vmem:[#allocation37_spill] sm:$0xff] }
 0x319   : > { %v2884_v1 = vmax.f32 %v2852_v30, 0.0  ;;  %v1983_v40 = vadd.f32 %v10530_v19, %v10529_v32  ;;  %v8770_v30 = vld [vmem:[#allocation3 + $0x3a] sm:$0xff] }
 0x31a   : > { %v2483_v22 = vpop.f32.mrf.mxu3  ;;  %v8757_v60 = vld [vmem:[#allocation3 + $0xf1] sm:$0xff]  ;;  %v2764_v43 = vpop.f32.mrf.mxu0  ;;  %v10533_v19 = vld [vmem:[#allocation70_spill] sm:$0xff] }
 0x31b   : > { %10528 = vst [vmem:[#allocation76_spill] sm:$0xff] %v8757_v60  ;;  %v8759_v45 = vld [vmem:[#allocation3 + $0xf0] sm:$0xff]  ;;  %v2539_v16 = vadd.f32 %v2483_v22, %v2261_v52  ;;  %v2262_v52 = vadd.f32 %v8453_v29, %v1983_v40 }
 0x31c   : > { %2963 = vst.msk [vmem:[#allocation3 + $0xf9] sm:$0xff] %vm2897_vm4, %v2884_v1  ;;  %6594 = vmatmul.msk.f32.gmra.mxu1 %vm2897_vm4, %v8757_v60 }
 0x31d   : > { %6626 = vmatmul.msk.f32.gmra.mxu2 %vm2897_vm4, %v8759_v45  ;;  %v2817_v36 = vadd.f32 %v2761_v21, %v2539_v16  ;;  %6677 = vmatmul.msk.f32.gmra.mxu0 %vm2897_vm4, %v8513_v61 }
 0x31f   : > { %v3377_v26 = vpop.f32.mrf.mxu2  ;;  %v2853_v1 = vadd.f32 %v8418_v38, %v2817_v36  ;;  %6644 = vmatmul.msk.f32.gmra.mxu3 %vm2897_vm4, %v8770_v30 }
 0x320   : > { %v8773_v50 = vadd.f32 %v3377_v26, %v3168_v10  ;;  %v3171_v22 = vpop.f32.mrf.mxu1  ;;  %v10532_v10 = vld [vmem:[#allocation49_spill] sm:$0xff]  ;;  %v8791_v26 = vld [vmem:[#allocation3 + $0x4a] sm:$0xff] }
 0x321   : > { %v2885_v60 = vmax.f32 %v2853_v1, 0.0  ;;  %v1984_v36 = vadd.f32 %v10533_v19, %v10532_v10 }
 0x322   : > { %v2486_v34 = vpop.f32.mrf.mxu3  ;;  %v2767_v61 = vpop.f32.mrf.mxu0 }
 0x323   : > { %v8778_v32 = vld [vmem:[#allocation3 + $0xf9] sm:$0xff]  ;;  %2964 = vst.msk [vmem:[#allocation3 + $0x109] sm:$0xff] %vm2897_vm4, %v2885_v60  ;;  %v2540_v16 = vadd.f32 %v2486_v34, %v2262_v52  ;;  %v10534_v52 = vld [vmem:[#allocation64_spill] sm:$0xff] }
 0x324   : > { %10531 = vst [vmem:[#allocation75_spill] sm:$0xff] %v8778_v32  ;;  %v8780_v21 = vld [vmem:[#allocation3 + $0xf8] sm:$0xff]  ;;  %6595 = vmatmul.msk.f32.gmra.mxu1 %vm2897_vm4, %v8778_v32  ;;  %v2263_v32 = vadd.f32 %v10534_v52, %v1984_v36 }
 0x325   : > { %6627 = vmatmul.msk.f32.gmra.mxu2 %vm2897_vm4, %v8780_v21  ;;  %v2818_v29 = vadd.f32 %v2764_v43, %v2540_v16  ;;  %6678 = vmatmul.msk.f32.gmra.mxu0 %vm2897_vm4, %v8529_v28 }
 0x327   : > { %v3380_v40 = vpop.f32.mrf.mxu2  ;;  %v2854_v60 = vadd.f32 %v8418_v38, %v2818_v29  ;;  %6645 = vmatmul.msk.f32.gmra.mxu3 %vm2897_vm4, %v8791_v26 }
 0x328   : > { %v8794_v1 = vadd.f32 %v3380_v40, %v3171_v22  ;;  %v3174_v34 = vpop.f32.mrf.mxu1  ;;  %v10536_v22 = vld [vmem:[#allocation54_spill] sm:$0xff]  ;;  %v8812_v40 = vld [vmem:[#allocation3 + $0x52] sm:$0xff] }
 0x329   : > { %v2886_v0 = vmax.f32 %v2854_v60, 0.0  ;;  %v1985_v19 = vadd.f32 %v8477_v7, %v10536_v22 }
 0x32a   : > { %v2489_v41 = vpop.f32.mrf.mxu3  ;;  %v8799_v10 = vld [vmem:[#allocation3 + $0x109] sm:$0xff]  ;;  %v2770_v28 = vpop.f32.mrf.mxu0 }
 0x32b   : > { %10535 = vst [vmem:[#allocation78_spill] sm:$0xff] %v8799_v10  ;;  %v8801_v43 = vld [vmem:[#allocation3 + $0x108] sm:$0xff]  ;;  %v2541_v16 = vadd.f32 %v2489_v41, %v2263_v32  ;;  %v2264_v32 = vadd.f32 %v8490_v14, %v1985_v19 }
 0x32c   : > { %2965 = vst.msk [vmem:[#allocation3 + $0x111] sm:$0xff] %vm2897_vm4, %v2886_v0  ;;  %6596 = vmatmul.msk.f32.gmra.mxu1 %vm2897_vm4, %v8799_v10 }
 0x32d   : > { %6628 = vmatmul.msk.f32.gmra.mxu2 %vm2897_vm4, %v8801_v43  ;;  %v2819_v36 = vadd.f32 %v2767_v61, %v2541_v16  ;;  %6679 = vmatmul.msk.f32.gmra.mxu0 %vm2897_vm4, %v8546_v23 }
 0x32f   : > { %v3383_v29 = vpop.f32.mrf.mxu2  ;;  %v2855_v0 = vadd.f32 %v8418_v38, %v2819_v36  ;;  %6646 = vmatmul.msk.f32.gmra.mxu3 %vm2897_vm4, %v8812_v40  ;;  %v8833_v36 = vld [vmem:[#allocation3 + $0x62] sm:$0xff] }
 0x330   : > { %v8815_v60 = vadd.f32 %v3383_v29, %v3174_v34  ;;  %v3177_v41 = vpop.f32.mrf.mxu1  ;;  %v10538_v34 = vld [vmem:[#allocation65_spill] sm:$0xff] }
 0x331   : > { %v2887_v52 = vmax.f32 %v2855_v0, 0.0  ;;  %v1986_v22 = vadd.f32 %v8496_v17, %v10538_v34  ;;  %v10541_v34 = vld [vmem:[#allocation62_spill] sm:$0xff] }
 0x332   : > { %v2492_v10 = vpop.f32.mrf.mxu3  ;;  %v2773_v23 = vpop.f32.mrf.mxu0 }
 0x333   : > { %v8820_v7 = vld [vmem:[#allocation3 + $0x111] sm:$0xff]  ;;  %2966 = vst.msk [vmem:[#allocation3 + $0x121] sm:$0xff] %vm2897_vm4, %v2887_v52  ;;  %v2542_v16 = vadd.f32 %v2492_v10, %v2264_v32  ;;  %v2265_v32 = vadd.f32 %v8505_v33, %v1986_v22 }
 0x334   : > { %10537 = vst [vmem:[#allocation38_spill] sm:$0xff] %v8820_v7  ;;  %v8822_v61 = vld [vmem:[#allocation3 + $0x110] sm:$0xff]  ;;  %6597 = vmatmul.msk.f32.gmra.mxu1 %vm2897_vm4, %v8820_v7 }
 0x335   : > { %6629 = vmatmul.msk.f32.gmra.mxu2 %vm2897_vm4, %v8822_v61  ;;  %v2820_v14 = vadd.f32 %v2770_v28, %v2542_v16  ;;  %6680 = vmatmul.msk.f32.gmra.mxu0 %vm2897_vm4, %v8561_v55 }
 0x337   : > { %v3386_v19 = vpop.f32.mrf.mxu2  ;;  %v2856_v29 = vadd.f32 %v8418_v38, %v2820_v14  ;;  %6647 = vmatmul.msk.f32.gmra.mxu3 %vm2897_vm4, %v8833_v36 }
 0x338   : > { %v8836_v0 = vadd.f32 %v3386_v19, %v3177_v41  ;;  %v3180_v10 = vpop.f32.mrf.mxu1  ;;  %v10540_v41 = vld [vmem:[#allocation41_spill] sm:$0xff]  ;;  %v8854_v19 = vld [vmem:[#allocation3 + $0x6a] sm:$0xff] }
 0x339   : > { %v2888_v52 = vmax.f32 %v2856_v29, 0.0  ;;  %v1987_v14 = vadd.f32 %v10541_v34, %v10540_v41 }
 0x33a   : > { %v2495_v7 = vpop.f32.mrf.mxu3  ;;  %v8841_v17 = vld [vmem:[#allocation3 + $0x121] sm:$0xff]  ;;  %v2776_v55 = vpop.f32.mrf.mxu0 }
 0x33b   : > { %10539 = vst [vmem:[#allocation81_spill] sm:$0xff] %v8841_v17  ;;  %v8843_v28 = vld [vmem:[#allocation3 + $0x120] sm:$0xff]  ;;  %v2543_v16 = vadd.f32 %v2495_v7, %v2265_v32  ;;  %v2266_v32 = vadd.f32 %v8526_v11, %v1987_v14 }
 0x33c   : > { %2967 = vst.msk [vmem:[#allocation3 + $0x129] sm:$0xff] %vm2897_vm4, %v2888_v52  ;;  %6598 = vmatmul.msk.f32.gmra.mxu1 %vm2897_vm4, %v8841_v17 }
 0x33d   : > { %6630 = vmatmul.msk.f32.gmra.mxu2 %vm2897_vm4, %v8843_v28  ;;  %v2821_v33 = vadd.f32 %v2773_v23, %v2543_v16  ;;  %6681 = vmatmul.msk.f32.gmra.mxu0 %vm2897_vm4, %v8580_v62 }
 0x33f   : > { %v3389_v22 = vpop.f32.mrf.mxu2  ;;  %v2857_v29 = vadd.f32 %v8418_v38, %v2821_v33  ;;  %6648 = vmatmul.msk.f32.gmra.mxu3 %vm2897_vm4, %v8854_v19  ;;  %v8875_v33 = vld [vmem:[#allocation3 + $0x7a] sm:$0xff] }
 0x340   : > { %v8857_v52 = vadd.f32 %v3389_v22, %v3180_v10  ;;  %v3183_v7 = vpop.f32.mrf.mxu1  ;;  %v10543_v10 = vld [vmem:[#allocation42_spill] sm:$0xff] }
 0x341   : > { %v2889_v17 = vmax.f32 %v2857_v29, 0.0  ;;  %v1988_v34 = vadd.f32 %v8535_v24, %v10543_v10 }
 0x342   : > { %v2498_v47 = vpop.f32.mrf.mxu3  ;;  %v2779_v62 = vpop.f32.mrf.mxu0 }
 0x343   : > { %v8862_v41 = vld [vmem:[#allocation3 + $0x129] sm:$0xff]  ;;  %2968 = vst.msk [vmem:[#allocation3 + $0x139] sm:$0xff] %vm2897_vm4, %v2889_v17  ;;  %v2544_v16 = vadd.f32 %v2498_v47, %v2266_v32  ;;  %v2267_v29 = vadd.f32 %v8544_v51, %v1988_v34 }
 0x344   : > { %10542 = vst [vmem:[#allocation80_spill] sm:$0xff] %v8862_v41  ;;  %v8864_v23 = vld [vmem:[#allocation3 + $0x128] sm:$0xff]  ;;  %6599 = vmatmul.msk.f32.gmra.mxu1 %vm2897_vm4, %v8862_v41 }
 0x345   : > { %6631 = vmatmul.msk.f32.gmra.mxu2 %vm2897_vm4, %v8864_v23  ;;  %v2822_v11 = vadd.f32 %v2776_v55, %v2544_v16  ;;  %6682 = vmatmul.msk.f32.gmra.mxu0 %vm2897_vm4, %v8601_v13 }
 0x347   : > { %v3392_v14 = vpop.f32.mrf.mxu2  ;;  %v2858_v17 = vadd.f32 %v8418_v38, %v2822_v11  ;;  %6649 = vmatmul.msk.f32.gmra.mxu3 %vm2897_vm4, %v8875_v33  ;;  %v8896_v11 = vld [vmem:[#allocation3 + $0x82] sm:$0xff] }
 0x348   : > { %v8878_v22 = vadd.f32 %v3392_v14, %v3183_v7  ;;  %v3186_v47 = vpop.f32.mrf.mxu1  ;;  %v10545_v7 = vld [vmem:[#allocation44_spill] sm:$0xff] }
 0x349   : > { %v2890_v32 = vmax.f32 %v2858_v17, 0.0  ;;  %v1989_v10 = vadd.f32 %v8554_v49, %v10545_v7 }
 0x34a   : > { %v2501_v41 = vpop.f32.mrf.mxu3  ;;  %v8883_v24 = vld [vmem:[#allocation3 + $0x139] sm:$0xff]  ;;  %v2782_v13 = vpop.f32.mrf.mxu0 }
 0x34b   : > { %10544 = vst [vmem:[#allocation45_spill] sm:$0xff] %v8883_v24  ;;  %v8885_v55 = vld [vmem:[#allocation3 + $0x138] sm:$0xff]  ;;  %v2545_v16 = vadd.f32 %v2501_v41, %v2267_v29  ;;  %v2268_v29 = vadd.f32 %v8567_v42, %v1989_v10 }
 0x34c   : > { %2969 = vst.msk [vmem:[#allocation3 + $0x141] sm:$0xff] %vm2897_vm4, %v2890_v32  ;;  %6600 = vmatmul.msk.f32.gmra.mxu1 %vm2897_vm4, %v8883_v24 }
 0x34d   : > { %6632 = vmatmul.msk.f32.gmra.mxu2 %vm2897_vm4, %v8885_v55  ;;  %v2823_v51 = vadd.f32 %v2779_v62, %v2545_v16  ;;  %6683 = vmatmul.msk.f32.gmra.mxu0 %vm2897_vm4, %v8620_v27 }
 0x34f   : > { %v3395_v34 = vpop.f32.mrf.mxu2  ;;  %v2859_v14 = vadd.f32 %v8418_v38, %v2823_v51  ;;  %6650 = vmatmul.msk.f32.gmra.mxu3 %vm2897_vm4, %v8896_v11  ;;  %v8917_v51 = vld [vmem:[#allocation3 + $0x92] sm:$0xff] }
 0x350   : > { %v8899_v17 = vadd.f32 %v3395_v34, %v3186_v47  ;;  %v3189_v41 = vpop.f32.mrf.mxu1  ;;  %v10547_v47 = vld [vmem:[#allocation56_spill] sm:$0xff] }
 0x351   : > { %v2891_v32 = vmax.f32 %v2859_v14, 0.0  ;;  %v1990_v7 = vadd.f32 %v8575_v57, %v10547_v47 }
 0x352   : > { %v2504_v24 = vpop.f32.mrf.mxu3  ;;  %v2785_v27 = vpop.f32.mrf.mxu0 }
 0x353   : > { %v8904_v49 = vld [vmem:[#allocation3 + $0x141] sm:$0xff]  ;;  %2970 = vst.msk [vmem:[#allocation3 + $0x151] sm:$0xff] %vm2897_vm4, %v2891_v32  ;;  %v2546_v16 = vadd.f32 %v2504_v24, %v2268_v29  ;;  %v2269_v29 = vadd.f32 %v8589_v20, %v1990_v7 }
 0x354   : > { %10546 = vst [vmem:[#allocation82_spill] sm:$0xff] %v8904_v49  ;;  %v8906_v62 = vld [vmem:[#allocation3 + $0x140] sm:$0xff]  ;;  %6601 = vmatmul.msk.f32.gmra.mxu1 %vm2897_vm4, %v8904_v49 }
 0x355   : > { %6633 = vmatmul.msk.f32.gmra.mxu2 %vm2897_vm4, %v8906_v62  ;;  %v2824_v42 = vadd.f32 %v2782_v13, %v2546_v16  ;;  %6684 = vmatmul.msk.f32.gmra.mxu0 %vm2897_vm4, %v8639_v12  ;;  %v6770_v20 = vld [vmem:[%s10240_s3 + $0x30] sm:$0xff] }
 0x356   : > { %4707 = vmatpush.msra.mxu3 %v6770_v20 }
 0x357   : > { %v3398_v10 = vpop.f32.mrf.mxu2  ;;  %v2860_v34 = vadd.f32 %v8418_v38, %v2824_v42  ;;  %6651 = vmatmul.msk.f32.gmra.mxu3 %vm2897_vm4, %v8917_v51 }
 0x358   : > { %v8920_v14 = vadd.f32 %v3398_v10, %v3189_v41  ;;  %v3192_v24 = vpop.f32.mrf.mxu1  ;;  %v10549_v41 = vld [vmem:[#allocation61_spill] sm:$0xff]  ;;  %v5423_v10 = vld [vmem:[%s10242_s5] sm:$0xf] }
 0x359   : > { %v2892_v32 = vmax.f32 %v2860_v34, 0.0  ;;  %v1991_v47 = vadd.f32 %v8597_v18, %v10549_v41  ;;  %v6803_v34 = vld [vmem:[%s10240_s3 + $0x38] sm:$0xff]  ;;  %6869 = vmatpush.msk.msra.mxu2 %vm553_vm0, %v5423_v10  ;;  %vm5837_vm0 = vcmask 261315  }
 0x35a   : > { %v2507_v49 = vpop.f32.mrf.mxu3  ;;  %v8925_v57 = vld [vmem:[#allocation3 + $0x151] sm:$0xff]  ;;  %v2788_v12 = vpop.f32.mrf.mxu0  ;;  %4982 = vmatpush.msra.mxu0 %v6803_v34 }
 0x35b   : > { %10548 = vst [vmem:[#allocation83_spill] sm:$0xff] %v8925_v57  ;;  %v8927_v13 = vld [vmem:[#allocation3 + $0x150] sm:$0xff]  ;;  %v2547_v16 = vadd.f32 %v2507_v49, %v2269_v29  ;;  %v8941_v49 = vld [vmem:[#allocation3 + $0x9a] sm:$0xff] }
 0x35c   : > { %2971 = vst.msk [vmem:[#allocation3 + $0x159] sm:$0xff] %vm2897_vm4, %v2892_v32  ;;  %6602 = vmatmul.msk.f32.gmra.mxu1 %vm2897_vm4, %v8925_v57  ;;  %v8972_v34 = vld [vmem:[#allocation3 + $0xaa] sm:$0xff] }
 0x35d   : > { %6634 = vmatmul.msk.f32.gmra.mxu2 %vm2897_vm4, %v8927_v13  ;;  %v2825_v7 = vadd.f32 %v2785_v27, %v2547_v16  ;;  %6685 = vmatmul.msk.f32.gmra.mxu0 %vm2897_vm4, %v8656_v35  ;;  %v2270_v35 = vadd.f32 %v8615_v58, %v1991_v47  ;;  %v6836_v58 = vld [vmem:[%s10240_s3 + $0x40] sm:$0xff]  ;;  %v10551_v47 = vld [vmem:[#allocation50_spill] sm:$0xff] }
 0x35e   : > { %5257 = vmatpush.msra.mxu1 %v6836_v58 }
 0x35f   : > { %v3401_v42 = vpop.f32.mrf.mxu2  ;;  %v2861_v29 = vadd.f32 %v8418_v38, %v2825_v7  ;;  %6652 = vmatmul.msk.f32.gmra.mxu3 %vm2897_vm4, %v8941_v49  ;;  %v1992_v7 = vadd.f32 %v8627_v48, %v10551_v47 }
 0x360   : > { %v8950_v32 = vadd.f32 %v3401_v42, %v3192_v24  ;;  %v3195_v18 = vpop.f32.mrf.mxu1 }
 0x361   : > { %v2893_v27 = vmax.f32 %v2861_v29, 0.0  ;;  %v6936_v29 = vld [vmem:[%s10239_s2] ss:$0 sm:$0xff]  ;;  %v2271_v48 = vadd.f32 %v8635_v6, %v1992_v7 }
 0x362   : > { %v2510_v16 = vpop.f32.mrf.mxu3  ;;  %v2791_v38 = vpop.f32.mrf.mxu0 }
 0x363   : > { %v8956_v20 = vld [vmem:[#allocation3 + $0x159] sm:$0xff]  ;;  %2972 = vst.msk [vmem:[#allocation3 + $0x169] sm:$0xff] %vm2897_vm4, %v2893_v27  ;;  %v2548_v24 = vadd.f32 %v2510_v16, %v2270_v35 }
 0x364   : > { %10550 = vst [vmem:[#allocation52_spill] sm:$0xff] %v8956_v20  ;;  %v8958_v41 = vld [vmem:[#allocation3 + $0x158] sm:$0xff]  ;;  %6603 = vmatmul.msk.f32.gmra.mxu1 %vm2897_vm4, %v8956_v20 }
 0x365   : > { %6635 = vmatmul.msk.f32.gmra.mxu2 %vm2897_vm4, %v8958_v41  ;;  %v2826_v42 = vadd.f32 %v2788_v12, %v2548_v24  ;;  %6686 = vmatmul.msk.f32.gmra.mxu0 %vm2897_vm4, %v8676_v39 }
 0x367   : > { %v3404_v10 = vpop.f32.mrf.mxu2  ;;  %v2862_v35 = vadd.f32 %v6936_v29, %v2826_v42  ;;  %6653 = vmatmul.msk.f32.gmra.mxu3 %vm2897_vm4, %v8972_v34 }
 0x368   : > { %v8977_v27 = vadd.f32 %v3404_v10, %v3195_v18  ;;  %v3198_v16 = vpop.f32.mrf.mxu1  ;;  %v10554_v18 = vld [vmem:[#allocation53_spill] sm:$0xff] }
 0x369   : > { %v2894_v12 = vmax.f32 %v2862_v35, 0.0  ;;  %v1993_v42 = vadd.f32 %v8648_v44, %v10554_v18  ;;  %v8995_v10 = vld [vmem:[#allocation3 + $0xb2] sm:$0xff] }
 0x36a   : > { %10552 = vst [vmem:[#allocation59_spill] sm:$0xff] %v8977_v27  ;;  %v2513_v24 = vpop.f32.mrf.mxu3  ;;  %v8982_v58 = vld [vmem:[#allocation3 + $0x169] sm:$0xff]  ;;  %v2794_v47 = vpop.f32.mrf.mxu0 }
 0x36b   : > { %10553 = vst [vmem:[#allocation66_spill] sm:$0xff] %v8982_v58  ;;  %v8984_v39 = vld [vmem:[#allocation3 + $0x168] sm:$0xff]  ;;  %v2549_v20 = vadd.f32 %v2513_v24, %v2271_v48  ;;  %v2272_v24 = vadd.f32 %v8663_v31, %v1993_v42 }
 0x36c   : > { %2973 = vst.msk [vmem:[#allocation3 + $0x171] sm:$0xff] %vm2897_vm4, %v2894_v12  ;;  %6604 = vmatmul.msk.f32.gmra.mxu1 %vm2897_vm4, %v8982_v58 }
 0x36d   : > { %6636 = vmatmul.msk.f32.gmra.mxu2 %vm2897_vm4, %v8984_v39  ;;  %v2827_v6 = vadd.f32 %v2791_v38, %v2549_v20  ;;  %6687 = vmatmul.msk.f32.gmra.mxu0 %vm2897_vm4, %v8696_v15 }
 0x36f   : > { %v3407_v7 = vpop.f32.mrf.mxu2  ;;  %v2863_v35 = vadd.f32 %v6936_v29, %v2827_v6  ;;  %6654 = vmatmul.msk.f32.gmra.mxu3 %vm2897_vm4, %v8995_v10 }
 0x370   : > { %v8997_v12 = vadd.f32 %v3407_v7, %v3198_v16  ;;  %v9013_v16 = vld [vmem:[#allocation3 + $0xc2] sm:$0xff] }
 0x371   : > { %v3201_v48 = vpop.f32.mrf.mxu1  ;;  %v2895_v58 = vmax.f32 %v2863_v35, 0.0 }
 0x372   : > { %v2516_v57 = vpop.f32.mrf.mxu3  ;;  %v3883_v15 = vpop.f32.mrf.mxu0 }
 0x373   : > { %v9002_v27 = vld [vmem:[#allocation3 + $0x171] sm:$0xff]  ;;  %2974 = vst.msk [vmem:[#allocation3 + $0x181] sm:$0xff] %vm2897_vm4, %v2895_v58  ;;  %v2550_v20 = vadd.f32 %v2516_v57, %v2272_v24  ;;  %v3366_v58 = vadd.f32 %v8683_v56, %v8669_v5 }
 0x374   : > { %v9004_v44 = vld [vmem:[#allocation3 + $0x170] sm:$0xff]  ;;  %6605 = vmatmul.msk.f32.gmra.mxu1 %vm2897_vm4, %v9002_v27 }
 0x375   : > { %6637 = vmatmul.msk.f32.gmra.mxu2 %vm2897_vm4, %v9004_v44  ;;  %v2828_v38 = vadd.f32 %v2794_v47, %v2550_v20  ;;  %6688 = vmatmul.msk.f32.gmra.mxu0 %vm2897_vm4, %v8717_v46  ;;  %v6937_v46 = vld [vmem:[#allocation3 + $0x19] sm:$0xff]  ;;  %v9029_v24 = vld [vmem:[#allocation3 + $0xca] sm:$0xff]  ;;  %v3369_v20 = vadd.f32 %v8707_v9, %v8691_v37 }
 0x377   : > { %v2864_v18 = vadd.f32 %v6936_v29, %v2828_v38  ;;  %6655 = vmatmul.msk.f32.gmra.mxu3 %vm2897_vm4, %v9013_v16 }
 0x378   : > { %v3410_v31 = vpop.f32.mrf.mxu2 }
 0x379   : > { %v9015_v42 = vadd.f32 %v3410_v31, %v3201_v48  ;;  %v3204_v57 = vpop.f32.mrf.mxu1  ;;  %v2896_v6 = vmax.f32 %v2864_v18, 0.0 }
 0x37a   : > { %v3608_v7 = vpop.f32.mrf.mxu3  ;;  %v3886_v47 = vpop.f32.mrf.mxu0 }
 0x37b   : > { %2975 = vst.msk [vmem:[#allocation3 + $0x189] sm:$0xff] %vm2897_vm4, %v2896_v6  ;;  %v3704_v35 = vadd.f32 %v3608_v7, %v3366_v58 }
 0x37c   : > { %6705 = vmatmul.msk.f32.vlgmr.msrb.gmra.mxu1 %vm2897_vm4, %v6937_v46 }
 0x37d   : > { %6738 = vmatmul.msk.f32.vlgmr.msrb.gmra.mxu2 %vm2897_vm4, %v8709_v63  ;;  %v9025_v29 = vadd.f32 %v3883_v15, %v3704_v35  ;;  %6689 = vmatmul.msk.f32.gmra.mxu0 %vm2897_vm4, %v8738_v54  ;;  %v6938_v15 = vld [vmem:[#allocation3 + $0x21] sm:$0xff]  ;;  %v6939_v35 = vld [vmem:[#allocation3 + $0x31] sm:$0xff] }
 0x37f   : > { %6656 = vmatmul.msk.f32.gmra.mxu3 %vm2897_vm4, %v9029_v24 }
 0x380   : > { %v3413_v48 = vpop.f32.mrf.mxu2 }
 0x381   : > { %v9031_v5 = vadd.f32 %v3413_v48, %v3204_v57  ;;  %v3207_v56 = vpop.f32.mrf.mxu1  ;;  %v9044_v57 = vld [vmem:[#allocation3 + $0xda] sm:$0xff] }
 0x382   : > { %v3611_v38 = vpop.f32.mrf.mxu3  ;;  %v3889_v31 = vpop.f32.mrf.mxu0 }
 0x383   : > { %v3705_v63 = vadd.f32 %v3611_v38, %v3369_v20  ;;  %v6940_v38 = vld [vmem:[#allocation3 + $0x39] sm:$0xff] }
 0x384   : > { %6706 = vmatmul.msk.f32.gmra.mxu1 %vm2897_vm4, %v6938_v15 }
 0x385   : > { %6739 = vmatmul.msk.f32.gmra.mxu2 %vm2897_vm4, %v8728_v2  ;;  %v9040_v54 = vadd.f32 %v3886_v47, %v3705_v63  ;;  %6690 = vmatmul.msk.f32.gmra.mxu0 %vm2897_vm4, %v8759_v45  ;;  %v9058_v47 = vld [vmem:[#allocation3 + $0xe2] sm:$0xff] }
 0x387   : > { %6657 = vmatmul.msk.f32.gmra.mxu3 %vm2897_vm4, %v9044_v57 }
 0x388   : > { %v3416_v18 = vpop.f32.mrf.mxu2 }
 0x389   : > { %v9046_v58 = vadd.f32 %v3416_v18, %v3207_v56  ;;  %v3210_v37 = vpop.f32.mrf.mxu1 }
 0x38a   : > { %v3614_v9 = vpop.f32.mrf.mxu3  ;;  %v3892_v6 = vpop.f32.mrf.mxu0 }
 0x38b   : > { %v3706_v7 = vadd.f32 %v3614_v9, %v8731_v8  ;;  %v6941_v9 = vld [vmem:[#allocation3 + $0x49] sm:$0xff] }
 0x38c   : > { %6707 = vmatmul.msk.f32.gmra.mxu1 %vm2897_vm4, %v6939_v35 }
 0x38d   : > { %6740 = vmatmul.msk.f32.gmra.mxu2 %vm2897_vm4, %v8749_v3  ;;  %v9054_v2 = vadd.f32 %v3889_v31, %v3706_v7  ;;  %6691 = vmatmul.msk.f32.gmra.mxu0 %vm2897_vm4, %v8780_v21  ;;  %v9072_v31 = vld [vmem:[#allocation3 + $0xf2] sm:$0xff] }
 0x38f   : > { %6658 = vmatmul.msk.f32.gmra.mxu3 %vm2897_vm4, %v9058_v47 }
 0x390   : > { %v3419_v45 = vpop.f32.mrf.mxu2 }
 0x391   : > { %v9060_v46 = vadd.f32 %v3419_v45, %v3210_v37  ;;  %v3213_v8 = vpop.f32.mrf.mxu1 }
 0x392   : > { %v3617_v48 = vpop.f32.mrf.mxu3  ;;  %v3895_v56 = vpop.f32.mrf.mxu0 }
 0x393   : > { %v3707_v20 = vadd.f32 %v3617_v48, %v8752_v59  ;;  %v6942_v48 = vld [vmem:[#allocation3 + $0x51] sm:$0xff] }
 0x394   : > { %6708 = vmatmul.msk.f32.gmra.mxu1 %vm2897_vm4, %v6940_v38 }
 0x395   : > { %6741 = vmatmul.msk.f32.gmra.mxu2 %vm2897_vm4, %v8770_v30  ;;  %v9068_v3 = vadd.f32 %v3892_v6, %v3707_v20  ;;  %6692 = vmatmul.msk.f32.gmra.mxu0 %vm2897_vm4, %v8801_v43  ;;  %v9086_v6 = vld [vmem:[#allocation3 + $0xfa] sm:$0xff] }
 0x397   : > { %6659 = vmatmul.msk.f32.gmra.mxu3 %vm2897_vm4, %v9072_v31 }
 0x398   : > { %v3422_v21 = vpop.f32.mrf.mxu2 }
 0x399   : > { %v9074_v63 = vadd.f32 %v3422_v21, %v3213_v8  ;;  %v3216_v59 = vpop.f32.mrf.mxu1 }
 0x39a   : > { %v3620_v15 = vpop.f32.mrf.mxu3  ;;  %v3898_v18 = vpop.f32.mrf.mxu0 }
 0x39b   : > { %v3708_v37 = vadd.f32 %v3620_v15, %v8773_v50  ;;  %v6943_v15 = vld [vmem:[#allocation3 + $0x61] sm:$0xff] }
 0x39c   : > { %6709 = vmatmul.msk.f32.gmra.mxu1 %vm2897_vm4, %v6941_v9 }
 0x39d   : > { %6742 = vmatmul.msk.f32.gmra.mxu2 %vm2897_vm4, %v8791_v26  ;;  %v9082_v30 = vadd.f32 %v3895_v56, %v3708_v37  ;;  %6693 = vmatmul.msk.f32.gmra.mxu0 %vm2897_vm4, %v8822_v61  ;;  %v9100_v56 = vld [vmem:[#allocation3 + $0x10a] sm:$0xff] }
 0x39f   : > { %6660 = vmatmul.msk.f32.gmra.mxu3 %vm2897_vm4, %v9086_v6 }
 0x3a0   : > { %v3425_v43 = vpop.f32.mrf.mxu2 }
 0x3a1   : > { %v9088_v7 = vadd.f32 %v3425_v43, %v3216_v59  ;;  %v3219_v50 = vpop.f32.mrf.mxu1 }
 0x3a2   : > { %v3623_v35 = vpop.f32.mrf.mxu3  ;;  %v3901_v45 = vpop.f32.mrf.mxu0 }
 0x3a3   : > { %v3709_v8 = vadd.f32 %v3623_v35, %v8794_v1  ;;  %v6944_v35 = vld [vmem:[#allocation3 + $0x69] sm:$0xff] }
 0x3a4   : > { %6710 = vmatmul.msk.f32.gmra.mxu1 %vm2897_vm4, %v6942_v48 }
 0x3a5   : > { %6743 = vmatmul.msk.f32.gmra.mxu2 %vm2897_vm4, %v8812_v40  ;;  %v9096_v26 = vadd.f32 %v3898_v18, %v3709_v8  ;;  %6694 = vmatmul.msk.f32.gmra.mxu0 %vm2897_vm4, %v8843_v28  ;;  %v9114_v18 = vld [vmem:[#allocation3 + $0x112] sm:$0xff] }
 0x3a7   : > { %6661 = vmatmul.msk.f32.gmra.mxu3 %vm2897_vm4, %v9100_v56 }
 0x3a8   : > { %v3428_v61 = vpop.f32.mrf.mxu2 }
 0x3a9   : > { %v9102_v20 = vadd.f32 %v3428_v61, %v3219_v50  ;;  %v3222_v1 = vpop.f32.mrf.mxu1 }
 0x3aa   : > { %v3626_v38 = vpop.f32.mrf.mxu3  ;;  %v3904_v21 = vpop.f32.mrf.mxu0 }
 0x3ab   : > { %v3710_v59 = vadd.f32 %v3626_v38, %v8815_v60  ;;  %v6945_v38 = vld [vmem:[#allocation3 + $0x79] sm:$0xff] }
 0x3ac   : > { %6711 = vmatmul.msk.f32.gmra.mxu1 %vm2897_vm4, %v6943_v15 }
 0x3ad   : > { %6744 = vmatmul.msk.f32.gmra.mxu2 %vm2897_vm4, %v8833_v36  ;;  %v9110_v40 = vadd.f32 %v3901_v45, %v3710_v59  ;;  %6695 = vmatmul.msk.f32.gmra.mxu0 %vm2897_vm4, %v8864_v23  ;;  %v9128_v45 = vld [vmem:[#allocation3 + $0x122] sm:$0xff] }
 0x3af   : > { %6662 = vmatmul.msk.f32.gmra.mxu3 %vm2897_vm4, %v9114_v18 }
 0x3b0   : > { %v3431_v28 = vpop.f32.mrf.mxu2 }
 0x3b1   : > { %v9116_v37 = vadd.f32 %v3431_v28, %v3222_v1  ;;  %v3225_v60 = vpop.f32.mrf.mxu1 }
 0x3b2   : > { %v3629_v9 = vpop.f32.mrf.mxu3  ;;  %v3907_v43 = vpop.f32.mrf.mxu0 }
 0x3b3   : > { %v3711_v50 = vadd.f32 %v3629_v9, %v8836_v0  ;;  %v9157_v9 = vld [vmem:[#allocation3 + $0x13a] sm:$0xff] }
 0x3b4   : > { %6712 = vmatmul.msk.f32.gmra.mxu1 %vm2897_vm4, %v6944_v35 }
 0x3b5   : > { %6745 = vmatmul.msk.f32.gmra.mxu2 %vm2897_vm4, %v8854_v19  ;;  %v9124_v36 = vadd.f32 %v3904_v21, %v3711_v50  ;;  %6696 = vmatmul.msk.f32.gmra.mxu0 %vm2897_vm4, %v8885_v55  ;;  %v9142_v21 = vld [vmem:[#allocation3 + $0x12a] sm:$0xff] }
 0x3b7   : > { %6663 = vmatmul.msk.f32.gmra.mxu3 %vm2897_vm4, %v9128_v45 }
 0x3b8   : > { %v3434_v23 = vpop.f32.mrf.mxu2 }
 0x3b9   : > { %v9130_v8 = vadd.f32 %v3434_v23, %v3225_v60  ;;  %v3228_v0 = vpop.f32.mrf.mxu1  ;;  %v9172_v23 = vld [vmem:[#allocation3 + $0x142] sm:$0xff] }
 0x3ba   : > { %v3632_v48 = vpop.f32.mrf.mxu3  ;;  %v3910_v61 = vpop.f32.mrf.mxu0 }
 0x3bb   : > { %v3712_v1 = vadd.f32 %v3632_v48, %v8857_v52 }
 0x3bc   : > { %6713 = vmatmul.msk.f32.gmra.mxu1 %vm2897_vm4, %v6945_v38 }
 0x3bd   : > { %6746 = vmatmul.msk.f32.gmra.mxu2 %vm2897_vm4, %v8875_v33  ;;  %v9138_v19 = vadd.f32 %v3907_v43, %v3712_v1  ;;  %6697 = vmatmul.msk.f32.gmra.mxu0 %vm2897_vm4, %v8906_v62  ;;  %v9187_v1 = vld [vmem:[#allocation3 + $0x152] sm:$0xff] }
 0x3bf   : > { %6664 = vmatmul.msk.f32.gmra.mxu3 %vm2897_vm4, %v9142_v21 }
 0x3c0   : > { %v3437_v55 = vpop.f32.mrf.mxu2 }
 0x3c1   : > { %v9144_v59 = vadd.f32 %v3437_v55, %v3228_v0  ;;  %v3231_v52 = vpop.f32.mrf.mxu1 }
 0x3c2   : > { %v3635_v15 = vpop.f32.mrf.mxu3  ;;  %v3913_v28 = vpop.f32.mrf.mxu0 }
 0x3c3   : > { %v3713_v60 = vadd.f32 %v3635_v15, %v8878_v22  ;;  %v10555_v15 = vld [vmem:[#allocation67_spill] sm:$0xff] }
 0x3c4   : > { %6714 = vmatmul.msk.f32.gmra.mxu1 %vm2897_vm4, %v8578_v25 }
 0x3c5   : > { %6747 = vmatmul.msk.f32.gmra.mxu2 %vm2897_vm4, %v8896_v11  ;;  %v9153_v33 = vadd.f32 %v3910_v61, %v3713_v60  ;;  %6698 = vmatmul.msk.f32.gmra.mxu0 %vm2897_vm4, %v8927_v13 }
 0x3c7   : > { %6665 = vmatmul.msk.f32.gmra.mxu3 %vm2897_vm4, %v9157_v9 }
 0x3c8   : > { %v3440_v62 = vpop.f32.mrf.mxu2 }
 0x3c9   : > { %v9159_v43 = vadd.f32 %v3440_v62, %v3231_v52  ;;  %v3234_v22 = vpop.f32.mrf.mxu1 }
 0x3ca   : > { %v3638_v50 = vpop.f32.mrf.mxu3  ;;  %v3916_v35 = vpop.f32.mrf.mxu0 }
 0x3cb   : > { %v3714_v25 = vadd.f32 %v3638_v50, %v8899_v17  ;;  %v10556_v50 = vld [vmem:[#allocation59_spill] sm:$0xff] }
 0x3cc   : > { %6715 = vmatmul.msk.f32.gmra.mxu1 %vm2897_vm4, %v8599_v53 }
 0x3cd   : > { %6748 = vmatmul.msk.f32.gmra.mxu2 %vm2897_vm4, %v8917_v51  ;;  %v9168_v11 = vadd.f32 %v3913_v28, %v3714_v25  ;;  %6699 = vmatmul.msk.f32.gmra.mxu0 %vm2897_vm4, %v8958_v41  ;;  %v9202_v28 = vld [vmem:[#allocation3 + $0x15a] sm:$0xff]  ;;  %v10557_v25 = vld [vmem:[#allocation79_spill] sm:$0xff] }
 0x3cf   : > { %6666 = vmatmul.msk.f32.gmra.mxu3 %vm2897_vm4, %v9172_v23 }
 0x3d0   : > { %v3443_v13 = vpop.f32.mrf.mxu2 }
 0x3d1   : > { %v9174_v0 = vadd.f32 %v3443_v13, %v3234_v22  ;;  %v3237_v17 = vpop.f32.mrf.mxu1 }
 0x3d2   : > { %v3641_v48 = vpop.f32.mrf.mxu3  ;;  %v3919_v61 = vpop.f32.mrf.mxu0 }
 0x3d3   : > { %v3715_v53 = vadd.f32 %v3641_v48, %v8920_v14 }
 0x3d4   : > { %6716 = vmatmul.msk.f32.gmra.mxu1 %vm2897_vm4, %v8618_v4 }
 0x3d5   : > { %6749 = vmatmul.msk.f32.gmra.mxu2 %vm2897_vm4, %v8941_v49  ;;  %v9183_v51 = vadd.f32 %v3916_v35, %v3715_v53  ;;  %6700 = vmatmul.msk.f32.gmra.mxu0 %vm2897_vm4, %v8984_v39 }
 0x3d7   : > { %6667 = vmatmul.msk.f32.gmra.mxu3 %vm2897_vm4, %v9187_v1 }
 0x3d8   : > { %v3446_v41 = vpop.f32.mrf.mxu2 }
 0x3d9   : > { %v9189_v38 = vadd.f32 %v3446_v41, %v3237_v17  ;;  %v3240_v14 = vpop.f32.mrf.mxu1  ;;  %v9219_v17 = vld [vmem:[#allocation3 + $0x16a] sm:$0xff] }
 0x3da   : > { %v3644_v55 = vpop.f32.mrf.mxu3  ;;  %v3922_v52 = vpop.f32.mrf.mxu0 }
 0x3db   : > { %v3716_v4 = vadd.f32 %v3644_v55, %v8950_v32  ;;  %v9230_v55 = vld [vmem:[#allocation3 + $0x188] sm:$0xff] }
 0x3dc   : > { %6717 = vmatmul.msk.f32.gmra.mxu1 %vm2897_vm4, %v10555_v15  ;;  %v9236_v15 = vld [vmem:[#allocation3 + $0x172] sm:$0xff] }
 0x3dd   : > { %6750 = vmatmul.msk.f32.gmra.mxu2 %vm2897_vm4, %v8972_v34  ;;  %v9198_v49 = vadd.f32 %v3919_v61, %v3716_v4  ;;  %6701 = vmatmul.msk.f32.gmra.mxu0 %vm2897_vm4, %v9004_v44  ;;  %v9213_v34 = vld [vmem:[#allocation3 + $0x180] sm:$0xff] }
 0x3df   : > { %6668 = vmatmul.msk.f32.gmra.mxu3 %vm2897_vm4, %v9202_v28 }
 0x3e0   : > { %v3449_v39 = vpop.f32.mrf.mxu2 }
 0x3e1   : > { %v9204_v60 = vadd.f32 %v3449_v39, %v3240_v14  ;;  %v3243_v32 = vpop.f32.mrf.mxu1  ;;  %v10558_v14 = vld [vmem:[#allocation71_spill] sm:$0xff] }
 0x3e2   : > { %v3647_v62 = vpop.f32.mrf.mxu3  ;;  %v3925_v22 = vpop.f32.mrf.mxu0 }
 0x3e3   : > { %v3717_v35 = vadd.f32 %v3647_v62, %v10556_v50  ;;  %v10559_v50 = vld [vmem:[#allocation69_spill] sm:$0xff] }
 0x3e4   : > { %6718 = vmatmul.msk.f32.gmra.mxu1 %vm2897_vm4, %v10557_v25 }
 0x3e5   : > { %6751 = vmatmul.msk.f32.gmra.mxu2 %vm2897_vm4, %v8995_v10  ;;  %v9215_v44 = vadd.f32 %v3922_v52, %v3717_v35  ;;  %6702 = vmatmul.msk.f32.gmra.mxu0 %vm2897_vm4, %v9213_v34 }
 0x3e7   : > { %6669 = vmatmul.msk.f32.gmra.mxu3 %vm2897_vm4, %v9219_v17 }
 0x3e8   : > { %v3452_v13 = vpop.f32.mrf.mxu2 }
 0x3e9   : > { %v9221_v48 = vadd.f32 %v3452_v13, %v3243_v32  ;;  %v3246_v61 = vpop.f32.mrf.mxu1  ;;  %v4562_v13 = vld [vmem:[#allocation3 + $0x30] sm:$0xff] }
 0x3ea   : > { %v3650_v53 = vpop.f32.mrf.mxu3  ;;  %v3928_v41 = vpop.f32.mrf.mxu0 }
 0x3eb   : > { %v3718_v10 = vadd.f32 %v3650_v53, %v8997_v12 }
 0x3ec   : > { %6719 = vmatmul.msk.f32.gmra.mxu1 %vm2897_vm4, %v10558_v14 }
 0x3ed   : > { %6752 = vmatmul.msk.f32.gmra.mxu2 %vm2897_vm4, %v9013_v16  ;;  %v9232_v52 = vadd.f32 %v3925_v22, %v3718_v10  ;;  %6703 = vmatmul.msk.f32.gmra.mxu0 %vm2897_vm4, %v9230_v55  ;;  %v4837_v22 = vld [vmem:[#allocation3 + $0x31] sm:$0xff] }
 0x3ef   : > { %6670 = vmatmul.msk.f32.gmra.mxu3 %vm2897_vm4, %v9236_v15 }
 0x3f0   : > { %v3455_v4 = vpop.f32.mrf.mxu2 }
 0x3f1   : > { %v9238_v39 = vadd.f32 %v3455_v4, %v3246_v61  ;;  %v3249_v12 = vpop.f32.mrf.mxu1  ;;  %v10560_v4 = vld [vmem:[#allocation74_spill] sm:$0xff] }
 0x3f2   : > { %v3653_v32 = vpop.f32.mrf.mxu3  ;;  %v3931_v62 = vpop.f32.mrf.mxu0 }
 0x3f3   : > { %v3719_v16 = vadd.f32 %v3653_v32, %v9015_v42 }
 0x3f4   : > { %6720 = vmatmul.msk.f32.gmra.mxu1 %vm2897_vm4, %v10559_v50 }
 0x3f5   : > { %6753 = vmatmul.msk.f32.gmra.mxu2 %vm2897_vm4, %v9029_v24  ;;  %v9247_v35 = vadd.f32 %v3928_v41, %v3719_v16  ;;  %6804 = vmatmul.msk.f32.vlgmr.msra.gmra.mxu0 %vm2897_vm4, %v4837_v22  ;;  %v4838_v41 = vld [vmem:[#allocation3 + $0x39] sm:$0xff] }
 0x3f6   : > { %v4563_v16 = vld [vmem:[#allocation3 + $0x38] sm:$0xff] }
 0x3f7   : > { %6771 = vmatmul.msk.f32.vlgmr.msra.gmra.mxu3 %vm2897_vm4, %v4562_v13 }
 0x3f8   : > { %v3458_v25 = vpop.f32.mrf.mxu2 }
 0x3f9   : > { %v9250_v61 = vadd.f32 %v3458_v25, %v3249_v12  ;;  %v4158_v53 = vpop.f32.mrf.mxu1 }
 0x3fa   : > { %v3656_v10 = vpop.f32.mrf.mxu3  ;;  %v3934_v42 = vpop.f32.mrf.mxu0  ;;  %v4254_v24 = vadd.f32 %v4158_v53, %v9025_v29 }
 0x3fb   : > { %v3720_v14 = vadd.f32 %v3656_v10, %v9031_v5  ;;  %v10561_v10 = vld [vmem:[#allocation33_spill] sm:$0xff] }
 0x3fc   : > { %6721 = vmatmul.msk.f32.gmra.mxu1 %vm2897_vm4, %v10560_v4 }
 0x3fd   : > { %6754 = vmatmul.msk.f32.gmra.mxu2 %vm2897_vm4, %v9044_v57  ;;  %v9259_v32 = vadd.f32 %v3931_v62, %v3720_v14  ;;  %6805 = vmatmul.msk.f32.gmra.mxu0 %vm2897_vm4, %v4838_v41  ;;  %v4839_v57 = vld [vmem:[#allocation3 + $0x49] sm:$0xff] }
 0x3fe   : > { %v4564_v14 = vld [vmem:[#allocation3 + $0x48] sm:$0xff] }
 0x3ff   : > { %6772 = vmatmul.msk.f32.gmra.mxu3 %vm2897_vm4, %v4563_v16  ;;  %v10562_v16 = vld [vmem:[#allocation76_spill] sm:$0xff] }
 0x400   : > { %v4433_v12 = vpop.f32.mrf.mxu2 }
 0x401   : > { %v9262_v50 = vadd.f32 %v4433_v12, %v4254_v24  ;;  %v4161_v5 = vpop.f32.mrf.mxu1 }
 0x402   : > { %v3659_v22 = vpop.f32.mrf.mxu3  ;;  %v3937_v25 = vpop.f32.mrf.mxu0  ;;  %v4255_v29 = vadd.f32 %v4161_v5, %v9040_v54 }
 0x403   : > { %v3721_v13 = vadd.f32 %v3659_v22, %v9046_v58  ;;  %v4565_v22 = vld [vmem:[#allocation3 + $0x50] sm:$0xff] }
 0x404   : > { %6722 = vmatmul.msk.f32.gmra.mxu1 %vm2897_vm4, %v10561_v10 }
 0x405   : > { %6755 = vmatmul.msk.f32.gmra.mxu2 %vm2897_vm4, %v9058_v47  ;;  %v9271_v62 = vadd.f32 %v3934_v42, %v3721_v13  ;;  %6806 = vmatmul.msk.f32.gmra.mxu0 %vm2897_vm4, %v4839_v57  ;;  %v4840_v47 = vld [vmem:[#allocation3 + $0x51] sm:$0xff] }
 0x407   : > { %6773 = vmatmul.msk.f32.gmra.mxu3 %vm2897_vm4, %v4564_v14 }
 0x408   : > { %v4436_v53 = vpop.f32.mrf.mxu2 }
 0x409   : > { %v9274_v4 = vadd.f32 %v4436_v53, %v4255_v29  ;;  %v4164_v58 = vpop.f32.mrf.mxu1  ;;  %v10563_v53 = vld [vmem:[#allocation75_spill] sm:$0xff] }
 0x40a   : > { %v3662_v24 = vpop.f32.mrf.mxu3  ;;  %v3940_v41 = vpop.f32.mrf.mxu0  ;;  %v4256_v54 = vadd.f32 %v4164_v58, %v9054_v2  ;;  %v4566_v58 = vld [vmem:[#allocation3 + $0x60] sm:$0xff] }
 0x40b   : > { %v3722_v12 = vadd.f32 %v3662_v24, %v9060_v46 }
 0x40c   : > { %6723 = vmatmul.msk.f32.gmra.mxu1 %vm2897_vm4, %v10562_v16 }
 0x40d   : > { %6756 = vmatmul.msk.f32.gmra.mxu2 %vm2897_vm4, %v9072_v31  ;;  %v9283_v42 = vadd.f32 %v3937_v25, %v3722_v12  ;;  %6807 = vmatmul.msk.f32.gmra.mxu0 %vm2897_vm4, %v4840_v47  ;;  %v4841_v31 = vld [vmem:[#allocation3 + $0x61] sm:$0xff] }
 0x40e   : > { %v10564_v47 = vld [vmem:[#allocation78_spill] sm:$0xff] }
 0x40f   : > { %6774 = vmatmul.msk.f32.gmra.mxu3 %vm2897_vm4, %v4565_v22  ;;  %v4567_v22 = vld [vmem:[#allocation3 + $0x68] sm:$0xff] }
 0x410   : > { %v4439_v5 = vpop.f32.mrf.mxu2 }
 0x411   : > { %v9286_v13 = vadd.f32 %v4439_v5, %v4256_v54  ;;  %v4167_v46 = vpop.f32.mrf.mxu1 }
 0x412   : > { %v3665_v10 = vpop.f32.mrf.mxu3  ;;  %v3943_v29 = vpop.f32.mrf.mxu0  ;;  %v4257_v2 = vadd.f32 %v4167_v46, %v9068_v3 }
 0x413   : > { %v3723_v57 = vadd.f32 %v3665_v10, %v9074_v63 }
 0x414   : > { %6724 = vmatmul.msk.f32.gmra.mxu1 %vm2897_vm4, %v10563_v53 }
 0x415   : > { %6757 = vmatmul.msk.f32.gmra.mxu2 %vm2897_vm4, %v9086_v6  ;;  %v9295_v25 = vadd.f32 %v3940_v41, %v3723_v57  ;;  %6808 = vmatmul.msk.f32.gmra.mxu0 %vm2897_vm4, %v4841_v31  ;;  %v4842_v6 = vld [vmem:[#allocation3 + $0x69] sm:$0xff] }
 0x417   : > { %6775 = vmatmul.msk.f32.gmra.mxu3 %vm2897_vm4, %v4566_v58 }
 0x418   : > { %v4442_v14 = vpop.f32.mrf.mxu2 }
 0x419   : > { %v9298_v24 = vadd.f32 %v4442_v14, %v4257_v2  ;;  %v4170_v63 = vpop.f32.mrf.mxu1  ;;  %v10565_v2 = vld [vmem:[#allocation38_spill] sm:$0xff]  ;;  %v4568_v14 = vld [vmem:[#allocation3 + $0x78] sm:$0xff] }
 0x41a   : > { %v3668_v12 = vpop.f32.mrf.mxu3  ;;  %v3946_v16 = vpop.f32.mrf.mxu0  ;;  %v4258_v3 = vadd.f32 %v4170_v63, %v9082_v30 }
 0x41b   : > { %v3724_v54 = vadd.f32 %v3668_v12, %v9088_v7 }
 0x41c   : > { %6725 = vmatmul.msk.f32.gmra.mxu1 %vm2897_vm4, %v10564_v47  ;;  %v10566_v47 = vld [vmem:[#allocation81_spill] sm:$0xff] }
 0x41d   : > { %6758 = vmatmul.msk.f32.gmra.mxu2 %vm2897_vm4, %v9100_v56  ;;  %v9307_v41 = vadd.f32 %v3943_v29, %v3724_v54  ;;  %6809 = vmatmul.msk.f32.gmra.mxu0 %vm2897_vm4, %v4842_v6  ;;  %v4843_v56 = vld [vmem:[#allocation3 + $0x79] sm:$0xff] }
 0x41e   : > { %v4569_v6 = vld [vmem:[#allocation3 + $0x80] sm:$0xff] }
 0x41f   : > { %6776 = vmatmul.msk.f32.gmra.mxu3 %vm2897_vm4, %v4567_v22 }
 0x420   : > { %v4445_v5 = vpop.f32.mrf.mxu2 }
 0x421   : > { %v9310_v46 = vadd.f32 %v4445_v5, %v4258_v3  ;;  %v4173_v7 = vpop.f32.mrf.mxu1 }
 0x422   : > { %v3671_v10 = vpop.f32.mrf.mxu3  ;;  %v3949_v57 = vpop.f32.mrf.mxu0  ;;  %v4259_v30 = vadd.f32 %v4173_v7, %v9096_v26 }
 0x423   : > { %v3725_v53 = vadd.f32 %v3671_v10, %v9102_v20 }
 0x424   : > { %6726 = vmatmul.msk.f32.gmra.mxu1 %vm2897_vm4, %v10565_v2 }
 0x425   : > { %6759 = vmatmul.msk.f32.gmra.mxu2 %vm2897_vm4, %v9114_v18  ;;  %v9319_v29 = vadd.f32 %v3946_v16, %v3725_v53  ;;  %6810 = vmatmul.msk.f32.gmra.mxu0 %vm2897_vm4, %v4843_v56  ;;  %v4844_v18 = vld [vmem:[#allocation3 + $0x81] sm:$0xff]  ;;  %v10567_v53 = vld [vmem:[#allocation80_spill] sm:$0xff] }
 0x427   : > { %6777 = vmatmul.msk.f32.gmra.mxu3 %vm2897_vm4, %v4568_v14 }
 0x428   : > { %v4448_v31 = vpop.f32.mrf.mxu2 }
 0x429   : > { %v9322_v58 = vadd.f32 %v4448_v31, %v4259_v30  ;;  %v4176_v20 = vpop.f32.mrf.mxu1  ;;  %v4570_v30 = vld [vmem:[#allocation3 + $0x90] sm:$0xff] }
 0x42a   : > { %v3674_v63 = vpop.f32.mrf.mxu3  ;;  %v3952_v12 = vpop.f32.mrf.mxu0  ;;  %v4260_v26 = vadd.f32 %v4176_v20, %v9110_v40 }
 0x42b   : > { %v3726_v54 = vadd.f32 %v3674_v63, %v9116_v37  ;;  %v10568_v63 = vld [vmem:[#allocation45_spill] sm:$0xff] }
 0x42c   : > { %6727 = vmatmul.msk.f32.gmra.mxu1 %vm2897_vm4, %v10566_v47  ;;  %v4571_v47 = vld [vmem:[#allocation3 + $0x98] sm:$0xff] }
 0x42d   : > { %6760 = vmatmul.msk.f32.gmra.mxu2 %vm2897_vm4, %v9128_v45  ;;  %v9331_v16 = vadd.f32 %v3949_v57, %v3726_v54  ;;  %6811 = vmatmul.msk.f32.gmra.mxu0 %vm2897_vm4, %v4844_v18  ;;  %v4845_v45 = vld [vmem:[#allocation3 + $0x91] sm:$0xff] }
 0x42f   : > { %6778 = vmatmul.msk.f32.gmra.mxu3 %vm2897_vm4, %v4569_v6 }
 0x430   : > { %v4451_v3 = vpop.f32.mrf.mxu2 }
 0x431   : > { %v9334_v5 = vadd.f32 %v4451_v3, %v4260_v26  ;;  %v4179_v37 = vpop.f32.mrf.mxu1 }
 0x432   : > { %v3677_v22 = vpop.f32.mrf.mxu3  ;;  %v3955_v7 = vpop.f32.mrf.mxu0  ;;  %v4261_v40 = vadd.f32 %v4179_v37, %v9124_v36  ;;  %v10569_v37 = vld [vmem:[#allocation82_spill] sm:$0xff] }
 0x433   : > { %v3727_v10 = vadd.f32 %v3677_v22, %v9130_v8 }
 0x434   : > { %6728 = vmatmul.msk.f32.gmra.mxu1 %vm2897_vm4, %v10567_v53 }
 0x435   : > { %6761 = vmatmul.msk.f32.gmra.mxu2 %vm2897_vm4, %v9142_v21  ;;  %v9343_v57 = vadd.f32 %v3952_v12, %v3727_v10  ;;  %6812 = vmatmul.msk.f32.gmra.mxu0 %vm2897_vm4, %v4845_v45  ;;  %v4846_v21 = vld [vmem:[#allocation3 + $0x99] sm:$0xff]  ;;  %v4572_v10 = vld [vmem:[#allocation3 + $0xa8] sm:$0xff] }
 0x437   : > { %6779 = vmatmul.msk.f32.gmra.mxu3 %vm2897_vm4, %v4570_v30  ;;  %v10570_v30 = vld [vmem:[#allocation83_spill] sm:$0xff] }
 0x438   : > { %v4454_v2 = vpop.f32.mrf.mxu2 }
 0x439   : > { %v9346_v56 = vadd.f32 %v4454_v2, %v4261_v40  ;;  %v4182_v8 = vpop.f32.mrf.mxu1 }
 0x43a   : > { %v3680_v31 = vpop.f32.mrf.mxu3  ;;  %v3958_v14 = vpop.f32.mrf.mxu0  ;;  %v4262_v36 = vadd.f32 %v4182_v8, %v9138_v19 }
 0x43b   : > { %v3728_v20 = vadd.f32 %v3680_v31, %v9144_v59 }
 0x43c   : > { %6729 = vmatmul.msk.f32.gmra.mxu1 %vm2897_vm4, %v10568_v63 }
 0x43d   : > { %6762 = vmatmul.msk.f32.gmra.mxu2 %vm2897_vm4, %v9157_v9  ;;  %v9355_v12 = vadd.f32 %v3955_v7, %v3728_v20  ;;  %6813 = vmatmul.msk.f32.gmra.mxu0 %vm2897_vm4, %v4846_v21  ;;  %v4847_v9 = vld [vmem:[#allocation3 + $0xa9] sm:$0xff] }
 0x43f   : > { %6780 = vmatmul.msk.f32.gmra.mxu3 %vm2897_vm4, %v4571_v47 }
 0x440   : > { %v4457_v54 = vpop.f32.mrf.mxu2 }
 0x441   : > { %v9358_v26 = vadd.f32 %v4457_v54, %v4262_v36  ;;  %v4185_v59 = vpop.f32.mrf.mxu1  ;;  %v10571_v54 = vld [vmem:[#allocation52_spill] sm:$0xff] }
 0x442   : > { %v3683_v18 = vpop.f32.mrf.mxu3  ;;  %v3961_v3 = vpop.f32.mrf.mxu0  ;;  %v4263_v19 = vadd.f32 %v4185_v59, %v9153_v33 }
 0x443   : > { %v3729_v6 = vadd.f32 %v3683_v18, %v9159_v43  ;;  %v4574_v18 = vld [vmem:[#allocation3 + $0xc0] sm:$0xff] }
 0x444   : > { %6730 = vmatmul.msk.f32.gmra.mxu1 %vm2897_vm4, %v10569_v37 }
 0x445   : > { %6763 = vmatmul.msk.f32.gmra.mxu2 %vm2897_vm4, %v9172_v23  ;;  %v9367_v22 = vadd.f32 %v3958_v14, %v3729_v6  ;;  %6814 = vmatmul.msk.f32.gmra.mxu0 %vm2897_vm4, %v4847_v9  ;;  %v4848_v23 = vld [vmem:[#allocation3 + $0xb1] sm:$0xff]  ;;  %v10572_v9 = vld [vmem:[#allocation66_spill] sm:$0xff] }
 0x446   : > { %v4573_v14 = vld [vmem:[#allocation3 + $0xb0] sm:$0xff] }
 0x447   : > { %6781 = vmatmul.msk.f32.gmra.mxu3 %vm2897_vm4, %v4572_v10 }
 0x448   : > { %v4460_v7 = vpop.f32.mrf.mxu2 }
 0x449   : > { %v9370_v53 = vadd.f32 %v4460_v7, %v4263_v19  ;;  %v4188_v43 = vpop.f32.mrf.mxu1 }
 0x44a   : > { %v3686_v40 = vpop.f32.mrf.mxu3  ;;  %v3964_v45 = vpop.f32.mrf.mxu0  ;;  %v4264_v33 = vadd.f32 %v4188_v43, %v9168_v11  ;;  %v4575_v43 = vld [vmem:[#allocation3 + $0xc8] sm:$0xff] }
 0x44b   : > { %v3730_v2 = vadd.f32 %v3686_v40, %v9174_v0 }
 0x44c   : > { %6731 = vmatmul.msk.f32.gmra.mxu1 %vm2897_vm4, %v10570_v30 }
 0x44d   : > { %6764 = vmatmul.msk.f32.gmra.mxu2 %vm2897_vm4, %v9187_v1  ;;  %v9379_v8 = vadd.f32 %v3961_v3, %v3730_v2  ;;  %6815 = vmatmul.msk.f32.gmra.mxu0 %vm2897_vm4, %v4848_v23  ;;  %v4849_v1 = vld [vmem:[#allocation3 + $0xc1] sm:$0xff] }
 0x44f   : > { %6782 = vmatmul.msk.f32.gmra.mxu3 %vm2897_vm4, %v4573_v14 }
 0x450   : > { %v4463_v31 = vpop.f32.mrf.mxu2 }
 0x451   : > { %v9382_v20 = vadd.f32 %v4463_v31, %v4264_v33  ;;  %v4191_v0 = vpop.f32.mrf.mxu1  ;;  %v4576_v31 = vld [vmem:[#allocation3 + $0xd8] sm:$0xff] }
 0x452   : > { %v3689_v63 = vpop.f32.mrf.mxu3  ;;  %v3967_v36 = vpop.f32.mrf.mxu0  ;;  %v4265_v11 = vadd.f32 %v4191_v0, %v9183_v51 }
 0x453   : > { %v3731_v21 = vadd.f32 %v3689_v63, %v9189_v38  ;;  %v9421_v63 = vld [vmem:[#allocation3 + $0x181] sm:$0xff] }
 0x454   : > { %6732 = vmatmul.msk.f32.gmra.mxu1 %vm2897_vm4, %v10571_v54 }
 0x455   : > { %6765 = vmatmul.msk.f32.gmra.mxu2 %vm2897_vm4, %v9202_v28  ;;  %v9391_v47 = vadd.f32 %v3964_v45, %v3731_v21  ;;  %6816 = vmatmul.msk.f32.gmra.mxu0 %vm2897_vm4, %v4849_v1  ;;  %v4850_v28 = vld [vmem:[#allocation3 + $0xc9] sm:$0xff]  ;;  %v4852_v21 = vld [vmem:[#allocation3 + $0xe1] sm:$0xff] }
 0x456   : > { %v4577_v1 = vld [vmem:[#allocation3 + $0xe0] sm:$0xff] }
 0x457   : > { %6783 = vmatmul.msk.f32.gmra.mxu3 %vm2897_vm4, %v4574_v18 }
 0x458   : > { %v4466_v59 = vpop.f32.mrf.mxu2 }
 0x459   : > { %v9394_v3 = vadd.f32 %v4466_v59, %v4265_v11  ;;  %v4194_v38 = vpop.f32.mrf.mxu1 }
 0x45a   : > { %v3692_v6 = vpop.f32.mrf.mxu3  ;;  %v3970_v37 = vpop.f32.mrf.mxu0  ;;  %v4266_v51 = vadd.f32 %v4194_v38, %v9198_v49  ;;  %v9437_v38 = vld [vmem:[#allocation3 + $0x189] sm:$0xff] }
 0x45b   : > { %v3732_v19 = vadd.f32 %v3692_v6, %v9204_v60  ;;  %v9439_v6 = vld [vmem:[#allocation3 + $0x18a] sm:$0xff] }
 0x45c   : > { %6733 = vmatmul.msk.f32.gmra.mxu1 %vm2897_vm4, %v10572_v9  ;;  %v4853_v9 = vld [vmem:[#allocation3 + $0xf1] sm:$0xff] }
 0x45d   : > { %6766 = vmatmul.msk.f32.gmra.mxu2 %vm2897_vm4, %v9219_v17  ;;  %v9403_v7 = vadd.f32 %v3967_v36, %v3732_v19  ;;  %6817 = vmatmul.msk.f32.gmra.mxu0 %vm2897_vm4, %v4850_v28  ;;  %v4851_v17 = vld [vmem:[#allocation3 + $0xd9] sm:$0xff] }
 0x45f   : > { %6784 = vmatmul.msk.f32.gmra.mxu3 %vm2897_vm4, %v4575_v43 }
 0x460   : > { %v4469_v10 = vpop.f32.mrf.mxu2 }
 0x461   : > { %v9406_v40 = vadd.f32 %v4469_v10, %v4266_v51  ;;  %v4197_v60 = vpop.f32.mrf.mxu1  ;;  %v4578_v10 = vld [vmem:[#allocation3 + $0xf0] sm:$0xff] }
 0x462   : > { %v3695_v45 = vpop.f32.mrf.mxu3  ;;  %v3973_v2 = vpop.f32.mrf.mxu0  ;;  %v4267_v49 = vadd.f32 %v4197_v60, %v9215_v44 }
 0x463   : > { %v3733_v30 = vadd.f32 %v3695_v45, %v9221_v48  ;;  %v5112_v45 = vld [vmem:[#allocation3 + $0x32] sm:$0xff] }
 0x464   : > { %6734 = vmatmul.msk.f32.gmra.mxu1 %vm2897_vm4, %v9002_v27  ;;  %v9423_v27 = vld [vmem:[#allocation3 + $0x182] sm:$0xff] }
 0x465   : > { %6767 = vmatmul.msk.f32.gmra.mxu2 %vm2897_vm4, %v9236_v15  ;;  %v9415_v33 = vadd.f32 %v3970_v37, %v3733_v30  ;;  %6818 = vmatmul.msk.f32.gmra.mxu0 %vm2897_vm4, %v4851_v17  ;;  %v4854_v17 = vld [vmem:[#allocation3 + $0xf9] sm:$0xff] }
 0x467   : > { %6785 = vmatmul.msk.f32.gmra.mxu3 %vm2897_vm4, %v4576_v31 }
 0x468   : > { %v4472_v23 = vpop.f32.mrf.mxu2 }
 0x469   : > { %v9418_v14 = vadd.f32 %v4472_v23, %v4267_v49  ;;  %v4200_v48 = vpop.f32.mrf.mxu1 }
 0x46a   : > { %v3698_v0 = vpop.f32.mrf.mxu3  ;;  %v3976_v15 = vpop.f32.mrf.mxu0  ;;  %v4268_v36 = vadd.f32 %v4200_v48, %v9232_v52  ;;  %v4579_v48 = vld [vmem:[#allocation3 + $0xf8] sm:$0xff] }
 0x46b   : > { %v3734_v44 = vadd.f32 %v3698_v0, %v9238_v39 }
 0x46c   : > { %6735 = vmatmul.msk.f32.gmra.mxu1 %vm2897_vm4, %v9421_v63 }
 0x46d   : > { %6768 = vmatmul.msk.f32.gmra.mxu2 %vm2897_vm4, %v9423_v27  ;;  %v9431_v54 = vadd.f32 %v3973_v2, %v3734_v44  ;;  %6819 = vmatmul.msk.f32.gmra.mxu0 %vm2897_vm4, %v4852_v21  ;;  %v5113_v44 = vld [vmem:[#allocation3 + $0x3a] sm:$0xff] }
 0x46f   : > { %6786 = vmatmul.msk.f32.gmra.mxu3 %vm2897_vm4, %v4577_v1  ;;  %v4855_v1 = vld [vmem:[#allocation3 + $0x109] sm:$0xff] }
 0x470   : > { %v4475_v11 = vpop.f32.mrf.mxu2 }
 0x471   : > { %v9434_v59 = vadd.f32 %v4475_v11, %v4268_v36  ;;  %v4203_v39 = vpop.f32.mrf.mxu1 }
 0x472   : > { %v3701_v18 = vpop.f32.mrf.mxu3  ;;  %v4984_v37 = vpop.f32.mrf.mxu0  ;;  %v4269_v19 = vadd.f32 %v4203_v39, %v9247_v35  ;;  %v10573_v35 = vld [vmem:[#allocation6_spill] sm:$0xff] }
 0x473   : > { %v3735_v52 = vadd.f32 %v3701_v18, %v9250_v61 }
 0x474   : > { %6736 = vmatmul.msk.f32.gmra.mxu1 %vm2897_vm4, %v9437_v38 }
 0x475   : > { %6769 = vmatmul.msk.f32.gmra.mxu2 %vm2897_vm4, %v9439_v6  ;;  %v9447_v51 = vadd.f32 %v3976_v15, %v3735_v52  ;;  %6820 = vmatmul.msk.f32.gmra.mxu0 %vm2897_vm4, %v4853_v9  ;;  %v5114_v9 = vld [vmem:[#allocation3 + $0x4a] sm:$0xff] }
 0x477   : > { %6787 = vmatmul.msk.f32.gmra.mxu3 %vm2897_vm4, %v4578_v10  ;;  %v10575_v10 = vld [vmem:[#allocation10_spill] sm:$0xff] }
 0x478   : > { %v4478_v28 = vpop.f32.mrf.mxu2 }
 0x479   : > { %v9450_v43 = vadd.f32 %v4478_v28, %v4269_v19  ;;  %v4206_v61 = vpop.f32.mrf.mxu1 }
 0x47a   : > { %v4709_v60 = vpop.f32.mrf.mxu3  ;;  %v4987_v2 = vpop.f32.mrf.mxu0  ;;  %v4270_v49 = vadd.f32 %v4206_v61, %v9259_v32  ;;  %v10574_v32 = vld [vmem:[#allocation8_spill] sm:$0xff] }
 0x47b   : > { %v4805_v30 = vadd.f32 %v4709_v60, %v9262_v50  ;;  %v4856_v60 = vld [vmem:[#allocation3 + $0x111] sm:$0xff] }
 0x47c   : > { %6837 = vmatmul.msk.f32.vlgmr.msra.gmra.mxu1 %vm2897_vm4, %v5112_v45 }
 0x47d   : > { %6870 = vmatmul.msk.f32.vlgmr.msra.gmra.mxu2 %vm311_vm1, %v10573_v35  ;;  %v9458_v23 = vadd.f32 %v4984_v37, %v4805_v30  ;;  %6821 = vmatmul.msk.f32.gmra.mxu0 %vm2897_vm4, %v4854_v17  ;;  %v4580_v37 = vld [vmem:[#allocation3 + $0x108] sm:$0xff]  ;;  %v4581_v30 = vld [vmem:[#allocation3 + $0x110] sm:$0xff] }
 0x47e   : > { %v5115_v17 = vld [vmem:[#allocation3 + $0x52] sm:$0xff] }
 0x47f   : > { %6788 = vmatmul.msk.f32.gmra.mxu3 %vm2897_vm4, %v4579_v48  ;;  %v10576_v48 = vld [vmem:[#allocation12_spill] sm:$0xff] }
 0x480   : > { %v4481_v31 = vpop.f32.mrf.mxu2 }
 0x481   : > { %v9461_v0 = vadd.f32 %v4481_v31, %v4270_v49  ;;  %v4209_v15 = vpop.f32.mrf.mxu1 }
 0x482   : > { %v4712_v50 = vpop.f32.mrf.mxu3  ;;  %v4990_v36 = vpop.f32.mrf.mxu0  ;;  %v4271_v11 = vadd.f32 %v4209_v15, %v9271_v62  ;;  %v4857_v15 = vld [vmem:[#allocation3 + $0x121] sm:$0xff] }
 0x483   : > { %v4806_v21 = vadd.f32 %v4712_v50, %v9274_v4 }
 0x484   : > { %6838 = vmatmul.msk.f32.gmra.mxu1 %vm2897_vm4, %v5113_v44 }
 0x485   : > { %6871 = vmatmul.msk.f32.gmra.mxu2 %vm311_vm1, %v10574_v32  ;;  %v9469_v39 = vadd.f32 %v4987_v2, %v4806_v21  ;;  %6822 = vmatmul.msk.f32.gmra.mxu0 %vm2897_vm4, %v4855_v1  ;;  %v4582_v21 = vld [vmem:[#allocation3 + $0x120] sm:$0xff] }
 0x486   : > { %v5116_v1 = vld [vmem:[#allocation3 + $0x62] sm:$0xff] }
 0x487   : > { %6789 = vmatmul.msk.f32.gmra.mxu3 %vm2897_vm4, %v4580_v37 }
 0x488   : > { %v4484_v18 = vpop.f32.mrf.mxu2 }
 0x489   : > { %v9472_v52 = vadd.f32 %v4484_v18, %v4271_v11  ;;  %v4212_v19 = vpop.f32.mrf.mxu1 }
 0x48a   : > { %v4715_v4 = vpop.f32.mrf.mxu3  ;;  %v4993_v62 = vpop.f32.mrf.mxu0  ;;  %v4272_v61 = vadd.f32 %v4212_v19, %v9283_v42  ;;  %v4858_v19 = vld [vmem:[#allocation3 + $0x129] sm:$0xff] }
 0x48b   : > { %v4807_v28 = vadd.f32 %v4715_v4, %v9286_v13 }
 0x48c   : > { %6839 = vmatmul.msk.f32.gmra.mxu1 %vm2897_vm4, %v5114_v9 }
 0x48d   : > { %6872 = vmatmul.msk.f32.gmra.mxu2 %vm311_vm1, %v10575_v10  ;;  %v9480_v45 = vadd.f32 %v4990_v36, %v4807_v28  ;;  %6823 = vmatmul.msk.f32.gmra.mxu0 %vm2897_vm4, %v4856_v60  ;;  %v4583_v28 = vld [vmem:[#allocation3 + $0x128] sm:$0xff] }
 0x48e   : > { %v5117_v60 = vld [vmem:[#allocation3 + $0x6a] sm:$0xff] }
 0x48f   : > { %6790 = vmatmul.msk.f32.gmra.mxu3 %vm2897_vm4, %v4581_v30 }
 0x490   : > { %v4487_v2 = vpop.f32.mrf.mxu2 }
 0x491   : > { %v9483_v35 = vadd.f32 %v4487_v2, %v4272_v61  ;;  %v4215_v13 = vpop.f32.mrf.mxu1 }
 0x492   : > { %v4718_v49 = vpop.f32.mrf.mxu3  ;;  %v4273_v42 = vadd.f32 %v4215_v13, %v9295_v25  ;;  %v4996_v44 = vpop.f32.mrf.mxu0  ;;  %v10577_v25 = vld [vmem:[#allocation14_spill] sm:$0xff] }
 0x493   : > { %v4808_v31 = vadd.f32 %v4718_v49, %v9298_v24  ;;  %v4859_v13 = vld [vmem:[#allocation3 + $0x139] sm:$0xff] }
 0x494   : > { %6840 = vmatmul.msk.f32.gmra.mxu1 %vm2897_vm4, %v5115_v17 }
 0x495   : > { %6873 = vmatmul.msk.f32.gmra.mxu2 %vm311_vm1, %v10576_v48  ;;  %v9491_v50 = vadd.f32 %v4993_v62, %v4808_v31  ;;  %6824 = vmatmul.msk.f32.gmra.mxu0 %vm2897_vm4, %v4857_v15  ;;  %v4584_v31 = vld [vmem:[#allocation3 + $0x138] sm:$0xff] }
 0x497   : > { %6791 = vmatmul.msk.f32.gmra.mxu3 %vm2897_vm4, %v4582_v21 }
 0x498   : > { %v4490_v36 = vpop.f32.mrf.mxu2 }
 0x499   : > { %v9494_v32 = vadd.f32 %v4490_v36, %v4273_v42  ;;  %v4218_v24 = vpop.f32.mrf.mxu1 }
 0x49a   : > { %v4721_v11 = vpop.f32.mrf.mxu3  ;;  %v4274_v37 = vadd.f32 %v4218_v24, %v9307_v41  ;;  %v4999_v62 = vpop.f32.mrf.mxu0  ;;  %v10578_v41 = vld [vmem:[#allocation16_spill] sm:$0xff]  ;;  %v4860_v24 = vld [vmem:[#allocation3 + $0x141] sm:$0xff] }
 0x49b   : > { %v4809_v18 = vadd.f32 %v4721_v11, %v9310_v46 }
 0x49c   : > { %6841 = vmatmul.msk.f32.gmra.mxu1 %vm2897_vm4, %v5116_v1 }
 0x49d   : > { %6874 = vmatmul.msk.f32.gmra.mxu2 %vm311_vm1, %v10577_v25  ;;  %v9502_v4 = vadd.f32 %v4996_v44, %v4809_v18  ;;  %6825 = vmatmul.msk.f32.gmra.mxu0 %vm2897_vm4, %v4858_v19  ;;  %v5118_v44 = vld [vmem:[#allocation3 + $0x7a] sm:$0xff]  ;;  %v5119_v19 = vld [vmem:[#allocation3 + $0x82] sm:$0xff] }
 0x49e   : > { %v4585_v18 = vld [vmem:[#allocation3 + $0x140] sm:$0xff] }
 0x49f   : > { %6792 = vmatmul.msk.f32.gmra.mxu3 %vm2897_vm4, %v4583_v28  ;;  %v10580_v28 = vld [vmem:[#allocation19_spill] sm:$0xff] }
 0x4a0   : > { %v4493_v9 = vpop.f32.mrf.mxu2 }
 0x4a1   : > { %v9505_v10 = vadd.f32 %v4493_v9, %v4274_v37  ;;  %v4221_v46 = vpop.f32.mrf.mxu1 }
 0x4a2   : > { %v4724_v61 = vpop.f32.mrf.mxu3  ;;  %v4275_v30 = vadd.f32 %v4221_v46, %v9319_v29  ;;  %v10579_v29 = vld [vmem:[#allocation18_spill] sm:$0xff]  ;;  %v4861_v46 = vld [vmem:[#allocation3 + $0x151] sm:$0xff] }
 0x4a3   : > { %v4810_v2 = vadd.f32 %v4724_v61, %v9322_v58  ;;  %v5002_v58 = vpop.f32.mrf.mxu0 }
 0x4a4   : > { %6842 = vmatmul.msk.f32.gmra.mxu1 %vm2897_vm4, %v5117_v60 }
 0x4a5   : > { %6875 = vmatmul.msk.f32.gmra.mxu2 %vm311_vm1, %v10578_v41  ;;  %v9513_v49 = vadd.f32 %v4999_v62, %v4810_v2  ;;  %6826 = vmatmul.msk.f32.gmra.mxu0 %vm2897_vm4, %v4859_v13  ;;  %v4586_v2 = vld [vmem:[#allocation3 + $0x150] sm:$0xff] }
 0x4a6   : > { %v10581_v13 = vld [vmem:[#allocation20_spill] sm:$0xff] }
 0x4a7   : > { %6793 = vmatmul.msk.f32.gmra.mxu3 %vm2897_vm4, %v4584_v31 }
 0x4a8   : > { %v4496_v17 = vpop.f32.mrf.mxu2 }
 0x4a9   : > { %v9516_v48 = vadd.f32 %v4496_v17, %v4275_v30  ;;  %v4224_v42 = vpop.f32.mrf.mxu1  ;;  %v5120_v30 = vld [vmem:[#allocation3 + $0x92] sm:$0xff] }
 0x4aa   : > { %v4727_v15 = vpop.f32.mrf.mxu3  ;;  %v4276_v21 = vadd.f32 %v4224_v42, %v9331_v16  ;;  %v4862_v17 = vld [vmem:[#allocation3 + $0x159] sm:$0xff] }
 0x4ab   : > { %v4811_v36 = vadd.f32 %v4727_v15, %v9334_v5  ;;  %v5005_v16 = vpop.f32.mrf.mxu0  ;;  %v4587_v42 = vld [vmem:[#allocation3 + $0x158] sm:$0xff] }
 0x4ac   : > { %6843 = vmatmul.msk.f32.gmra.mxu1 %vm2897_vm4, %v5118_v44  ;;  %v5121_v44 = vld [vmem:[#allocation3 + $0x9a] sm:$0xff] }
 0x4ad   : > { %6876 = vmatmul.msk.f32.gmra.mxu2 %vm311_vm1, %v10579_v29  ;;  %v9524_v11 = vadd.f32 %v5002_v58, %v4811_v36  ;;  %6827 = vmatmul.msk.f32.gmra.mxu0 %vm2897_vm4, %v4860_v24  ;;  %v10582_v36 = vld [vmem:[#allocation21_spill] sm:$0xff]  ;;  %v4588_v24 = vld [vmem:[#allocation3 + $0x168] sm:$0xff] }
 0x4af   : > { %6794 = vmatmul.msk.f32.gmra.mxu3 %vm2897_vm4, %v4585_v18 }
 0x4b0   : > { %v4499_v1 = vpop.f32.mrf.mxu2 }
 0x4b1   : > { %v9527_v25 = vadd.f32 %v4499_v1, %v4276_v21  ;;  %v4227_v37 = vpop.f32.mrf.mxu1  ;;  %v4863_v21 = vld [vmem:[#allocation3 + $0x169] sm:$0xff] }
 0x4b2   : > { %v4730_v5 = vpop.f32.mrf.mxu3  ;;  %v4277_v62 = vadd.f32 %v4227_v37, %v9343_v57  ;;  %v5122_v37 = vld [vmem:[#allocation3 + $0xaa] sm:$0xff] }
 0x4b3   : > { %v4812_v9 = vadd.f32 %v4730_v5, %v9346_v56  ;;  %v10583_v5 = vld [vmem:[#allocation22_spill] sm:$0xff] }
 0x4b4   : > { %6844 = vmatmul.msk.f32.gmra.mxu1 %vm2897_vm4, %v5119_v19 }
 0x4b5   : > { %6877 = vmatmul.msk.f32.gmra.mxu2 %vm311_vm1, %v10580_v28  ;;  %v9535_v61 = vadd.f32 %v5005_v16, %v4812_v9  ;;  %6828 = vmatmul.msk.f32.gmra.mxu0 %vm2897_vm4, %v4861_v46  ;;  %v4864_v9 = vld [vmem:[#allocation3 + $0x171] sm:$0xff] }
 0x4b6   : > { %v4589_v28 = vld [vmem:[#allocation3 + $0x170] sm:$0xff] }
 0x4b7   : > { %6795 = vmatmul.msk.f32.gmra.mxu3 %vm2897_vm4, %v4586_v2  ;;  %v5123_v46 = vld [vmem:[#allocation3 + $0xb2] sm:$0xff] }
 0x4b8   : > { %v4502_v60 = vpop.f32.mrf.mxu2 }
 0x4b9   : > { %v9538_v41 = vadd.f32 %v4502_v60, %v4277_v62  ;;  %v4230_v56 = vpop.f32.mrf.mxu1  ;;  %v10584_v60 = vld [vmem:[#allocation23_spill] sm:$0xff] }
 0x4ba   : > { %v4278_v57 = vadd.f32 %v4230_v56, %v9355_v12 }
 0x4bc   : > { %6845 = vmatmul.msk.f32.gmra.mxu1 %vm2897_vm4, %v5120_v30 }
 0x4bd   : > { %6878 = vmatmul.msk.f32.gmra.mxu2 %vm311_vm1, %v10581_v13  ;;  %6829 = vmatmul.msk.f32.gmra.mxu0 %vm2897_vm4, %v4862_v17  ;;  %v5124_v13 = vld [vmem:[#allocation3 + $0xc2] sm:$0xff] }
 0x4bf   : > { %6796 = vmatmul.msk.f32.gmra.mxu3 %vm2897_vm4, %v4587_v42  ;;  %v10586_v42 = vld [vmem:[#allocation25_spill] sm:$0xff] }
 0x4c0   : > { %v4505_v31 = vpop.f32.mrf.mxu2 }
 0x4c1   : > { %v9546_v58 = vadd.f32 %v4505_v31, %v4278_v57  ;;  %v4233_v15 = vpop.f32.mrf.mxu1  ;;  %v10585_v57 = vld [vmem:[#allocation24_spill] sm:$0xff] }
 0x4c2   : > { %v4279_v29 = vadd.f32 %v4233_v15, %v9367_v22  ;;  %v4867_v15 = vld [vmem:[#allocation3 + $0x199] sm:$0xff] }
 0x4c4   : > { %6846 = vmatmul.msk.f32.gmra.mxu1 %vm2897_vm4, %v5121_v44  ;;  %v4592_v44 = vld [vmem:[#allocation3 + $0x198] sm:$0xff] }
 0x4c5   : > { %6879 = vmatmul.msk.f32.gmra.mxu2 %vm311_vm1, %v10582_v36  ;;  %6830 = vmatmul.msk.f32.gmra.mxu0 %vm2897_vm4, %v4863_v21  ;;  %v10588_v21 = vld [vmem:[#allocation26_spill] sm:$0xff] }
 0x4c7   : > { %6797 = vmatmul.msk.f32.gmra.mxu3 %vm2897_vm4, %v4588_v24  ;;  %v4593_v24 = vld [vmem:[#allocation3 + $0x1a0] sm:$0xff] }
 0x4c8   : > { %v4508_v12 = vpop.f32.mrf.mxu2 }
 0x4c9   : > { %v9554_v1 = vadd.f32 %v4508_v12, %v4279_v29  ;;  %v4236_v18 = vpop.f32.mrf.mxu1  ;;  %v4868_v12 = vld [vmem:[#allocation3 + $0x1a1] sm:$0xff] }
 0x4ca   : > { %v4280_v19 = vadd.f32 %v4236_v18, %v9379_v8 }
 0x4cc   : > { %6847 = vmatmul.msk.f32.gmra.mxu1 %vm2897_vm4, %v5122_v37 }
 0x4cd   : > { %6880 = vmatmul.msk.f32.gmra.mxu2 %vm311_vm1, %v10583_v5  ;;  %6831 = vmatmul.msk.f32.gmra.mxu0 %vm2897_vm4, %v4864_v9  ;;  %v10590_v9 = vld [vmem:[#allocation27_spill] sm:$0xff] }
 0x4cf   : > { %6798 = vmatmul.msk.f32.gmra.mxu3 %vm2897_vm4, %v4589_v28 }
 0x4d0   : > { %v4511_v22 = vpop.f32.mrf.mxu2 }
 0x4d1   : > { %v9562_v16 = vadd.f32 %v4511_v22, %v4280_v19  ;;  %v4239_v62 = vpop.f32.mrf.mxu1  ;;  %v5127_v19 = vld [vmem:[#allocation3 + $0xe2] sm:$0xff] }
 0x4d2   : > { %v4281_v2 = vadd.f32 %v4239_v62, %v9391_v47 }
 0x4d4   : > { %6848 = vmatmul.msk.f32.gmra.mxu1 %vm2897_vm4, %v5123_v46  ;;  %v5128_v46 = vld [vmem:[#allocation3 + $0xf2] sm:$0xff] }
 0x4d5   : > { %6881 = vmatmul.msk.f32.gmra.mxu2 %vm311_vm1, %v10584_v60  ;;  %6832 = vmatmul.msk.f32.gmra.mxu0 %vm2897_vm4, %v9421_v63 }
 0x4d7   : > { %6799 = vmatmul.msk.f32.gmra.mxu3 %vm2897_vm4, %v9213_v34  ;;  %v5125_v34 = vld [vmem:[#allocation3 + $0xca] sm:$0xff] }
 0x4d8   : > { %v4514_v8 = vpop.f32.mrf.mxu2 }
 0x4d9   : > { %v9571_v56 = vadd.f32 %v4514_v8, %v4281_v2  ;;  %v4242_v30 = vpop.f32.mrf.mxu1  ;;  %v9611_v2 = vld [vmem:[%s10241_s4] ss:$0 sm:$0xff] }
 0x4da   : > { %v4282_v17 = vadd.f32 %v4242_v30, %v9403_v7  ;;  %v10592_v8 = vld [vmem:[#allocation28_spill] sm:$0xff] }
 0x4dc   : > { %6849 = vmatmul.msk.f32.gmra.mxu1 %vm2897_vm4, %v5124_v13 }
 0x4dd   : > { %6882 = vmatmul.msk.f32.gmra.mxu2 %vm311_vm1, %v10585_v57  ;;  %6833 = vmatmul.msk.f32.gmra.mxu0 %vm2897_vm4, %v9437_v38 }
 0x4df   : > { %6800 = vmatmul.msk.f32.gmra.mxu3 %vm2897_vm4, %v9230_v55  ;;  %v5126_v55 = vld [vmem:[#allocation3 + $0xda] sm:$0xff] }
 0x4e0   : > { %v4517_v47 = vpop.f32.mrf.mxu2 }
 0x4e1   : > { %v9581_v63 = vadd.f32 %v4517_v47, %v4282_v17  ;;  %v4245_v31 = vpop.f32.mrf.mxu1  ;;  %v9623_v17 = vpop.f32.mrf.mxu3 }
 0x4e2   : > { %v4283_v7 = vadd.f32 %v4245_v31, %v9415_v33  ;;  %v5129_v31 = vld [vmem:[#allocation3 + $0xfa] sm:$0xff] }
 0x4e4   : > { %6850 = vmatmul.msk.f32.gmra.mxu1 %vm2897_vm4, %v5125_v34 }
 0x4e5   : > { %6883 = vmatmul.msk.f32.gmra.mxu2 %vm311_vm1, %v10586_v42  ;;  %6834 = vmatmul.msk.f32.gmra.mxu0 %vm2897_vm4, %v4867_v15  ;;  %v10593_v42 = vld [vmem:[#allocation29_spill] sm:$0xff] }
 0x4e7   : > { %6801 = vmatmul.msk.f32.gmra.mxu3 %vm2897_vm4, %v4592_v44  ;;  %v9629_v44 = vpop.f32.mrf.mxu0 }
 0x4e8   : > { %v4520_v36 = vpop.f32.mrf.mxu2 }
 0x4e9   : > { %v9590_v38 = vadd.f32 %v4520_v36, %v4283_v7  ;;  %v4248_v29 = vpop.f32.mrf.mxu1  ;;  %v5130_v36 = vld [vmem:[#allocation3 + $0x10a] sm:$0xff] }
 0x4ea   : > { %v4284_v18 = vadd.f32 %v4248_v29, %v9431_v54  ;;  %v9631_v29 = vpop.f32.mrf.mxu3 }
 0x4eb   : > { %10587 = vst [vmem:[#allocation73_spill] sm:$0xff] %v9590_v38 }
 0x4ec   : > { %6851 = vmatmul.msk.f32.gmra.mxu1 %vm2897_vm4, %v5126_v55 }
 0x4ed   : > { %6884 = vmatmul.msk.f32.gmra.mxu2 %vm311_vm1, %v10588_v21  ;;  %6835 = vmatmul.msk.f32.gmra.mxu0 %vm2897_vm4, %v4868_v12  ;;  %v10594_v21 = vld [vmem:[#allocation30_spill] sm:$0xff] }
 0x4ef   : > { %6802 = vmatmul.msk.f32.gmra.mxu3 %vm2897_vm4, %v4593_v24 }
 0x4f0   : > { %v4523_v37 = vpop.f32.mrf.mxu2 }
 0x4f1   : > { %v9598_v33 = vadd.f32 %v4523_v37, %v4284_v18  ;;  %v4251_v5 = vpop.f32.mrf.mxu1 }
 0x4f2   : > { %v4285_v22 = vadd.f32 %v4251_v5, %v9447_v51  ;;  %v9619_v51 = vld [vmem:[%s10243_s6] ss:$0 sm:$0xff]  ;;  %v9639_v5 = vpop.f32.mrf.mxu0 }
 0x4f3   : > { %10589 = vst [vmem:[#allocation77_spill] sm:$0xff] %v9598_v33 }
 0x4f4   : > { %6852 = vmatmul.msk.f32.gmra.mxu1 %vm2897_vm4, %v5127_v19 }
 0x4f5   : > { %6885 = vmatmul.msk.f32.gmra.mxu2 %vm311_vm1, %v10590_v9 }
 0x4f8   : > { %v4526_v28 = vpop.f32.mrf.mxu2 }
 0x4f9   : > { %v9605_v62 = vadd.f32 %v4526_v28, %v4285_v22  ;;  %v5259_v54 = vpop.f32.mrf.mxu1  ;;  %v5131_v28 = vld [vmem:[#allocation3 + $0x112] sm:$0xff] }
 0x4fa   : > { %v5355_v60 = vadd.f32 %v5259_v54, %v9458_v23  ;;  %v10595_v54 = vld [vmem:[#allocation34_spill] sm:$0xff] }
 0x4fb   : > { %10591 = vst [vmem:[#allocation89_spill] sm:$0xff] %v9605_v62  ;;  %v5135_v62 = vld [vmem:[#allocation3 + $0x142] sm:$0xff] }
 0x4fc   : > { %6853 = vmatmul.msk.f32.gmra.mxu1 %vm2897_vm4, %v5128_v46  ;;  %v5391_v13 = vadd.f32 %v9611_v2, %v5355_v60  ;;  %v9646_v46 = vpop.f32.mrf.mxu3 }
 0x4fd   : > { %6886 = vmatmul.msk.f32.gmra.mxu2 %vm311_vm1, %v10592_v8 }
 0x500   : > { %v5544_v30 = vpop.f32.mrf.mxu2 }
 0x501   : > { %v5545_v23 = vadd.f32 %v9619_v51, %v5544_v30  ;;  %v5262_v57 = vpop.f32.mrf.mxu1 }
 0x502   : > { %v5356_v9 = vadd.f32 %v5262_v57, %v9469_v39 }
 0x503   : > { %v5640_v47 = vadd.f32 %v5545_v23, %v5391_v13 }
 0x504   : > { %6854 = vmatmul.msk.f32.gmra.mxu1 %vm2897_vm4, %v5129_v31  ;;  %v5392_v39 = vadd.f32 %v9611_v2, %v5356_v9 }
 0x505   : > { %v5672_v34 = vmax.f32 %v5640_v47, 0.0  ;;  %6887 = vmatmul.msk.f32.gmra.mxu2 %vm311_vm1, %v10593_v42 }
 0x507   : > { %5940 = vrot.lane.b32.xlu0 %v5672_v34, %s6957_s11 }
 0x508   : > { %v5547_v15 = vpop.f32.mrf.mxu2 }
 0x509   : > { %v5265_v7 = vpop.f32.mrf.mxu1  ;;  %v5548_v60 = vadd.f32 %v9619_v51, %v5547_v15 }
 0x50a   : > { %v5357_v55 = vadd.f32 %v5265_v7, %v9480_v45 }
 0x50c   : > { %6855 = vmatmul.msk.f32.gmra.mxu1 %vm2897_vm4, %v5130_v36  ;;  %v5393_v24 = vadd.f32 %v9611_v2, %v5357_v55  ;;  %v5641_v55 = vadd.f32 %v5548_v60, %v5392_v39 }
 0x50d   : > { %6888 = vmatmul.msk.f32.gmra.mxu2 %vm311_vm1, %v10594_v21 }
 0x50e   : > { %v9666_v9 = vmax.f32 %v5641_v55, 0.0 }
 0x510   : > { %v5550_v12 = vpop.f32.mrf.mxu2  ;;  %10597 = vst [vmem:[#allocation91_spill] sm:$0xff] %v9666_v9 }
 0x511   : > { %v5551_v18 = vadd.f32 %v9619_v51, %v5550_v12  ;;  %v5268_v37 = vpop.f32.mrf.mxu1  ;;  %v5132_v12 = vld [vmem:[#allocation3 + $0x122] sm:$0xff] }
 0x512   : > { %v5358_v22 = vadd.f32 %v5268_v37, %v9491_v50 }
 0x513   : > { %v5642_v19 = vadd.f32 %v5551_v18, %v5393_v24  ;;  %v9660_v24 = vpop.f32.mrf.mxu0 }
 0x514   : > { %6856 = vmatmul.msk.f32.gmra.mxu1 %vm2897_vm4, %v5131_v28  ;;  %v5394_v50 = vadd.f32 %v9611_v2, %v5358_v22 }
 0x515   : > { %v5674_v45 = vmax.f32 %v5642_v19, 0.0  ;;  %6889 = vmatmul.msk.f32.gmra.mxu2 %vm311_vm1, %v10595_v54  ;;  %v10596_v19 = vld [vmem:[#allocation40_spill] sm:$0xff] }
 0x517   : > { %v5720_v8 = vrot.slane %v5674_v45, 7  ;;  %v9668_v45 = vpop.f32.mrf.mxu3 }
 0x518   : > { %v5553_v30 = vpop.f32.mrf.mxu2 }
 0x519   : > { %v5554_v13 = vadd.f32 %v9619_v51, %v5553_v30  ;;  %v5899_v23 = vsel %vm5739_vm7, %v5720_v8, %v5672_v34  ;;  %v5871_v57 = vsel %vm5736_vm8, %v5720_v8, %v5672_v34  ;;  %v5843_v47 = vsel %vm5733_vm9, %v5720_v8, %v5672_v34  ;;  %v5271_v31 = vpop.f32.mrf.mxu1  ;;  %v5133_v30 = vld [vmem:[#allocation3 + $0x12a] sm:$0xff] }
 0x51a   : > { %5912 = vrot.lane.b32.xlu0 %v5899_v23, %s6958_s12  ;;  %v5815_v42 = vsel %vm5730_vm10, %v5720_v8, %v5672_v34  ;;  %v5787_v15 = vsel %vm5727_vm11, %v5720_v8, %v5672_v34  ;;  %v5759_v7 = vsel %vm5724_vm12, %v5720_v8, %v5672_v34  ;;  %v5722_v36 = vsel %vm5721_vm13, %v5720_v8, %v5672_v34  ;;  %v10598_v23 = vld [vmem:[#allocation47_spill] sm:$0xff] }
 0x51b   : > { %v5643_v21 = vadd.f32 %v5554_v13, %v5394_v50  ;;  %v5359_v37 = vadd.f32 %v5271_v31, %v9502_v4  ;;  %v9679_v31 = vpop.f32.mrf.mxu0 }
 0x51c   : > { %6857 = vmatmul.msk.f32.gmra.mxu1 %vm2897_vm4, %v5132_v12 }
 0x51d   : > { %v5675_v18 = vmax.f32 %v5643_v21, 0.0  ;;  %6890 = vmatmul.msk.f32.gmra.mxu2 %vm311_vm1, %v10596_v19  ;;  %v5395_v34 = vadd.f32 %v9611_v2, %v5359_v37 }
 0x51f   : > { %v5971_v22 = vrot.slane %v5675_v18, 7 }
 0x520   : > { %v5556_v28 = vpop.f32.mrf.mxu2 }
 0x521   : > { %v5557_v54 = vadd.f32 %v9619_v51, %v5556_v28  ;;  %v6148_v60 = vsel %vm5739_vm7, %v5971_v22, %v9666_v9  ;;  %v5274_v39 = vpop.f32.mrf.mxu1 }
 0x522   : > { %6161 = vrot.lane.b32.xlu2 %v6148_v60, %s6959_s13  ;;  %v5360_v50 = vadd.f32 %v5274_v39, %v9513_v49 }
 0x523   : > { %v5644_v4 = vadd.f32 %v5557_v54, %v5395_v34 }
 0x524   : > { %6858 = vmatmul.msk.f32.gmra.mxu1 %vm2897_vm4, %v5133_v30  ;;  %v5396_v21 = vadd.f32 %v9611_v2, %v5360_v50  ;;  %v10599_v30 = vld [vmem:[#allocation4_spill] sm:$0xff] }
 0x525   : > { %v5676_v13 = vmax.f32 %v5644_v4, 0.0  ;;  %6891 = vmatmul.msk.f32.gmra.mxu2 %vm311_vm1, %v10598_v23  ;;  %v5134_v4 = vld [vmem:[#allocation3 + $0x13a] sm:$0xff]  ;;  %v6036_v23 = vsel %vm5727_vm11, %v5971_v22, %v9666_v9 }
 0x527   : > { %v9681_v55 = vrot.slane %v5676_v13, 6 }
 0x528   : > { %v5559_v12 = vpop.f32.mrf.mxu2 }
 0x529   : > { %v5560_v18 = vadd.f32 %v9619_v51, %v5559_v12  ;;  %v5872_v37 = vsel %vm5739_vm7, %v9681_v55, %v5871_v57  ;;  %v5844_v49 = vsel %vm5736_vm8, %v9681_v55, %v5843_v47  ;;  %v5816_v19 = vsel %vm5733_vm9, %v9681_v55, %v5815_v42  ;;  %v5277_v28 = vpop.f32.mrf.mxu1  ;;  %v9700_v47 = vpop.f32.mrf.mxu3 }
 0x52a   : > { %5884 = vrot.lane.b32.xlu0 %v5872_v37, %s6960_s14  ;;  %v5788_v34 = vsel %vm5730_vm10, %v9681_v55, %v5787_v15  ;;  %v5760_v54 = vsel %vm5727_vm11, %v9681_v55, %v5759_v7  ;;  %v5927_v60 = vsel %vm5721_vm13, %v9681_v55, %v5720_v8  ;;  %v5725_v57 = vsel %vm5724_vm12, %v9681_v55, %v5722_v36 }
 0x52b   : > { %v5645_v39 = vadd.f32 %v5560_v18, %v5396_v21  ;;  %v5361_v42 = vadd.f32 %v5277_v28, %v9524_v11  ;;  %v6120_v8 = vsel %vm5736_vm8, %v5971_v22, %v9666_v9  ;;  %v6092_v7 = vsel %vm5733_vm9, %v5971_v22, %v9666_v9  ;;  %v9721_v18 = vpop.f32.mrf.mxu0 }
 0x52c   : > { %6859 = vmatmul.msk.f32.gmra.mxu1 %vm2897_vm4, %v5134_v4  ;;  %v6064_v36 = vsel %vm5730_vm10, %v5971_v22, %v9666_v9  ;;  %v6008_v21 = vsel %vm5724_vm12, %v5971_v22, %v9666_v9  ;;  %v5972_v12 = vsel %vm5721_vm13, %v5971_v22, %v9666_v9 }
 0x52d   : > { %v5677_v50 = vmax.f32 %v5645_v39, 0.0  ;;  %6892 = vmatmul.msk.f32.gmra.mxu2 %vm311_vm1, %v10599_v30  ;;  %v5397_v11 = vadd.f32 %v9611_v2, %v5361_v42 }
 0x52f   : > { %v9706_v15 = vrot.slane %v5677_v50, 6 }
 0x530   : > { %v5562_v13 = vpop.f32.mrf.mxu2 }
 0x531   : > { %v5563_v37 = vadd.f32 %v9619_v51, %v5562_v13  ;;  %v6121_v28 = vsel %vm5739_vm7, %v9706_v15, %v6120_v8  ;;  %v6093_v39 = vsel %vm5736_vm8, %v9706_v15, %v6092_v7  ;;  %v6065_v42 = vsel %vm5733_vm9, %v9706_v15, %v6064_v36  ;;  %v5280_v4 = vpop.f32.mrf.mxu1 }
 0x532   : > { %6133 = vrot.lane.b32.xlu2 %v6121_v28, %s6961_s15  ;;  %v6037_v50 = vsel %vm5730_vm10, %v9706_v15, %v6036_v23  ;;  %v6009_v30 = vsel %vm5727_vm11, %v9706_v15, %v6008_v21  ;;  %v5974_v13 = vsel %vm5724_vm12, %v9706_v15, %v5972_v12  ;;  %v6176_v8 = vsel %vm5721_vm13, %v9706_v15, %v5971_v22  ;;  %v9742_v28 = vpop.f32.mrf.mxu3  ;;  %v10600_v23 = vld [vmem:[#allocation5_spill] sm:$0xff] }
 0x533   : > { %v5646_v7 = vadd.f32 %v5563_v37, %v5397_v11  ;;  %v4813_v36 = vadd.f32 %v9623_v17, %v9358_v26  ;;  %v5362_v9 = vadd.f32 %v5280_v4, %v9535_v61  ;;  %v5136_v4 = vld [vmem:[#allocation3 + $0x152] sm:$0xff] }
 0x534   : > { %6860 = vmatmul.msk.f32.gmra.mxu1 %vm2897_vm4, %v5135_v62 }
 0x535   : > { %v5678_v33 = vmax.f32 %v5646_v7, 0.0  ;;  %6893 = vmatmul.msk.f32.gmra.mxu2 %vm311_vm1, %v10600_v23  ;;  %v5398_v12 = vadd.f32 %v9611_v2, %v5362_v9  ;;  %v5088_v22 = vadd.f32 %v9629_v44, %v4813_v36  ;;  %v10601_v36 = vld [vmem:[#allocation7_spill] sm:$0xff] }
 0x537   : > { %v5726_v21 = vrot.slane %v5678_v33, 5 }
 0x538   : > { %v5565_v38 = vpop.f32.mrf.mxu2 }
 0x539   : > { %v5566_v11 = vadd.f32 %v9619_v51, %v5565_v38  ;;  %v5845_v26 = vsel %vm5739_vm7, %v5726_v21, %v5844_v49  ;;  %v5817_v61 = vsel %vm5736_vm8, %v5726_v21, %v5816_v19  ;;  %v5789_v17 = vsel %vm5733_vm9, %v5726_v21, %v5788_v34  ;;  %v5283_v37 = vpop.f32.mrf.mxu1  ;;  %v9759_v38 = vpop.f32.mrf.mxu0 }
 0x53a   : > { %5856 = vrot.lane.b32.xlu0 %v5845_v26, %s6962_s16  ;;  %v5761_v62 = vsel %vm5730_vm10, %v5726_v21, %v5760_v54  ;;  %v5928_v33 = vsel %vm5724_vm12, %v5726_v21, %v5927_v60  ;;  %v5900_v9 = vsel %vm5721_vm13, %v5726_v21, %v9681_v55  ;;  %v5728_v44 = vsel %vm5727_vm11, %v5726_v21, %v5725_v57  ;;  %v9766_v54 = vpop.f32.mrf.mxu3 }
 0x53b   : > { %v5647_v49 = vadd.f32 %v5566_v11, %v5398_v12  ;;  %v4814_v19 = vadd.f32 %v9631_v29, %v9370_v53  ;;  %v5363_v34 = vadd.f32 %v5283_v37, %v5088_v22 }
 0x53c   : > { %6861 = vmatmul.msk.f32.gmra.mxu1 %vm2897_vm4, %v5136_v4 }
 0x53d   : > { %v5679_v7 = vmax.f32 %v5647_v49, 0.0  ;;  %6894 = vmatmul.msk.f32.gmra.mxu2 %vm311_vm1, %v10601_v36  ;;  %v5399_v55 = vadd.f32 %v9611_v2, %v5363_v34  ;;  %v5089_v23 = vadd.f32 %v9639_v5, %v4814_v19  ;;  %v5137_v34 = vld [vmem:[#allocation3 + $0x15a] sm:$0xff] }
 0x53f   : > { %v5975_v60 = vrot.slane %v5679_v7, 5  ;;  %v10602_v7 = vld [vmem:[#allocation9_spill] sm:$0xff] }
 0x540   : > { %v5568_v57 = vpop.f32.mrf.mxu2 }
 0x541   : > { %v5569_v12 = vadd.f32 %v9619_v51, %v5568_v57  ;;  %v6094_v53 = vsel %vm5739_vm7, %v5975_v60, %v6093_v39  ;;  %v6066_v29 = vsel %vm5736_vm8, %v5975_v60, %v6065_v42  ;;  %v6038_v22 = vsel %vm5733_vm9, %v5975_v60, %v6037_v50  ;;  %v5286_v11 = vpop.f32.mrf.mxu1  ;;  %v9782_v50 = vpop.f32.mrf.mxu0 }
 0x542   : > { %6105 = vrot.lane.b32.xlu2 %v6094_v53, %s6963_s17  ;;  %v6010_v26 = vsel %vm5730_vm10, %v5975_v60, %v6009_v30  ;;  %v5976_v37 = vsel %vm5727_vm11, %v5975_v60, %v5974_v13  ;;  %v6149_v49 = vsel %vm5721_vm13, %v5975_v60, %v9706_v15  ;;  %v6177_v5 = vsel %vm5724_vm12, %v5975_v60, %v6176_v8  ;;  %v9789_v36 = vpop.f32.mrf.mxu3 }
 0x543   : > { %v5648_v19 = vadd.f32 %v5569_v12, %v5399_v55  ;;  %v4815_v39 = vadd.f32 %v9646_v46, %v9382_v20  ;;  %v5364_v42 = vadd.f32 %v5286_v11, %v5089_v23 }
 0x544   : > { %6862 = vmatmul.msk.f32.gmra.mxu1 %vm2897_vm4, %v5137_v34 }
 0x545   : > { %v5680_v4 = vmax.f32 %v5648_v19, 0.0  ;;  %6895 = vmatmul.msk.f32.gmra.mxu2 %vm311_vm1, %v10602_v7  ;;  %v5400_v13 = vadd.f32 %v9611_v2, %v5364_v42  ;;  %v5090_v8 = vadd.f32 %v9660_v24, %v4815_v39 }
 0x547   : > { %v5729_v30 = vrot.slane %v5680_v4, 4 }
 0x548   : > { %v5571_v15 = vpop.f32.mrf.mxu2 }
 0x549   : > { %v5572_v20 = vadd.f32 %v9619_v51, %v5571_v15  ;;  %v5818_v46 = vsel %vm5739_vm7, %v5729_v30, %v5817_v61  ;;  %v5790_v55 = vsel %vm5736_vm8, %v5729_v30, %v5789_v17  ;;  %v5762_v57 = vsel %vm5733_vm9, %v5729_v30, %v5761_v62  ;;  %v5289_v23 = vpop.f32.mrf.mxu1  ;;  %v5138_v17 = vld [vmem:[#allocation3 + $0x16a] sm:$0xff]  ;;  %v9805_v34 = vpop.f32.mrf.mxu0 }
 0x54a   : > { %5828 = vrot.lane.b32.xlu0 %v5818_v46, %s6964_s18  ;;  %v5929_v12 = vsel %vm5727_vm11, %v5729_v30, %v5928_v33  ;;  %v5901_v53 = vsel %vm5724_vm12, %v5729_v30, %v5900_v9  ;;  %v5873_v24 = vsel %vm5721_vm13, %v5729_v30, %v5726_v21  ;;  %v5731_v11 = vsel %vm5730_vm10, %v5729_v30, %v5728_v44  ;;  %v10603_v62 = vld [vmem:[#allocation11_spill] sm:$0xff]  ;;  %v9818_v46 = vpop.f32.mrf.mxu3 }
 0x54b   : > { %v5649_v19 = vadd.f32 %v5572_v20, %v5400_v13  ;;  %v4816_v61 = vadd.f32 %v9668_v45, %v9394_v3  ;;  %v5365_v39 = vadd.f32 %v5289_v23, %v5090_v8 }
 0x54c   : > { %6863 = vmatmul.msk.f32.gmra.mxu1 %vm2897_vm4, %v5138_v17 }
 0x54d   : > { %v5681_v42 = vmax.f32 %v5649_v19, 0.0  ;;  %6896 = vmatmul.msk.f32.gmra.mxu2 %vm311_vm1, %v10603_v62  ;;  %v5401_v9 = vadd.f32 %v9611_v2, %v5365_v39  ;;  %v5091_v44 = vadd.f32 %v9679_v31, %v4816_v61  ;;  %v10604_v61 = vld [vmem:[#allocation13_spill] sm:$0xff] }
 0x54f   : > { %v5977_v33 = vrot.slane %v5681_v42, 4 }
 0x550   : > { %v5574_v21 = vpop.f32.mrf.mxu2 }
 0x551   : > { %v5575_v4 = vadd.f32 %v9619_v51, %v5574_v21  ;;  %v6067_v3 = vsel %vm5739_vm7, %v5977_v33, %v6066_v29  ;;  %v6039_v45 = vsel %vm5736_vm8, %v5977_v33, %v6038_v22  ;;  %v6011_v7 = vsel %vm5733_vm9, %v5977_v33, %v6010_v26  ;;  %v5292_v13 = vpop.f32.mrf.mxu1  ;;  %v5139_v26 = vld [vmem:[#allocation3 + $0x172] sm:$0xff]  ;;  %v9827_v39 = vpop.f32.mrf.mxu0 }
 0x552   : > { %6077 = vrot.lane.b32.xlu2 %v6067_v3, %s6965_s19  ;;  %v5978_v15 = vsel %vm5730_vm10, %v5977_v33, %v5976_v37  ;;  %v6150_v8 = vsel %vm5724_vm12, %v5977_v33, %v6149_v49  ;;  %v6122_v20 = vsel %vm5721_vm13, %v5977_v33, %v5975_v60  ;;  %v6178_v31 = vsel %vm5727_vm11, %v5977_v33, %v6177_v5 }
 0x553   : > { %v5650_v23 = vadd.f32 %v5575_v4, %v5401_v9  ;;  %v4817_v29 = vadd.f32 %v9700_v47, %v9406_v40  ;;  %v5366_v22 = vadd.f32 %v5292_v13, %v5091_v44  ;;  %v10605_v13 = vld [vmem:[#allocation15_spill] sm:$0xff] }
 0x554   : > { %6864 = vmatmul.msk.f32.gmra.mxu1 %vm2897_vm4, %v5139_v26 }
 0x555   : > { %v5682_v19 = vmax.f32 %v5650_v23, 0.0  ;;  %6897 = vmatmul.msk.f32.gmra.mxu2 %vm311_vm1, %v10604_v61  ;;  %v5402_v49 = vadd.f32 %v9611_v2, %v5366_v22  ;;  %v5092_v5 = vadd.f32 %v9721_v18, %v4817_v29 }
 0x557   : > { %v5732_v37 = vrot.slane %v5682_v19, 3 }
 0x558   : > { %v5577_v60 = vpop.f32.mrf.mxu2 }
 0x559   : > { %v5578_v17 = vadd.f32 %v9619_v51, %v5577_v60  ;;  %v5791_v40 = vsel %vm5739_vm7, %v5732_v37, %v5790_v55  ;;  %v5763_v47 = vsel %vm5736_vm8, %v5732_v37, %v5762_v57  ;;  %v5930_v42 = vsel %vm5730_vm10, %v5732_v37, %v5929_v12  ;;  %v5295_v62 = vpop.f32.mrf.mxu1  ;;  %v9840_v57 = vpop.f32.mrf.mxu3  ;;  %v10606_v60 = vld [vmem:[#allocation17_spill] sm:$0xff] }
 0x55a   : > { %5800 = vrot.lane.b32.xlu1 %v5791_v40, %s6966_s20  ;;  %v5902_v9 = vsel %vm5727_vm11, %v5732_v37, %v5901_v53  ;;  %v5874_v21 = vsel %vm5724_vm12, %v5732_v37, %v5873_v24  ;;  %v5846_v18 = vsel %vm5721_vm13, %v5732_v37, %v5729_v30  ;;  %v5734_v44 = vsel %vm5733_vm9, %v5732_v37, %v5731_v11  ;;  %v9857_v61 = vpop.f32.mrf.mxu0 }
 0x55b   : > { %v5651_v4 = vadd.f32 %v5578_v17, %v5402_v49  ;;  %v4818_v55 = vadd.f32 %v9742_v28, %v9418_v14  ;;  %v5367_v3 = vadd.f32 %v5295_v62, %v5092_v5  ;;  %v5142_v62 = vld [vmem:[#allocation3 + $0x19a] sm:$0xff] }
 0x55c   : > { %6865 = vmatmul.msk.f32.gmra.mxu1 %vm2897_vm4, %v9423_v27 }
 0x55d   : > { %v5683_v12 = vmax.f32 %v5651_v4, 0.0  ;;  %6898 = vmatmul.msk.f32.gmra.mxu2 %vm311_vm1, %v10605_v13  ;;  %v5403_v24 = vadd.f32 %v9611_v2, %v5367_v3  ;;  %v5093_v11 = vadd.f32 %v9759_v38, %v4818_v55 }
 0x55f   : > { %v5979_v53 = vrot.slane %v5683_v12, 3 }
 0x560   : > { %v5580_v30 = vpop.f32.mrf.mxu2 }
 0x561   : > { %v5581_v23 = vadd.f32 %v9619_v51, %v5580_v30  ;;  %v6040_v14 = vsel %vm5739_vm7, %v5979_v53, %v6039_v45  ;;  %v6012_v28 = vsel %vm5736_vm8, %v5979_v53, %v6011_v7  ;;  %v5980_v29 = vsel %vm5733_vm9, %v5979_v53, %v5978_v15  ;;  %v5298_v22 = vpop.f32.mrf.mxu1 }
 0x562   : > { %6049 = vrot.lane.b32.xlu2 %v6040_v14, %s6967_s21  ;;  %v6151_v27 = vsel %vm5727_vm11, %v5979_v53, %v6150_v8  ;;  %v6123_v26 = vsel %vm5724_vm12, %v5979_v53, %v6122_v20  ;;  %v6095_v19 = vsel %vm5721_vm13, %v5979_v53, %v5977_v33  ;;  %v6179_v38 = vsel %vm5730_vm10, %v5979_v53, %v6178_v31  ;;  %v9865_v8 = vpop.f32.mrf.mxu3  ;;  %v9880_v13 = vpop.f32.mrf.mxu0 }
 0x563   : > { %v5652_v49 = vadd.f32 %v5581_v23, %v5403_v24  ;;  %v4819_v45 = vadd.f32 %v9766_v54, %v9434_v59  ;;  %v5368_v7 = vadd.f32 %v5298_v22, %v5093_v11  ;;  %v10607_v24 = vld [vmem:[#allocation46_spill] sm:$0xff] }
 0x564   : > { %6866 = vmatmul.msk.f32.gmra.mxu1 %vm2897_vm4, %v9439_v6  ;;  %v5143_v22 = vld [vmem:[#allocation3 + $0x1a2] sm:$0xff] }
 0x565   : > { %v5684_v15 = vmax.f32 %v5652_v49, 0.0  ;;  %6899 = vmatmul.msk.f32.gmra.mxu2 %vm311_vm1, %v10606_v60  ;;  %v5404_v33 = vadd.f32 %v9611_v2, %v5368_v7  ;;  %v5094_v5 = vadd.f32 %v9782_v50, %v4819_v45  ;;  %v10608_v60 = vld [vmem:[#allocation58_spill] sm:$0xff] }
 0x567   : > { %v5735_v20 = vrot.slane %v5684_v15, 2 }
 0x568   : > { %v5583_v31 = vpop.f32.mrf.mxu2 }
 0x569   : > { %v5584_v17 = vadd.f32 %v9619_v51, %v5583_v31  ;;  %v5764_v59 = vsel %vm5739_vm7, %v5735_v20, %v5763_v47  ;;  %v5931_v54 = vsel %vm5733_vm9, %v5735_v20, %v5930_v42  ;;  %v5903_v40 = vsel %vm5730_vm10, %v5735_v20, %v5902_v9  ;;  %v5301_v6 = vpop.f32.mrf.mxu1 }
 0x56a   : > { %5772 = vrot.lane.b32.xlu0 %v5764_v59, %s6968_s22  ;;  %v5875_v4 = vsel %vm5727_vm11, %v5735_v20, %v5874_v21  ;;  %v5847_v55 = vsel %vm5724_vm12, %v5735_v20, %v5846_v18  ;;  %v5819_v3 = vsel %vm5721_vm13, %v5735_v20, %v5732_v37  ;;  %v5737_v50 = vsel %vm5736_vm8, %v5735_v20, %v5734_v44  ;;  %v9887_v44 = vpop.f32.mrf.mxu3 }
 0x56b   : > { %v5653_v12 = vadd.f32 %v5584_v17, %v5404_v33  ;;  %v4820_v47 = vadd.f32 %v9789_v36, %v9450_v43  ;;  %v5369_v42 = vadd.f32 %v5301_v6, %v5094_v5  ;;  %v9904_v33 = vpop.f32.mrf.mxu0 }
 0x56c   : > { %6867 = vmatmul.msk.f32.gmra.mxu1 %vm2897_vm4, %v5142_v62 }
 0x56d   : > { %v5685_v9 = vmax.f32 %v5653_v12, 0.0  ;;  %6900 = vmatmul.msk.f32.gmra.mxu2 %vm311_vm1, %v10607_v24  ;;  %v5405_v18 = vadd.f32 %v9611_v2, %v5369_v42  ;;  %v5095_v37 = vadd.f32 %v9805_v34, %v4820_v47 }
 0x56f   : > { %v5981_v21 = vrot.slane %v5685_v9, 2 }
 0x570   : > { %v5586_v30 = vpop.f32.mrf.mxu2 }
 0x571   : > { %v5587_v43 = vadd.f32 %v9619_v51, %v5586_v30  ;;  %v6013_v36 = vsel %vm5739_vm7, %v5981_v21, %v6012_v28  ;;  %v5982_v11 = vsel %vm5736_vm8, %v5981_v21, %v5980_v29  ;;  %v6152_v23 = vsel %vm5730_vm10, %v5981_v21, %v6151_v27  ;;  %v5304_v14 = vpop.f32.mrf.mxu1 }
 0x572   : > { %6021 = vrot.lane.b32.xlu2 %v6013_v36, %s6969_s23  ;;  %v6124_v49 = vsel %vm5727_vm11, %v5981_v21, %v6123_v26  ;;  %v6096_v34 = vsel %vm5724_vm12, %v5981_v21, %v6095_v19  ;;  %v6068_v45 = vsel %vm5721_vm13, %v5981_v21, %v5979_v53  ;;  %v6180_v7 = vsel %vm5733_vm9, %v5981_v21, %v6179_v38  ;;  %v4769_v47 = vpop.f32.mrf.mxu3 }
 0x573   : > { %v5654_v15 = vadd.f32 %v5587_v43, %v5405_v18  ;;  %v4821_v28 = vadd.f32 %v9818_v46, %v9461_v0  ;;  %v5370_v29 = vadd.f32 %v5304_v14, %v5095_v37 }
 0x574   : > { %6868 = vmatmul.msk.f32.gmra.mxu1 %vm2897_vm4, %v5143_v22 }
 0x575   : > { %v5686_v27 = vmax.f32 %v5654_v15, 0.0  ;;  %6901 = vmatmul.msk.f32.gmra.mxu2 %vm311_vm1, %v10608_v60  ;;  %v5406_v53 = vadd.f32 %v9611_v2, %v5370_v29  ;;  %v5096_v46 = vadd.f32 %v9827_v39, %v4821_v28  ;;  %vm5865_vm1 = vcmask 326916  }
 0x577   : > { %v5738_v26 = vrot.slane %v5686_v27, 1 }
 0x578   : > { %v5589_v0 = vpop.f32.mrf.mxu2 }
 0x579   : > { %v5590_v19 = vadd.f32 %v9619_v51, %v5589_v0  ;;  %v5932_v38 = vsel %vm5736_vm8, %v5738_v26, %v5931_v54  ;;  %v5904_v31 = vsel %vm5733_vm9, %v5738_v26, %v5903_v40  ;;  %v5876_v5 = vsel %vm5730_vm10, %v5738_v26, %v5875_v4  ;;  %v5307_v17 = vpop.f32.mrf.mxu1 }
 0x57a   : > { %v5848_v59 = vsel %vm5727_vm11, %v5738_v26, %v5847_v55  ;;  %v5820_v6 = vsel %vm5724_vm12, %v5738_v26, %v5819_v3  ;;  %v5792_v62 = vsel %vm5721_vm13, %v5738_v26, %v5735_v20  ;;  %v5740_v12 = vsel %vm5739_vm7, %v5738_v26, %v5737_v50  ;;  %v5044_v55 = vpop.f32.mrf.mxu0 }
 0x57b   : > { %v5655_v42 = vadd.f32 %v5590_v19, %v5406_v53  ;;  %5757 = vst.msk [vmem:[%s9909_s29] sm:$0xff] %vm2897_vm4, %v5740_v12  ;;  %v5371_v39 = vadd.f32 %v5307_v17, %v5096_v46  ;;  %v4822_v54 = vadd.f32 %v9840_v57, %v9472_v52 }
 0x57d   : > { %v5687_v9 = vmax.f32 %v5655_v42, 0.0  ;;  %v5407_v4 = vadd.f32 %v9611_v2, %v5371_v39  ;;  %v5097_v14 = vadd.f32 %v9857_v61, %v4822_v54  ;;  %v4825_v54 = vadd.f32 %v4769_v47, %v9505_v10 }
 0x57f   : > { %v5983_v40 = vrot.slane %v5687_v9, 1 }
 0x580   : > { %v5592_v24 = vpop.f32.mrf.mxu2 }
 0x581   : > { %v5593_v3 = vadd.f32 %v9619_v51, %v5592_v24  ;;  %v5984_v20 = vsel %vm5739_vm7, %v5983_v40, %v5982_v11  ;;  %v6153_v50 = vsel %vm5733_vm9, %v5983_v40, %v6152_v23  ;;  %v6125_v18 = vsel %vm5730_vm10, %v5983_v40, %v6124_v49  ;;  %v5310_v30 = vpop.f32.mrf.mxu1  ;;  %v4772_v11 = vpop.f32.mrf.mxu3 }
 0x582   : > { %5999 = vrot.lane.b32.xlu0 %v5984_v20, %s6970_s25  ;;  %v6097_v37 = vsel %vm5727_vm11, %v5983_v40, %v6096_v34  ;;  %v6069_v52 = vsel %vm5724_vm12, %v5983_v40, %v6068_v45  ;;  %v6041_v57 = vsel %vm5721_vm13, %v5983_v40, %v5981_v21  ;;  %v6181_v43 = vsel %vm5736_vm8, %v5983_v40, %v6180_v7  ;;  %v5047_v60 = vpop.f32.mrf.mxu0 }
 0x583   : > { %v5656_v36 = vadd.f32 %v5593_v3, %v5407_v4  ;;  %v5372_v23 = vadd.f32 %v5310_v30, %v5097_v14  ;;  %v4823_v49 = vadd.f32 %v9865_v8, %v9483_v35 }
 0x585   : > { %v5688_v22 = vmax.f32 %v5656_v36, 0.0  ;;  %v5408_v27 = vadd.f32 %v9611_v2, %v5372_v23  ;;  %v5098_v0 = vadd.f32 %v9880_v13, %v4823_v49  ;;  %v4826_v23 = vadd.f32 %v4772_v11, %v9516_v48 }
 0x587   : > { %v5933_v15 = vsel %vm5739_vm7, %v5688_v22, %v5932_v38  ;;  %v5905_v28 = vsel %vm5736_vm8, %v5688_v22, %v5904_v31  ;;  %v5877_v34 = vsel %vm5733_vm9, %v5688_v22, %v5876_v5  ;;  %v5849_v45 = vsel %vm5730_vm10, %v5688_v22, %v5848_v59 }
 0x588   : > { %v5595_v21 = vpop.f32.mrf.mxu2  ;;  %5942 = vrot.lane.b32.xlu1 %v5933_v15, %s6957_s11  ;;  %v5821_v7 = vsel %vm5727_vm11, %v5688_v22, %v5820_v6  ;;  %v5793_v61 = vsel %vm5724_vm12, %v5688_v22, %v5792_v62  ;;  %v5765_v29 = vsel %vm5721_vm13, %v5688_v22, %v5738_v26  ;;  %v4824_v38 = vadd.f32 %v9887_v44, %v9494_v32 }
 0x589   : > { %v5596_v35 = vadd.f32 %v9619_v51, %v5595_v21  ;;  %v5313_v8 = vpop.f32.mrf.mxu1  ;;  %v4775_v31 = vpop.f32.mrf.mxu3 }
 0x58a   : > { %v5373_v19 = vadd.f32 %v5313_v8, %v5098_v0  ;;  %v5099_v44 = vadd.f32 %v9904_v33, %v4824_v38  ;;  %v5050_v24 = vpop.f32.mrf.mxu0 }
 0x58b   : > { %v5657_v53 = vadd.f32 %v5596_v35, %v5408_v27  ;;  %v5101_v27 = vadd.f32 %v5047_v60, %v4826_v23 }
 0x58c   : > { %v5409_v42 = vadd.f32 %v9611_v2, %v5373_v19  ;;  %v4827_v19 = vadd.f32 %v4775_v31, %v9527_v25 }
 0x58d   : > { %v5689_v46 = vmax.f32 %v5657_v53, 0.0 }
 0x58f   : > { %v6154_v5 = vsel %vm5736_vm8, %v5689_v46, %v6153_v50  ;;  %v6126_v17 = vsel %vm5733_vm9, %v5689_v46, %v6125_v18  ;;  %v6098_v26 = vsel %vm5730_vm10, %v5689_v46, %v6097_v37  ;;  %v6070_v59 = vsel %vm5727_vm11, %v5689_v46, %v6069_v52 }
 0x590   : > { %v5598_v6 = vpop.f32.mrf.mxu2  ;;  %v6042_v62 = vsel %vm5724_vm12, %v5689_v46, %v6041_v57  ;;  %v6014_v12 = vsel %vm5721_vm13, %v5689_v46, %v5983_v40  ;;  %v9958_v13 = vsel %vm5739_vm7, %v5689_v46, %v6181_v43  ;;  %v5100_v18 = vadd.f32 %v5044_v55, %v4825_v54 }
 0x591   : > { %v5599_v32 = vadd.f32 %v9619_v51, %v5598_v6  ;;  %v5316_v39 = vpop.f32.mrf.mxu1  ;;  %v4778_v30 = vpop.f32.mrf.mxu3 }
 0x592   : > { %v5374_v4 = vadd.f32 %v5316_v39, %v5099_v44 }
 0x593   : > { %v5658_v9 = vadd.f32 %v5599_v32, %v5409_v42  ;;  %v5102_v42 = vadd.f32 %v5050_v24, %v4827_v19 }
 0x594   : > { %v5410_v50 = vadd.f32 %v9611_v2, %v5374_v4  ;;  %v4828_v4 = vadd.f32 %v4778_v30, %v9538_v41 }
 0x595   : > { %v5690_v3 = vmax.f32 %v5658_v9, 0.0 }
 0x597   : > { %v5741_v20 = vrot.slane %v5690_v3, 7 }
 0x598   : > { %v5601_v40 = vpop.f32.mrf.mxu2 }
 0x599   : > { %v5602_v37 = vadd.f32 %v9619_v51, %v5601_v40  ;;  %v5906_v52 = vsel %vm5739_vm7, %v5741_v20, %v5905_v28  ;;  %v5878_v57 = vsel %vm5736_vm8, %v5741_v20, %v5877_v34  ;;  %v5850_v33 = vsel %vm5733_vm9, %v5741_v20, %v5849_v45  ;;  %v5319_v43 = vpop.f32.mrf.mxu1  ;;  %v5053_v28 = vpop.f32.mrf.mxu0 }
 0x59a   : > { %5914 = vrot.lane.b32.xlu1 %v5906_v52, %s6958_s12  ;;  %v5822_v10 = vsel %vm5730_vm10, %v5741_v20, %v5821_v7  ;;  %v5794_v47 = vsel %vm5727_vm11, %v5741_v20, %v5793_v61  ;;  %v5766_v36 = vsel %vm5724_vm12, %v5741_v20, %v5765_v29  ;;  %v5742_v55 = vsel %vm5721_vm13, %v5741_v20, %v5688_v22  ;;  %v4781_v60 = vpop.f32.mrf.mxu3 }
 0x59b   : > { %v5659_v14 = vadd.f32 %v5602_v37, %v5410_v50  ;;  %v5375_v49 = vadd.f32 %v5319_v43, %v5100_v18  ;;  %v5103_v52 = vadd.f32 %v5053_v28, %v4828_v4  ;;  %v4829_v23 = vadd.f32 %v4781_v60, %v9546_v58 }
 0x59d   : > { %v5691_v15 = vmax.f32 %v5659_v14, 0.0  ;;  %v5411_v45 = vadd.f32 %v9611_v2, %v5375_v49  ;;  %v10008_v49 = vpop.permute.xlu0 %5940 }
 0x59f   : > { %v5985_v34 = vrot.slane %v5691_v15, 7 }
 0x5a0   : > { %v5604_v21 = vpop.f32.mrf.mxu2 }
 0x5a1   : > { %v5605_v35 = vadd.f32 %v9619_v51, %v5604_v21  ;;  %v6155_v7 = vsel %vm5739_vm7, %v5985_v34, %v6154_v5  ;;  %v6127_v61 = vsel %vm5736_vm8, %v5985_v34, %v6126_v17  ;;  %v6099_v29 = vsel %vm5733_vm9, %v5985_v34, %v6098_v26  ;;  %v5322_v22 = vpop.f32.mrf.mxu1  ;;  %v5056_v32 = vpop.f32.mrf.mxu0 }
 0x5a2   : > { %6163 = vrot.lane.b32.xlu0 %v6155_v7, %s6959_s13  ;;  %v6071_v48 = vsel %vm5730_vm10, %v5985_v34, %v6070_v59  ;;  %v6043_v11 = vsel %vm5727_vm11, %v5985_v34, %v6042_v62  ;;  %v6015_v8 = vsel %vm5724_vm12, %v5985_v34, %v6014_v12  ;;  %v5986_v53 = vsel %vm5721_vm13, %v5985_v34, %v5689_v46  ;;  %v4784_v3 = vpop.f32.mrf.mxu3 }
 0x5a3   : > { %v5660_v0 = vadd.f32 %v5605_v35, %v5411_v45  ;;  %v5376_v38 = vadd.f32 %v5322_v22, %v5101_v27  ;;  %v5104_v7 = vadd.f32 %v5056_v32, %v4829_v23 }
 0x5a5   : > { %v5692_v5 = vmax.f32 %v5660_v0, 0.0  ;;  %v5412_v26 = vadd.f32 %v9611_v2, %v5376_v38  ;;  %v4830_v0 = vadd.f32 %v4784_v3, %v9554_v1  ;;  %v10021_v19 = vpop.permute.xlu0 %5912 }
 0x5a7   : > { %v5743_v17 = vrot.slane %v5692_v5, 6 }
 0x5a8   : > { %v5607_v6 = vpop.f32.mrf.mxu2 }
 0x5a9   : > { %v5608_v59 = vadd.f32 %v9619_v51, %v5607_v6  ;;  %v5879_v62 = vsel %vm5739_vm7, %v5743_v17, %v5878_v57  ;;  %v5851_v12 = vsel %vm5736_vm8, %v5743_v17, %v5850_v33  ;;  %v5823_v46 = vsel %vm5733_vm9, %v5743_v17, %v5822_v10  ;;  %v5325_v44 = vpop.f32.mrf.mxu1 }
 0x5aa   : > { %5886 = vrot.lane.b32.xlu1 %v5879_v62, %s6960_s14  ;;  %v5795_v25 = vsel %vm5730_vm10, %v5743_v17, %v5794_v47  ;;  %v5767_v31 = vsel %vm5727_vm11, %v5743_v17, %v5766_v36  ;;  %v5934_v39 = vsel %vm5721_vm13, %v5743_v17, %v5741_v20  ;;  %v5744_v9 = vsel %vm5724_vm12, %v5743_v17, %v5742_v55  ;;  %v5059_v55 = vpop.f32.mrf.mxu0  ;;  %v4787_v45 = vpop.f32.mrf.mxu3 }
 0x5ab   : > { %v5661_v54 = vadd.f32 %v5608_v59, %v5412_v26  ;;  %v5377_v24 = vadd.f32 %v5325_v44, %v5102_v42  ;;  %v5105_v59 = vadd.f32 %v5059_v55, %v4830_v0 }
 0x5ad   : > { %v5693_v50 = vmax.f32 %v5661_v54, 0.0  ;;  %v5413_v18 = vadd.f32 %v9611_v2, %v5377_v24  ;;  %v10034_v54 = vpop.permute.xlu0 %5884 }
 0x5af   : > { %v5987_v40 = vrot.slane %v5693_v50, 6 }
 0x5b0   : > { %v5610_v37 = vpop.f32.mrf.mxu2 }
 0x5b1   : > { %v5611_v57 = vadd.f32 %v9619_v51, %v5610_v37  ;;  %v6128_v33 = vsel %vm5739_vm7, %v5987_v40, %v6127_v61  ;;  %v6100_v43 = vsel %vm5736_vm8, %v5987_v40, %v6099_v29  ;;  %v6072_v20 = vsel %vm5733_vm9, %v5987_v40, %v6071_v48  ;;  %v5328_v10 = vpop.f32.mrf.mxu1 }
 0x5b2   : > { %6135 = vrot.lane.b32.xlu0 %v6128_v33, %s6961_s15  ;;  %v6044_v41 = vsel %vm5730_vm10, %v5987_v40, %v6043_v11  ;;  %v6016_v30 = vsel %vm5727_vm11, %v5987_v40, %v6015_v8  ;;  %v5988_v47 = vsel %vm5724_vm12, %v5987_v40, %v5986_v53  ;;  %v6183_v36 = vsel %vm5721_vm13, %v5987_v40, %v5985_v34  ;;  %v5062_v5 = vpop.f32.mrf.mxu0  ;;  %v4790_v62 = vpop.f32.mrf.mxu3 }
 0x5b3   : > { %v5662_v14 = vadd.f32 %v5611_v57, %v5413_v18  ;;  %v5378_v15 = vadd.f32 %v5328_v10, %v5103_v52  ;;  %v10039_v18 = vld [vmem:[%s10241_s4] ss:$0 sm:$0xff]  ;;  %v4832_v23 = vadd.f32 %v4790_v62, %v9571_v56 }
 0x5b4   : > { %v10045_v57 = vld [vmem:[%s10243_s6] ss:$0 sm:$0xff] }
 0x5b5   : > { %v5694_v28 = vmax.f32 %v5662_v14, 0.0  ;;  %v5414_v27 = vadd.f32 %v9611_v2, %v5378_v15  ;;  %v5857_v15 = vpop.permute.xlu0 %5856 }
 0x5b7   : > { %v5745_v21 = vrot.slane %v5694_v28, 5 }
 0x5b8   : > { %v5613_v35 = vpop.f32.mrf.mxu2 }
 0x5b9   : > { %v5614_v61 = vadd.f32 %v9619_v51, %v5613_v35  ;;  %v5852_v29 = vsel %vm5739_vm7, %v5745_v21, %v5851_v12  ;;  %v5824_v34 = vsel %vm5736_vm8, %v5745_v21, %v5823_v46  ;;  %v5796_v22 = vsel %vm5733_vm9, %v5745_v21, %v5795_v25  ;;  %v5331_v48 = vpop.f32.mrf.mxu1 }
 0x5ba   : > { %5858 = vrot.lane.b32.xlu1 %v5852_v29, %s6962_s16  ;;  %v5768_v58 = vsel %vm5730_vm10, %v5745_v21, %v5767_v31  ;;  %v5907_v11 = vsel %vm5721_vm13, %v5745_v21, %v5743_v17  ;;  %v5935_v8 = vsel %vm5724_vm12, %v5745_v21, %v5934_v39  ;;  %v5746_v53 = vsel %vm5727_vm11, %v5745_v21, %v5744_v9  ;;  %v5065_v3 = vpop.f32.mrf.mxu0  ;;  %v4793_v55 = vpop.f32.mrf.mxu3 }
 0x5bb   : > { %v5663_v60 = vadd.f32 %v5614_v61, %v5414_v27  ;;  %v5379_v38 = vadd.f32 %v5331_v48, %v5104_v7  ;;  %v5107_v61 = vadd.f32 %v5065_v3, %v4832_v23  ;;  %v4833_v0 = vadd.f32 %v4793_v55, %v9581_v63 }
 0x5bd   : > { %v5695_v26 = vmax.f32 %v5663_v60, 0.0  ;;  %v5415_v42 = vadd.f32 %v9611_v2, %v5379_v38  ;;  %v5829_v38 = vpop.permute.xlu0 %5828 }
 0x5bf   : > { %v5989_v6 = vrot.slane %v5695_v26, 5 }
 0x5c0   : > { %v5616_v32 = vpop.f32.mrf.mxu2 }
 0x5c1   : > { %v5617_v17 = vadd.f32 %v9619_v51, %v5616_v32  ;;  %v6101_v12 = vsel %vm5739_vm7, %v5989_v6, %v6100_v43  ;;  %v6073_v46 = vsel %vm5736_vm8, %v5989_v6, %v6072_v20  ;;  %v6045_v44 = vsel %vm5733_vm9, %v5989_v6, %v6044_v41  ;;  %v5334_v1 = vpop.f32.mrf.mxu1 }
 0x5c2   : > { %6107 = vrot.lane.b32.xlu0 %v6101_v12, %s6963_s17  ;;  %v6017_v25 = vsel %vm5730_vm10, %v5989_v6, %v6016_v30  ;;  %v5990_v31 = vsel %vm5727_vm11, %v5989_v6, %v5988_v47  ;;  %v6156_v2 = vsel %vm5721_vm13, %v5989_v6, %v5987_v40  ;;  %v6184_v39 = vsel %vm5724_vm12, %v5989_v6, %v6183_v36  ;;  %v4796_v26 = vpop.f32.mrf.mxu3 }
 0x5c3   : > { %v5664_v9 = vadd.f32 %v5617_v17, %v5415_v42  ;;  %v4831_v51 = vadd.f32 %v4787_v45, %v9562_v16  ;;  %v5380_v4 = vadd.f32 %v5334_v1, %v5105_v59 }
 0x5c5   : > { %v5696_v24 = vmax.f32 %v5664_v9, 0.0  ;;  %v5416_v37 = vadd.f32 %v10039_v18, %v5380_v4  ;;  %v5106_v40 = vadd.f32 %v5062_v5, %v4831_v51  ;;  %v10609_v51 = vld [vmem:[#allocation73_spill] sm:$0xff] }
 0x5c6   : > { %v4834_v4 = vadd.f32 %v4796_v26, %v10609_v51 }
 0x5c7   : > { %v5747_v50 = vrot.slane %v5696_v24, 4 }
 0x5c8   : > { %v5619_v52 = vpop.f32.mrf.mxu2 }
 0x5c9   : > { %v5620_v16 = vadd.f32 %v10045_v57, %v5619_v52  ;;  %v5825_v33 = vsel %vm5739_vm7, %v5747_v50, %v5824_v34  ;;  %v5797_v43 = vsel %vm5736_vm8, %v5747_v50, %v5796_v22  ;;  %v5769_v20 = vsel %vm5733_vm9, %v5747_v50, %v5768_v58  ;;  %v5337_v10 = vpop.f32.mrf.mxu1 }
 0x5ca   : > { %5830 = vrot.lane.b32.xlu1 %v5825_v33, %s6964_s18  ;;  %v5880_v41 = vsel %vm5721_vm13, %v5747_v50, %v5745_v21  ;;  %v5908_v30 = vsel %vm5724_vm12, %v5747_v50, %v5907_v11  ;;  %v5936_v47 = vsel %vm5727_vm11, %v5747_v50, %v5935_v8  ;;  %v5748_v36 = vsel %vm5730_vm10, %v5747_v50, %v5746_v53  ;;  %v5068_v21 = vpop.f32.mrf.mxu0  ;;  %v4799_v52 = vpop.f32.mrf.mxu3 }
 0x5cb   : > { %v5665_v14 = vadd.f32 %v5620_v16, %v5416_v37  ;;  %v5381_v28 = vadd.f32 %v5337_v10, %v5106_v40  ;;  %v5108_v17 = vadd.f32 %v5068_v21, %v4833_v0  ;;  %v10611_v0 = vld [vmem:[#allocation89_spill] sm:$0xff] }
 0x5cd   : > { %v5697_v45 = vmax.f32 %v5665_v14, 0.0  ;;  %v5417_v35 = vadd.f32 %v10039_v18, %v5381_v28 }
 0x5cf   : > { %v10057_v27 = vrot.slane %v5697_v45, 4  ;;  %v10610_v45 = vld [vmem:[#allocation77_spill] sm:$0xff] }
 0x5d0   : > { %v5622_v7 = vpop.f32.mrf.mxu2 }
 0x5d1   : > { %v5623_v29 = vadd.f32 %v10045_v57, %v5622_v7  ;;  %v6074_v34 = vsel %vm5739_vm7, %v10057_v27, %v6073_v46  ;;  %v6046_v22 = vsel %vm5736_vm8, %v10057_v27, %v6045_v44  ;;  %v6018_v56 = vsel %vm5733_vm9, %v10057_v27, %v6017_v25  ;;  %v5340_v48 = vpop.f32.mrf.mxu1 }
 0x5d2   : > { %6079 = vrot.lane.b32.xlu0 %v6074_v34, %s6965_s19  ;;  %v5992_v58 = vsel %vm5730_vm10, %v10057_v27, %v5990_v31  ;;  %v6129_v11 = vsel %vm5721_vm13, %v10057_v27, %v5989_v6  ;;  %v6157_v8 = vsel %vm5724_vm12, %v10057_v27, %v6156_v2  ;;  %v6185_v53 = vsel %vm5727_vm11, %v10057_v27, %v6184_v39  ;;  %v5071_v39 = vpop.f32.mrf.mxu0  ;;  %v4802_v34 = vpop.f32.mrf.mxu3 }
 0x5d3   : > { %v5666_v60 = vadd.f32 %v5623_v29, %v5417_v35  ;;  %v5382_v5 = vadd.f32 %v5340_v48, %v5107_v61  ;;  %v4835_v35 = vadd.f32 %v4799_v52, %v10610_v45 }
 0x5d5   : > { %v5698_v42 = vmax.f32 %v5666_v60, 0.0  ;;  %v5418_v59 = vadd.f32 %v10039_v18, %v5382_v5 }
 0x5d7   : > { %v10077_v32 = vrot.slane %v5698_v42, 3 }
 0x5d8   : > { %v5625_v62 = vpop.f32.mrf.mxu2 }
 0x5d9   : > { %v5626_v6 = vadd.f32 %v10045_v57, %v5625_v62  ;;  %v5798_v12 = vsel %vm5739_vm7, %v10077_v32, %v5797_v43  ;;  %v5770_v46 = vsel %vm5736_vm8, %v10077_v32, %v5769_v20  ;;  %v5853_v63 = vsel %vm5721_vm13, %v10077_v32, %v5747_v50  ;;  %v5343_v44 = vpop.f32.mrf.mxu1  ;;  %v5801_v50 = vpop.permute.xlu1 %5800 }
 0x5da   : > { %5802 = vrot.lane.b32.xlu2 %v5798_v12, %s6966_s20  ;;  %v5881_v1 = vsel %vm5724_vm12, %v10077_v32, %v5880_v41  ;;  %v5909_v25 = vsel %vm5727_vm11, %v10077_v32, %v5908_v30  ;;  %v5937_v31 = vsel %vm5730_vm10, %v10077_v32, %v5936_v47  ;;  %v5750_v2 = vsel %vm5733_vm9, %v10077_v32, %v5748_v36 }
 0x5db   : > { %v5667_v9 = vadd.f32 %v5626_v6, %v5418_v59  ;;  %v5383_v24 = vadd.f32 %v5343_v44, %v5108_v17  ;;  %v5109_v43 = vadd.f32 %v5071_v39, %v4834_v4 }
 0x5dc   : > { %v5773_v3 = vpop.permute.xlu0 %5772 }
 0x5dd   : > { %v5699_v37 = vmax.f32 %v5667_v9, 0.0  ;;  %5782 = vst.msk [vmem:[%s9909_s29 - $0x1] sm:$0xfe] %vm5781_vm14, %v5773_v3  ;;  %v5419_v16 = vadd.f32 %v10039_v18, %v5383_v24  ;;  %vm6058_vm14 = vcmask 720514  }
 0x5de   : > { %5810 = vst.msk [vmem:[%s9909_s29 - $0x2] sm:$0xfc] %vm5809_vm15, %v5801_v50  ;;  %vm6086_vm15 = vcmask 786115  }
 0x5df   : > { %v5993_v40 = vrot.slane %v5699_v37, 3  ;;  %5838 = vst.msk [vmem:[%s9909_s29 - $0x3] sm:$0xf8] %vm5837_vm0, %v5829_v38  ;;  %v4836_v38 = vadd.f32 %v4802_v34, %v10611_v0  ;;  %vm6114_vm0 = vcmask 851716  }
 0x5e0   : > { %5866 = vst.msk [vmem:[%s9909_s29 - $0x4] sm:$0xf0] %vm5865_vm1, %v5857_v15  ;;  %v5628_v33 = vpop.f32.mrf.mxu2  ;;  %v5074_v15 = vpop.f32.mrf.mxu0  ;;  %vm6142_vm1 = vcmask 917317  }
 0x5e1   : > { %v5629_v20 = vadd.f32 %v10045_v57, %v5628_v33  ;;  %v6047_v10 = vsel %vm5739_vm7, %v5993_v40, %v6046_v22  ;;  %v6019_v41 = vsel %vm5736_vm8, %v5993_v40, %v6018_v56  ;;  %v5994_v30 = vsel %vm5733_vm9, %v5993_v40, %v5992_v58  ;;  %5894 = vst.msk [vmem:[%s9909_s29 - $0x5] sm:$0xe0] %vm5893_vm2, %v10034_v54  ;;  %v5346_v47 = vpop.f32.mrf.mxu1 }
 0x5e2   : > { %6051 = vrot.lane.b32.xlu0 %v6047_v10, %s6967_s21  ;;  %v6102_v36 = vsel %vm5721_vm13, %v5993_v40, %v10057_v27  ;;  %v6130_v55 = vsel %vm5724_vm12, %v5993_v40, %v6129_v11  ;;  %v6158_v14 = vsel %vm5727_vm11, %v5993_v40, %v6157_v8  ;;  %v6186_v23 = vsel %vm5730_vm10, %v5993_v40, %v6185_v53 }
 0x5e3   : > { %v5668_v28 = vadd.f32 %v5629_v20, %v5419_v16  ;;  %5922 = vst.msk [vmem:[%s9909_s29 - $0x6] sm:$0xc0] %vm5921_vm3, %v10021_v19  ;;  %v5384_v7 = vadd.f32 %v5346_v47, %v5109_v43  ;;  %v5110_v21 = vadd.f32 %v5074_v15, %v4835_v35  ;;  %vm6170_vm2 = vcmask 982918  }
 0x5e4   : > { %5950 = vst.msk [vmem:[%s9909_s29 - $0x7] sm:$0x80] %vm5949_vm5, %v10008_v49  ;;  %vm5785_vm3 = vcmask 122944   ;;  %vm5813_vm5 = vcmask 189568  }
 0x5e5   : > { %v5700_v54 = vmax.f32 %v5668_v28, 0.0  ;;  %v5420_v27 = vadd.f32 %v10039_v18, %v5384_v7  ;;  %v10612_v28 = vld [vmem:[#allocation91_spill] sm:$0xff] }
 0x5e7   : > { %v5751_v61 = vrot.slane %v5700_v54, 2 }
 0x5e8   : > { %v5631_v29 = vpop.f32.mrf.mxu2  ;;  %v5077_v26 = vpop.f32.mrf.mxu0 }
 0x5e9   : > { %v5632_v22 = vadd.f32 %v10045_v57, %v5631_v29  ;;  %v5771_v56 = vsel %vm5739_vm7, %v5751_v61, %v5770_v46  ;;  %v5826_v19 = vsel %vm5721_vm13, %v5751_v61, %v10077_v32  ;;  %v5854_v48 = vsel %vm5724_vm12, %v5751_v61, %v5853_v63  ;;  %v5349_v58 = vpop.f32.mrf.mxu1 }
 0x5ea   : > { %5774 = vrot.lane.b32.xlu0 %v5771_v56, %s6968_s22  ;;  %v5882_v49 = vsel %vm5727_vm11, %v5751_v61, %v5881_v1  ;;  %v5910_v11 = vsel %vm5730_vm10, %v5751_v61, %v5909_v25  ;;  %v5938_v8 = vsel %vm5733_vm9, %v5751_v61, %v5937_v31  ;;  %v5752_v53 = vsel %vm5736_vm8, %v5751_v61, %v5750_v2 }
 0x5eb   : > { %v5669_v60 = vadd.f32 %v5632_v22, %v5420_v27  ;;  %v5385_v5 = vadd.f32 %v5349_v58, %v5110_v21  ;;  %v5111_v59 = vadd.f32 %v5077_v26, %v4836_v38 }
 0x5ed   : > { %v5701_v42 = vmax.f32 %v5669_v60, 0.0  ;;  %v5421_v62 = vadd.f32 %v10039_v18, %v5385_v5 }
 0x5ef   : > { %v5995_v32 = vrot.slane %v5701_v42, 2 }
 0x5f0   : > { %v5634_v17 = vpop.f32.mrf.mxu2 }
 0x5f1   : > { %v5635_v6 = vadd.f32 %v10045_v57, %v5634_v17  ;;  %v6020_v12 = vsel %vm5739_vm7, %v5995_v32, %v6019_v41  ;;  %v5996_v46 = vsel %vm5736_vm8, %v5995_v32, %v5994_v30  ;;  %v6075_v63 = vsel %vm5721_vm13, %v5995_v32, %v5993_v40  ;;  %v5352_v44 = vpop.f32.mrf.mxu1 }
 0x5f2   : > { %6023 = vrot.lane.b32.xlu0 %v6020_v12, %s6969_s23  ;;  %v6103_v1 = vsel %vm5724_vm12, %v5995_v32, %v6102_v36  ;;  %v6131_v25 = vsel %vm5727_vm11, %v5995_v32, %v6130_v55  ;;  %v6159_v31 = vsel %vm5730_vm10, %v5995_v32, %v6158_v14  ;;  %v6187_v2 = vsel %vm5733_vm9, %v5995_v32, %v6186_v23  ;;  %v6162_v23 = vpop.permute.xlu2 %6161 }
 0x5f3   : > { %v5670_v39 = vadd.f32 %v5635_v6, %v5421_v62  ;;  %v5386_v9 = vadd.f32 %v5352_v44, %v5111_v59 }
 0x5f4   : > { %v6000_v35 = vpop.permute.xlu0 %5999 }
 0x5f5   : > { %v5702_v51 = vmax.f32 %v5670_v39, 0.0  ;;  %v5422_v24 = vadd.f32 %v10039_v18, %v5386_v9 }
 0x5f7   : > { %v5753_v4 = vrot.slane %v5702_v51, 1 }
 0x5f8   : > { %v5637_v3 = vpop.f32.mrf.mxu2 }
 0x5f9   : > { %v5638_v50 = vadd.f32 %v10045_v57, %v5637_v3  ;;  %5776 = vrot.lane.b32.xlu1 %v5753_v4, %s6968_s22  ;;  %v5799_v37 = vsel %vm5721_vm13, %v5753_v4, %v5751_v61  ;;  %v5827_v52 = vsel %vm5724_vm12, %v5753_v4, %v5826_v19  ;;  %v5855_v40 = vsel %vm5727_vm11, %v5753_v4, %v5854_v48 }
 0x5fa   : > { %5804 = vrot.lane.b32.xlu2 %v5799_v37, %s6966_s20  ;;  %6191 = vrot.lane.b32.xlu0 %v9958_v13, %s6971_s26  ;;  %v5883_v16 = vsel %vm5730_vm10, %v5753_v4, %v5882_v49  ;;  %v5911_v18 = vsel %vm5733_vm9, %v5753_v4, %v5910_v11  ;;  %v5939_v57 = vsel %vm5736_vm8, %v5753_v4, %v5938_v8  ;;  %v6134_v15 = vpop.permute.xlu2 %6133  ;;  %v5943_v27 = vpop.permute.xlu1 %5942 }
 0x5fb   : > { %v5671_v33 = vadd.f32 %v5638_v50, %v5422_v24  ;;  %v5754_v43 = vsel %vm5739_vm7, %v5753_v4, %v5752_v53 }
 0x5fc   : > { %5758 = vst.msk [vmem:[%s9909_s29 + $0x8] sm:$0xff] %vm2897_vm4, %v5754_v43  ;;  %vm5783_vm4 = vcmask 130112  }
 0x5fd   : > { %v5703_v20 = vmax.f32 %v5671_v33, 0.0 }
 0x5ff   : > { %v5997_v10 = vrot.slane %v5703_v20, 1 }
 0x601   : > { %6025 = vrot.lane.b32.xlu1 %v5997_v10, %s6969_s23  ;;  %v5998_v41 = vsel %vm5739_vm7, %v5997_v10, %v5996_v46  ;;  %v6048_v30 = vsel %vm5721_vm13, %v5997_v10, %v5995_v32  ;;  %v6076_v13 = vsel %vm5724_vm12, %v5997_v10, %v6075_v63  ;;  %v6104_v47 = vsel %vm5727_vm11, %v5997_v10, %v6103_v1 }
 0x602   : > { %5832 = vrot.lane.b32.xlu2 %v5827_v52, %s6964_s18  ;;  %v6132_v36 = vsel %vm5730_vm10, %v5997_v10, %v6131_v25  ;;  %v6160_v55 = vsel %vm5733_vm9, %v5997_v10, %v6159_v31  ;;  %v6188_v14 = vsel %vm5736_vm8, %v5997_v10, %v6187_v2  ;;  %v6106_v45 = vpop.permute.xlu2 %6105  ;;  %vm5839_vm7 = vcmask 261312  }
 0x603   : > { %vm5867_vm8 = vcmask 326912   ;;  %vm5895_vm9 = vcmask 392512   ;;  %vm5923_vm10 = vcmask 458112   ;;  %vm5951_vm11 = vcmask 523712  }
 0x604   : > { %vm6005_vm12 = vcmask 589312   ;;  %vm6030_vm13 = vcmask 654913  }
 0x609   : > { %6001 = vrot.lane.b32.xlu1 %v5998_v41, %s6970_s25 }
 0x60a   : > { %5860 = vrot.lane.b32.xlu2 %v5855_v40, %s6962_s16  ;;  %v6078_v7 = vpop.permute.xlu2 %6077 }
 0x60c   : > { %v5915_v22 = vpop.permute.xlu1 %5914 }
 0x611   : > { %6053 = vrot.lane.b32.xlu1 %v6048_v30, %s6967_s21 }
 0x612   : > { %5888 = vrot.lane.b32.xlu2 %v5883_v16, %s6960_s14  ;;  %v6050_v61 = vpop.permute.xlu2 %6049 }
 0x614   : > { %v10179_v54 = vpop.permute.xlu0 %6163 }
 0x619   : > { %6081 = vrot.lane.b32.xlu1 %v6076_v13, %s6965_s19 }
 0x61a   : > { %5916 = vrot.lane.b32.xlu2 %v5911_v18, %s6958_s12  ;;  %v6022_v29 = vpop.permute.xlu2 %6021 }
 0x61c   : > { %v5887_v48 = vpop.permute.xlu1 %5886 }
 0x621   : > { %6109 = vrot.lane.b32.xlu1 %v6104_v47, %s6963_s17 }
 0x622   : > { %5944 = vrot.lane.b32.xlu2 %v5939_v57, %s6957_s11 }
 0x624   : > { %v10182_v21 = vpop.permute.xlu0 %6135 }
 0x629   : > { %6137 = vrot.lane.b32.xlu1 %v6132_v36, %s6961_s15 }
 0x62a   : > { %6189 = vrot.lane.b32.xlu2 %v10612_v28, %s6971_s26 }
 0x62c   : > { %v5859_v11 = vpop.permute.xlu1 %5858 }
 0x631   : > { %6165 = vrot.lane.b32.xlu1 %v6160_v55, %s6959_s13 }
 0x634   : > { %v10184_v34 = vpop.permute.xlu0 %6107  ;;  %v5803_v56 = vpop.permute.xlu2 %5802 }
 0x639   : > { %6193 = vrot.lane.b32.xlu1 %v6188_v14, %s6971_s26 }
 0x63c   : > { %v5831_v60 = vpop.permute.xlu1 %5830 }
 0x644   : > { %v10186_v19 = vpop.permute.xlu0 %6079 }
 0x654   : > { %v5805_v58 = vpop.permute.xlu2 %5804  ;;  %v10188_v49 = vpop.permute.xlu0 %6051 }
 0x65c   : > { %v5833_v8 = vpop.permute.xlu2 %5832  ;;  %v5775_v53 = vpop.permute.xlu0 %5774 }
 0x65d   : > { %5784 = vst.msk [vmem:[%s9909_s29 + $0x7] sm:$0xff] %vm5783_vm4, %v5775_v53  ;;  %vm5841_vm4 = vcmask 256192  }
 0x65e   : > { %5812 = vst.msk [vmem:[%s9909_s29 + $0x6] sm:$0xff] %vm5811_vm6, %v5803_v56  ;;  %vm5869_vm6 = vcmask 322816  }
 0x65f   : > { %5840 = vst.msk [vmem:[%s9909_s29 + $0x5] sm:$0xff] %vm5839_vm7, %v5831_v60  ;;  %vm5897_vm7 = vcmask 389440  }
 0x660   : > { %5868 = vst.msk [vmem:[%s9909_s29 + $0x4] sm:$0xff] %vm5867_vm8, %v5859_v11  ;;  %vm5925_vm8 = vcmask 456064  }
 0x661   : > { %5896 = vst.msk [vmem:[%s9909_s29 + $0x3] sm:$0xff] %vm5895_vm9, %v5887_v48  ;;  %vm5953_vm9 = vcmask 522688  }
 0x662   : > { %5924 = vst.msk [vmem:[%s9909_s29 + $0x2] sm:$0xff] %vm5923_vm10, %v5915_v22  ;;  %vm6032_vm10 = vcmask 654912  }
 0x663   : > { %5952 = vst.msk [vmem:[%s9909_s29 + $0x1] sm:$0xff] %vm5951_vm11, %v5943_v27  ;;  %vm6034_vm11 = vcmask 647744  }
 0x664   : > { %v5861_v0 = vpop.permute.xlu2 %5860  ;;  %6006 = vst.msk [vmem:[%s9909_s29] sm:$0xff] %vm6005_vm12, %v6000_v35  ;;  %v6024_v62 = vpop.permute.xlu0 %6023 }
 0x665   : > { %6031 = vst.msk [vmem:[%s9909_s29 - $0x1] sm:$0xfe] %vm6030_vm13, %v6022_v29  ;;  %vm6060_vm13 = vcmask 720512  }
 0x666   : > { %6059 = vst.msk [vmem:[%s9909_s29 - $0x2] sm:$0xfc] %vm6058_vm14, %v6050_v61  ;;  %vm6088_vm14 = vcmask 786112  }
 0x667   : > { %6087 = vst.msk [vmem:[%s9909_s29 - $0x3] sm:$0xf8] %vm6086_vm15, %v6078_v7  ;;  %vm6116_vm15 = vcmask 851712  }
 0x668   : > { %6115 = vst.msk [vmem:[%s9909_s29 - $0x4] sm:$0xf0] %vm6114_vm0, %v6106_v45  ;;  %vm6062_vm0 = vcmask 714368  }
 0x669   : > { %6143 = vst.msk [vmem:[%s9909_s29 - $0x5] sm:$0xe0] %vm6142_vm1, %v6134_v15  ;;  %vm6198_vm1 = vcmask 1048519  }
 0x66a   : > { %6171 = vst.msk [vmem:[%s9909_s29 - $0x6] sm:$0xc0] %vm6170_vm2, %v6162_v23  ;;  %vm6172_vm2 = vcmask 982912  }
 0x66b   : > { %v5777_v38 = vpop.permute.xlu1 %5776 }
 0x66c   : > { %5786 = vst.msk [vmem:[%s9909_s29 + $0xf] sm:$0x1] %vm5785_vm3, %v5777_v38  ;;  %v5889_v5 = vpop.permute.xlu2 %5888  ;;  %vm6200_vm3 = vcmask 1048512   ;;  %v6192_v12 = vpop.permute.xlu0 %6191 }
 0x66d   : > { %5814 = vst.msk [vmem:[%s9909_s29 + $0xe] sm:$0x3] %vm5813_vm5, %v5805_v58  ;;  %vm6090_vm5 = vcmask 780992  }
 0x66e   : > { %5842 = vst.msk [vmem:[%s9909_s29 + $0xd] sm:$0x7] %vm5841_vm4, %v5833_v8  ;;  %vm6118_vm4 = vcmask 847616  }
 0x66f   : > { %5870 = vst.msk [vmem:[%s9909_s29 + $0xc] sm:$0xf] %vm5869_vm6, %v5861_v0  ;;  %vm6146_vm6 = vcmask 914240  }
 0x670   : > { %5898 = vst.msk [vmem:[%s9909_s29 + $0xb] sm:$0x1f] %vm5897_vm7, %v5889_v5  ;;  %vm6174_vm7 = vcmask 980864  }
 0x673   : > { %v6026_v26 = vpop.permute.xlu1 %6025 }
 0x674   : > { %v5917_v42 = vpop.permute.xlu2 %5916 }
 0x675   : > { %5926 = vst.msk [vmem:[%s9909_s29 + $0xa] sm:$0x3f] %vm5925_vm8, %v5917_v42  ;;  %vm6202_vm8 = vcmask 1047488  }
 0x67b   : > { %v6002_v32 = vpop.permute.xlu1 %6001 }
 0x67c   : > { %v5945_v59 = vpop.permute.xlu2 %5944 }
 0x67d   : > { %5954 = vst.msk [vmem:[%s9909_s29 + $0x9] sm:$0x7f] %vm5953_vm9, %v5945_v59 }
 0x67e   : > { %6007 = vst.msk [vmem:[%s9909_s29 + $0x8] sm:$0xff] %vm6005_vm12, %v6002_v32  ;;  %vm6144_vm12 = vcmask 917312  }
 0x67f   : > { %6033 = vst.msk [vmem:[%s9909_s29 + $0x7] sm:$0xff] %vm6032_vm10, %v6024_v62 }
 0x680   : > { %6035 = vst.msk [vmem:[%s9909_s29 + $0xf] sm:$0x1] %vm6034_vm11, %v6026_v26 }
 0x681   : > { %6061 = vst.msk [vmem:[%s9909_s29 + $0x6] sm:$0xff] %vm6060_vm13, %v10188_v49 }
 0x682   : > { %6089 = vst.msk [vmem:[%s9909_s29 + $0x5] sm:$0xff] %vm6088_vm14, %v10186_v19 }
 0x683   : > { %v6054_v17 = vpop.permute.xlu1 %6053  ;;  %6117 = vst.msk [vmem:[%s9909_s29 + $0x4] sm:$0xff] %vm6116_vm15, %v10184_v34 }
 0x684   : > { %6063 = vst.msk [vmem:[%s9909_s29 + $0xe] sm:$0x3] %vm6062_vm0, %v6054_v17  ;;  %v6190_v6 = vpop.permute.xlu2 %6189 }
 0x685   : > { %6199 = vst.msk [vmem:[%s9909_s29 - $0x7] sm:$0x80] %vm6198_vm1, %v6190_v6 }
 0x686   : > { %6145 = vst.msk [vmem:[%s9909_s29 + $0x3] sm:$0xff] %vm6144_vm12, %v10182_v21 }
 0x687   : > { %6173 = vst.msk [vmem:[%s9909_s29 + $0x2] sm:$0xff] %vm6172_vm2, %v10179_v54 }
 0x688   : > { %6201 = vst.msk [vmem:[%s9909_s29 + $0x1] sm:$0xff] %vm6200_vm3, %v6192_v12 }
 0x68b   : > { %v6082_v46 = vpop.permute.xlu1 %6081 }
 0x68c   : > { %6091 = vst.msk [vmem:[%s9909_s29 + $0xd] sm:$0x7] %vm6090_vm5, %v6082_v46 }
 0x693   : > { %v6110_v63 = vpop.permute.xlu1 %6109 }
 0x694   : > { %6119 = vst.msk [vmem:[%s9909_s29 + $0xc] sm:$0xf] %vm6118_vm4, %v6110_v63 }
 0x69b   : > { %v6138_v44 = vpop.permute.xlu1 %6137 }
 0x69c   : > { %6147 = vst.msk [vmem:[%s9909_s29 + $0xb] sm:$0x1f] %vm6146_vm6, %v6138_v44 }
 0x6a3   : > { %v6166_v1 = vpop.permute.xlu1 %6165 }
 0x6a4   : > { %6175 = vst.msk [vmem:[%s9909_s29 + $0xa] sm:$0x3f] %vm6174_vm7, %v6166_v1 }
 0x6ab   : > { %v6194_v25 = vpop.permute.xlu1 %6193 }
 0x6ac   : > { %6203 = vst.msk [vmem:[%s9909_s29 + $0x9] sm:$0x7f] %vm6202_vm8, %v6194_v25 }
 0x6ad PF: > { %s17_s24 = sadd.s32 1, %s6954_s24  }
 0x6ae   : > { %p14_p4 = scmp.ge.s32.totalorder %s17_s24, 4  }
 0x6b0   :  { %16 = sbr.rel (!%p14_p4) target bundleno = 1 (0x1), region = 100 }

</bundles_post_ra>
